<compile_context>
chip_gen: v5e
topology: v5e:2x2
jax: 0.10.0
libtpu: 0.0.40
codegen_flags: <defaults>
</compile_context>

<pallas_src>
import functools

import jax
import jax.numpy as jnp
from jax.experimental import pallas as pl
from jax.experimental.pallas import tpu as pltpu


def _round_up(x, m):
    return ((x + m - 1) // m) * m


def _dynamic_routing_kernel(x_ref, w_ref, o_ref, *, in_caps, out_caps, out_dim,
                            routing_iters):
    # x_ref: [in_caps, in_dim, TL]                (lane tile TL, bf16/f32)
    # w_ref: [in_caps, out_caps*out_dim, in_dim]  (grid-invariant, pre-cast)
    # o_ref: [out_caps, out_dim, TL]
    x = x_ref[...]
    w = w_ref[...]
    tl = x.shape[-1]

    # u_hat[i, j*d, l] = sum_k W[j, i, d, k] * x[i, k, l]  (batched over i)
    # MXU matmul: low-precision operands, f32 accumulation.
    u = jax.lax.dot_general(
        w, x,
        dimension_numbers=(((2,), (1,)), ((0,), (0,))),
        preferred_element_type=jnp.float32)              # [in_caps, J*D, TL]
    # Splitting the sublane axis (J*D -> J, D) is layout-preserving here since
    # out_dim % 8 == 0 and TL % 128 == 0 -> no VMEM relayout copy of u_hat.
    u_hat = u.reshape(in_caps, out_caps, out_dim, tl)    # f32

    def squash(s):
        # s: [out_caps, out_dim, TL]; squash along out_dim (axis 1).
        # Exact f32 math: the approximate reciprocal's error amplifies through
        # the routing feedback loop, so keep this precise (it is cheap).
        sq = jnp.sum(s * s, axis=1, keepdims=True)
        scale = sq / (1.0 + sq) * jax.lax.rsqrt(sq + 1e-8)
        return s * scale

    def routing_step(b):
        # b: [in_caps, out_caps, TL]; softmax over out_caps (axis 1).
        b_max = jnp.max(b, axis=1, keepdims=True)
        e = jnp.exp(b - b_max)
        c = e / jnp.sum(e, axis=1, keepdims=True)        # exact divide
        s = jnp.sum(c[:, :, None, :] * u_hat, axis=0)    # [out_caps, out_dim, TL]
        return squash(s)

    def routing_iter(_, b):
        v = routing_step(b)
        # agreement[i, j, l] = sum_d u_hat[i, j, d, l] * v[j, d, l]
        return b + jnp.sum(u_hat * v[None, :, :, :], axis=2)

    b0 = jnp.zeros((in_caps, out_caps, tl), jnp.float32)
    b = jax.lax.fori_loop(0, routing_iters - 1, routing_iter, b0, unroll=True)
    v = routing_step(b)                                  # [out_caps, out_dim, TL]
    o_ref[...] = v.astype(o_ref.dtype)


def dynamic_routing(x, W, routing_iters=3, *, lane_tile=512,
                    matmul_dtype=jnp.bfloat16):
    """x: [B, in_caps, in_dim, S], W: [out_caps, in_caps, out_dim, in_dim].

    Returns [B, out_caps, out_dim, S] (same as the PyTorch module).
    """
    B, in_caps, in_dim, S = x.shape
    out_caps, w_ic, out_dim, w_id = W.shape
    assert (w_ic, w_id) == (in_caps, in_dim)
    out_dtype = x.dtype
    mm_dtype = x.dtype if matmul_dtype is None else matmul_dtype

    # --- layout plumbing (wrapper-side, outside the kernel) ------------------
    # Every (batch, seq) column routes independently, so fold batch into the
    # trailing lane axis to get >=128 live lanes per vreg / per store.
    lanes = B * S
    x_flat = jnp.transpose(x, (1, 2, 0, 3)).reshape(in_caps, in_dim, lanes)

    tl = min(_round_up(lane_tile, 128), _round_up(lanes, 128))
    lanes_p = _round_up(lanes, tl)
    if lanes_p != lanes:
        # Zero-padded columns route to zero capsules and are sliced off below.
        x_flat = jnp.pad(x_flat, ((0, 0), (0, 0), (0, lanes_p - lanes)))
    x_flat = x_flat.astype(mm_dtype)

    # W -> [in_caps, out_caps*out_dim, in_dim]: one batched MXU matmul over
    # in_caps.  Dtype cast hoisted here (grid-invariant block, no per-step cast).
    w_k = jnp.transpose(W, (1, 0, 2, 3)).reshape(
        in_caps, out_caps * out_dim, in_dim).astype(mm_dtype)

    kernel = functools.partial(
        _dynamic_routing_kernel, in_caps=in_caps, out_caps=out_caps,
        out_dim=out_dim, routing_iters=routing_iters)

    out_flat = pl.pallas_call(
        kernel,
        out_shape=jax.ShapeDtypeStruct((out_caps, out_dim, lanes_p), out_dtype),
        grid_spec=pltpu.PrefetchScalarGridSpec(
            num_scalar_prefetch=0,
            grid=(lanes_p // tl,),
            in_specs=[
                pl.BlockSpec((in_caps, in_dim, tl), lambda t: (0, 0, t)),
                # Weight block is grid-invariant (constant index_map), so it is
                # only DMA'd when its block index changes (i.e. once).
                pl.BlockSpec((in_caps, out_caps * out_dim, in_dim),
                             lambda t: (0, 0, 0)),
            ],
            out_specs=pl.BlockSpec((out_caps, out_dim, tl),
                                   lambda t: (0, 0, t)),
        ),
        compiler_params=pltpu.CompilerParams(
            dimension_semantics=("parallel",)),
    )(x_flat, w_k)

    out = out_flat[:, :, :lanes].reshape(out_caps, out_dim, B, S)
    return jnp.transpose(out, (2, 0, 1, 3))


def dynamic_routing_ref(x, W, routing_iters=3, matmul_dtype=None):
    """Pure-JAX reference implementing the intended PyTorch semantics."""
    xm = x if matmul_dtype is None else x.astype(matmul_dtype)
    Wm = W if matmul_dtype is None else W.astype(matmul_dtype)
    # u_hat: [B, out_caps, in_caps, S, out_dim], f32-accumulated.
    u_hat = jnp.einsum('jidk,biks->bjisd', Wm, xm,
                       preferred_element_type=jnp.float32)
    B, out_caps, in_caps, S, out_dim = u_hat.shape

    def squash(s):
        sq = jnp.sum(s * s, axis=-1, keepdims=True)
        return sq / (1.0 + sq) * s / jnp.sqrt(sq + 1e-8)

    b = jnp.zeros((B, out_caps, in_caps, S), jnp.float32)
    v = None
    for i in range(routing_iters):
        c = jax.nn.softmax(b, axis=1)
        s = jnp.sum(c[..., None] * u_hat, axis=2)            # [B, J, S, D]
        v = squash(s)
        if i < routing_iters - 1:
            b = b + jnp.sum(u_hat * v[:, :, None, :, :], axis=-1)
    return jnp.transpose(v, (0, 1, 3, 2))                    # [B, J, D, S]


if __name__ == "__main__":
    key = jax.random.PRNGKey(0)
    kx, kw = jax.random.split(key)

    B, in_caps, in_dim, out_caps, out_dim, S = 16, 8, 8, 4, 16, 16
    routing_iters = 3

    x = jax.random.normal(kx, (B, in_caps, in_dim, S), dtype=jnp.float32)
    W = jax.random.normal(kw, (out_caps, in_caps, out_dim, in_dim),
                          dtype=jnp.float32)

    # lane_tile=128 with B*S=256 fused lanes -> a 2-step "parallel" grid, which
    # exercises the pipelined / megacore path even at this small size.
    out = dynamic_routing(x, W, routing_iters=routing_iters, lane_tile=128)
    out = jax.block_until_ready(out)

    # Compare against the pure-JAX reference using the same bf16 matmul
    # operands (f32 accumulation; routing math is exact f32 in both paths, so
    # the only residual difference is accumulation order / transcendental ulps).
    ref = dynamic_routing_ref(x, W, routing_iters=routing_iters,
                              matmul_dtype=jnp.bfloat16)

    assert out.shape == (B, out_caps, out_dim, S), out.shape
    err = float(jnp.max(jnp.abs(out - ref)))
    assert jnp.allclose(out, ref, rtol=1e-2, atol=1e-2), err
    print("KERNEL_OK")
</pallas_src>

<mosaic_0001>
module attributes {stable_mosaic.version = 11 : i64} {
  func.func @_dynamic_routing_kernel(%arg0: i32, %arg1: memref<8x8x128xbf16, #tpu.memory_space<vmem>>, %arg2: memref<8x64x8xbf16, #tpu.memory_space<vmem>>, %arg3: memref<4x16x128xf32, #tpu.memory_space<vmem>>) attributes {dimension_semantics = [#tpu.dimension_semantics<parallel>], iteration_bounds = array<i64: 2>, scalar_prefetch = 0 : i64, scratch_operands = 0 : i64, tpu.core_type = #tpu.core_type<tc>, window_params = [{transform_indices = @transform_0, window_bounds = array<i64: 8, 8, 128>}, {pipeline_mode = #tpu.pipeline_mode<synchronous>, transform_indices = @transform_1, window_bounds = array<i64: 8, 64, 8>}, {transform_indices = @transform_2, window_bounds = array<i64: 4, 16, 128>}]} {
    %c0 = arith.constant 0 : index
    %c0_0 = arith.constant 0 : index
    %c0_1 = arith.constant 0 : index
    %0 = vector.load %arg1[%c0, %c0_0, %c0_1] : memref<8x8x128xbf16, #tpu.memory_space<vmem>>, vector<8x8x128xbf16>
    %c0_2 = arith.constant 0 : index
    %c0_3 = arith.constant 0 : index
    %c0_4 = arith.constant 0 : index
    %1 = vector.load %arg2[%c0_2, %c0_3, %c0_4] : memref<8x64x8xbf16, #tpu.memory_space<vmem>>, vector<8x64x8xbf16>
    %cst = arith.constant dense<0.000000e+00> : vector<8x64x128xf32>
    %2 = tpu.matmul %1, %0, %cst {dimension_numbers = #tpu.dot_dimension_numbers<[2], [1], [1], [2], [0, 0, 0, 1, 1, 2], [0], [0]>} : vector<8x64x8xbf16>, vector<8x8x128xbf16>, vector<8x64x128xf32> -> vector<8x64x128xf32>
    %3 = vector.shape_cast %2 : vector<8x64x128xf32> to vector<8x4x16x128xf32>
    %cst_5 = arith.constant 0.000000e+00 : f32
    %4 = vector.broadcast %cst_5 : f32 to vector<8x4x128xf32>
    %c0_i32 = arith.constant 0 : i32
    %cst_6 = arith.constant dense<0xFF800000> : vector<8x128xf32>
    %5 = vector.multi_reduction <maximumf>, %4, %cst_6 [1] : vector<8x4x128xf32> to vector<8x128xf32>
    %6 = vector.shape_cast %5 : vector<8x128xf32> to vector<8x1x128xf32>
    %7 = vector.broadcast %6 : vector<8x1x128xf32> to vector<8x4x128xf32>
    %8 = arith.subf %4, %7 : vector<8x4x128xf32>
    %9 = math.exp %8 : vector<8x4x128xf32>
    %cst_7 = arith.constant dense<0.000000e+00> : vector<8x128xf32>
    %10 = vector.multi_reduction <add>, %9, %cst_7 [1] : vector<8x4x128xf32> to vector<8x128xf32>
    %11 = vector.shape_cast %10 : vector<8x128xf32> to vector<8x1x128xf32>
    %12 = vector.broadcast %11 : vector<8x1x128xf32> to vector<8x4x128xf32>
    %13 = arith.divf %9, %12 : vector<8x4x128xf32>
    %14 = vector.shape_cast %13 : vector<8x4x128xf32> to vector<8x4x1x128xf32>
    %15 = vector.broadcast %14 : vector<8x4x1x128xf32> to vector<8x4x16x128xf32>
    %16 = arith.mulf %15, %3 : vector<8x4x16x128xf32>
    %cst_8 = arith.constant dense<0.000000e+00> : vector<4x16x128xf32>
    %17 = vector.multi_reduction <add>, %16, %cst_8 [0] : vector<8x4x16x128xf32> to vector<4x16x128xf32>
    %18 = arith.mulf %17, %17 : vector<4x16x128xf32>
    %cst_9 = arith.constant dense<0.000000e+00> : vector<4x128xf32>
    %19 = vector.multi_reduction <add>, %18, %cst_9 [1] : vector<4x16x128xf32> to vector<4x128xf32>
    %20 = vector.shape_cast %19 : vector<4x128xf32> to vector<4x1x128xf32>
    %cst_10 = arith.constant 1.000000e+00 : f32
    %21 = vector.broadcast %cst_10 : f32 to vector<4x1x128xf32>
    %22 = arith.addf %21, %20 : vector<4x1x128xf32>
    %23 = arith.divf %20, %22 : vector<4x1x128xf32>
    %cst_11 = arith.constant 9.99999993E-9 : f32
    %24 = vector.broadcast %cst_11 : f32 to vector<4x1x128xf32>
    %25 = arith.addf %20, %24 : vector<4x1x128xf32>
    %26 = math.rsqrt %25 : vector<4x1x128xf32>
    %27 = arith.mulf %23, %26 : vector<4x1x128xf32>
    %28 = vector.broadcast %27 : vector<4x1x128xf32> to vector<4x16x128xf32>
    %29 = arith.mulf %17, %28 : vector<4x16x128xf32>
    %30 = vector.shape_cast %29 : vector<4x16x128xf32> to vector<1x4x16x128xf32>
    %31 = vector.broadcast %30 : vector<1x4x16x128xf32> to vector<8x4x16x128xf32>
    %32 = arith.mulf %3, %31 : vector<8x4x16x128xf32>
    %cst_12 = arith.constant dense<0.000000e+00> : vector<8x4x128xf32>
    %33 = vector.multi_reduction <add>, %32, %cst_12 [2] : vector<8x4x16x128xf32> to vector<8x4x128xf32>
    %34 = arith.addf %4, %33 : vector<8x4x128xf32>
    %c1_i32 = arith.constant 1 : i32
    %cst_13 = arith.constant dense<0xFF800000> : vector<8x128xf32>
    %35 = vector.multi_reduction <maximumf>, %34, %cst_13 [1] : vector<8x4x128xf32> to vector<8x128xf32>
    %36 = vector.shape_cast %35 : vector<8x128xf32> to vector<8x1x128xf32>
    %37 = vector.broadcast %36 : vector<8x1x128xf32> to vector<8x4x128xf32>
    %38 = arith.subf %34, %37 : vector<8x4x128xf32>
    %39 = math.exp %38 : vector<8x4x128xf32>
    %cst_14 = arith.constant dense<0.000000e+00> : vector<8x128xf32>
    %40 = vector.multi_reduction <add>, %39, %cst_14 [1] : vector<8x4x128xf32> to vector<8x128xf32>
    %41 = vector.shape_cast %40 : vector<8x128xf32> to vector<8x1x128xf32>
    %42 = vector.broadcast %41 : vector<8x1x128xf32> to vector<8x4x128xf32>
    %43 = arith.divf %39, %42 : vector<8x4x128xf32>
    %44 = vector.shape_cast %43 : vector<8x4x128xf32> to vector<8x4x1x128xf32>
    %45 = vector.broadcast %44 : vector<8x4x1x128xf32> to vector<8x4x16x128xf32>
    %46 = arith.mulf %45, %3 : vector<8x4x16x128xf32>
    %cst_15 = arith.constant dense<0.000000e+00> : vector<4x16x128xf32>
    %47 = vector.multi_reduction <add>, %46, %cst_15 [0] : vector<8x4x16x128xf32> to vector<4x16x128xf32>
    %48 = arith.mulf %47, %47 : vector<4x16x128xf32>
    %cst_16 = arith.constant dense<0.000000e+00> : vector<4x128xf32>
    %49 = vector.multi_reduction <add>, %48, %cst_16 [1] : vector<4x16x128xf32> to vector<4x128xf32>
    %50 = vector.shape_cast %49 : vector<4x128xf32> to vector<4x1x128xf32>
    %cst_17 = arith.constant 1.000000e+00 : f32
    %51 = vector.broadcast %cst_17 : f32 to vector<4x1x128xf32>
    %52 = arith.addf %51, %50 : vector<4x1x128xf32>
    %53 = arith.divf %50, %52 : vector<4x1x128xf32>
    %cst_18 = arith.constant 9.99999993E-9 : f32
    %54 = vector.broadcast %cst_18 : f32 to vector<4x1x128xf32>
    %55 = arith.addf %50, %54 : vector<4x1x128xf32>
    %56 = math.rsqrt %55 : vector<4x1x128xf32>
    %57 = arith.mulf %53, %56 : vector<4x1x128xf32>
    %58 = vector.broadcast %57 : vector<4x1x128xf32> to vector<4x16x128xf32>
    %59 = arith.mulf %47, %58 : vector<4x16x128xf32>
    %60 = vector.shape_cast %59 : vector<4x16x128xf32> to vector<1x4x16x128xf32>
    %61 = vector.broadcast %60 : vector<1x4x16x128xf32> to vector<8x4x16x128xf32>
    %62 = arith.mulf %3, %61 : vector<8x4x16x128xf32>
    %cst_19 = arith.constant dense<0.000000e+00> : vector<8x4x128xf32>
    %63 = vector.multi_reduction <add>, %62, %cst_19 [2] : vector<8x4x16x128xf32> to vector<8x4x128xf32>
    %64 = arith.addf %34, %63 : vector<8x4x128xf32>
    %cst_20 = arith.constant dense<0xFF800000> : vector<8x128xf32>
    %65 = vector.multi_reduction <maximumf>, %64, %cst_20 [1] : vector<8x4x128xf32> to vector<8x128xf32>
    %66 = vector.shape_cast %65 : vector<8x128xf32> to vector<8x1x128xf32>
    %67 = vector.broadcast %66 : vector<8x1x128xf32> to vector<8x4x128xf32>
    %68 = arith.subf %64, %67 : vector<8x4x128xf32>
    %69 = math.exp %68 : vector<8x4x128xf32>
    %cst_21 = arith.constant dense<0.000000e+00> : vector<8x128xf32>
    %70 = vector.multi_reduction <add>, %69, %cst_21 [1] : vector<8x4x128xf32> to vector<8x128xf32>
    %71 = vector.shape_cast %70 : vector<8x128xf32> to vector<8x1x128xf32>
    %72 = vector.broadcast %71 : vector<8x1x128xf32> to vector<8x4x128xf32>
    %73 = arith.divf %69, %72 : vector<8x4x128xf32>
    %74 = vector.shape_cast %73 : vector<8x4x128xf32> to vector<8x4x1x128xf32>
    %75 = vector.broadcast %74 : vector<8x4x1x128xf32> to vector<8x4x16x128xf32>
    %76 = arith.mulf %75, %3 : vector<8x4x16x128xf32>
    %cst_22 = arith.constant dense<0.000000e+00> : vector<4x16x128xf32>
    %77 = vector.multi_reduction <add>, %76, %cst_22 [0] : vector<8x4x16x128xf32> to vector<4x16x128xf32>
    %78 = arith.mulf %77, %77 : vector<4x16x128xf32>
    %cst_23 = arith.constant dense<0.000000e+00> : vector<4x128xf32>
    %79 = vector.multi_reduction <add>, %78, %cst_23 [1] : vector<4x16x128xf32> to vector<4x128xf32>
    %80 = vector.shape_cast %79 : vector<4x128xf32> to vector<4x1x128xf32>
    %cst_24 = arith.constant 1.000000e+00 : f32
    %81 = vector.broadcast %cst_24 : f32 to vector<4x1x128xf32>
    %82 = arith.addf %81, %80 : vector<4x1x128xf32>
    %83 = arith.divf %80, %82 : vector<4x1x128xf32>
    %cst_25 = arith.constant 9.99999993E-9 : f32
    %84 = vector.broadcast %cst_25 : f32 to vector<4x1x128xf32>
    %85 = arith.addf %80, %84 : vector<4x1x128xf32>
    %86 = math.rsqrt %85 : vector<4x1x128xf32>
    %87 = arith.mulf %83, %86 : vector<4x1x128xf32>
    %88 = vector.broadcast %87 : vector<4x1x128xf32> to vector<4x16x128xf32>
    %89 = arith.mulf %77, %88 : vector<4x16x128xf32>
    %c0_26 = arith.constant 0 : index
    %c0_27 = arith.constant 0 : index
    %c0_28 = arith.constant 0 : index
    %90 = vector.load %arg3[%c0_26, %c0_27, %c0_28] : memref<4x16x128xf32, #tpu.memory_space<vmem>>, vector<4x16x128xf32>
    tpu.vector_store %arg3[%c0_26, %c0_27, %c0_28], %89 {strides = array<i32>} : memref<4x16x128xf32, #tpu.memory_space<vmem>>, vector<4x16x128xf32>,
    return
  }
  func.func @transform_0(%arg0: i32) -> (i32, i32, i32) {
    %c0_i32 = arith.constant 0 : i32
    %c0_i32_0 = arith.constant 0 : i32
    %c0_i32_1 = arith.constant 0 : i32
    return %c0_i32, %c0_i32_0, %arg0 : i32, i32, i32
  }
  func.func @transform_1(%arg0: i32) -> (i32, i32, i32) {
    %c0_i32 = arith.constant 0 : i32
    %c0_i32_0 = arith.constant 0 : i32
    %c0_i32_1 = arith.constant 0 : i32
    %c0_i32_2 = arith.constant 0 : i32
    return %c0_i32, %c0_i32_0, %c0_i32_1 : i32, i32, i32
  }
  func.func @transform_2(%arg0: i32) -> (i32, i32, i32) {
    %c0_i32 = arith.constant 0 : i32
    %c0_i32_0 = arith.constant 0 : i32
    %c0_i32_1 = arith.constant 0 : i32
    return %c0_i32, %c0_i32_0, %arg0 : i32, i32, i32
  }
}

</mosaic_0001>

<bundles_post_ra>
// kernel: tpu_custom_call.1
= control target key start
LH: loop header
LB: loop body
LE: loop exit
PB: predicated region body
PF: predicated region fallthrough
CT: control target
= control target key end

     0   :  { %7 = vsyncpa [#allocation4], 0  ;;  %s6792_s0 = inlined_call_operand.vmem [shape: bf16[8,8,256], index: 0, kind: input, shape index: {}]   ;;  %s6793_s1 = inlined_call_operand.vmem [shape: bf16[8,64,8], index: 1, kind: input, shape index: {}]   ;;  %s6794_s2 = inlined_call_operand.hbm [shape: f32[4,16,256], index: 2, kind: output, shape index: {}]  }
   0x1   :  { %9 = vsyncpa [#allocation4 + $0x1], 0  ;;  %s3820_s9 = smov 0   ;;  %s3822_s10 = smov 0  }
   0x2   :  { %s3824_s11 = smov 0   ;;  %s3826_s12 = smov 0  }
   0x3 LB: > { %s3279_s13 = sadd.s32 4294967295, %s3799_s12   ;;  %s3280_s14 = sadd.s32 4294967294, %s3799_s12   ;;  %s3799_s12 = sphi %s3826_s12, %s7488_s12   ;;  %s3795_s11 = sphi %s3824_s11, %s7487_s11   ;;  %s3791_s10 = sphi %s3822_s10, %s7486_s10   ;;  %s3787_s9 = sphi %s3820_s9, %s7485_s9  }
   0x4   : > { %s3843_s15 = sadd.s32 1, %s3799_s12   ;;  %s22_s16 = sadd.s32 1, %s3795_s11 }
   0x5   : > { %s19_s17 = ssub.s32 %s3799_s12, %s3843_s15  ;;  %p29_p0 = scmp.ne.s32.totalorder %s3795_s11, %s3791_s10 }
   0x6   : > { %p20_p1 = scmp.eq.s32.totalorder %s19_s17, 0  ;;  %p30_p2 = scmp.eq.s32.totalorder %s3799_s12, 0 }
   0x7   : > { %p80_p3 = scmp.eq.s32.totalorder %s3279_s13, 1  ;;  %p85_p4 = scmp.ne.s32.totalorder %s3791_s10, %s3787_s9 }
   0x8   : > { %s3856_s18 = scalar_select %p20_p1, %s3795_s11, %s22_s16  }
   0x9   : > { %p31_p5 = por %p30_p2, %p29_p0  ;;  %p3858_p6 = por %p80_p3, %p29_p0 }
   0xa   : > { %p86_p7 = scmp.eq.s32.totalorder %s3280_s14, 1  ;;  %p3282_p9 = scmp.ge.s32.totalorder %s3799_s12, 2 }
   0xc   : > { %p3862_p8 = por %p86_p7, %p85_p4  ;;  %105 = sbr.rel (%p3282_p9) target bundleno = 29 (0x1d), region = 20 }
  0x11   : > { %108 = sbr.rel (!%p31_p5) target bundleno = 29 (0x1d), region = 24  ;;  %s110_s21 = sand.u32 (%p31_p5), 1, %s3795_s11  }
  0x12   : > { %s3284_s22 = sshll.u32 (%p31_p5), %s3799_s12, 2  ;;  %s3283_s23 = sshll.u32 (%p31_p5), %s110_s21, 5 }
  0x13   : > { %s114_s26 = scalar_lea.vmem (%p31_p5), %s6792_s0, %s3284_s22  ;;  %s112_s27 = scalar_lea.vmem (%p31_p5), [#allocation2], %s3283_s23 }
  0x14   : > { %v131_v0 = vld [vmem:[%s114_s26] sm:$0xf] (%p31_p5)  ;;  %v133_v1 = vld [vmem:[%s114_s26 + $0x8] sm:$0xf] (%p31_p5)  ;;  %v135_v2 = vld [vmem:[%s114_s26 + $0x10] sm:$0xf] (%p31_p5) }
  0x15   : > { %132 = vst [vmem:[%s112_s27] sm:$0xf] (%p31_p5), %v131_v0  ;;  %v137_v3 = vld [vmem:[%s114_s26 + $0x18] sm:$0xf] (%p31_p5)  ;;  %v139_v4 = vld [vmem:[%s114_s26 + $0x20] sm:$0xf] (%p31_p5) }
  0x16   : > { %134 = vst [vmem:[%s112_s27 + $0x4] sm:$0xf] %v133_v1  ;;  %v141_v5 = vld [vmem:[%s114_s26 + $0x28] sm:$0xf]  ;;  %v143_v6 = vld [vmem:[%s114_s26 + $0x30] sm:$0xf] }
  0x17   : > { %136 = vst [vmem:[%s112_s27 + $0x8] sm:$0xf] %v135_v2  ;;  %v145_v7 = vld [vmem:[%s114_s26 + $0x38] sm:$0xf] }
  0x18   : > { %138 = vst [vmem:[%s112_s27 + $0xc] sm:$0xf] %v137_v3 }
  0x19   : > { %140 = vst [vmem:[%s112_s27 + $0x10] sm:$0xf] %v139_v4 }
  0x1a   : > { %142 = vst [vmem:[%s112_s27 + $0x14] sm:$0xf] %v141_v5 }
  0x1b   : > { %144 = vst [vmem:[%s112_s27 + $0x18] sm:$0xf] %v143_v6 }
  0x1c   : > { %146 = vst [vmem:[%s112_s27 + $0x1c] sm:$0xf] %v145_v7 }
  0x1d PF: > { %p3285_p10 = scmp.ge.s32.totalorder %s3799_s12, 1  ;;  %p185_p11 = scmp.lt.s32.totalorder %s3799_s12, 3 }
  0x1f   : > { %p186_p12 = pnand %p3285_p10, %p185_p11 }
  0x21   : > { %189 = sbr.rel (%p186_p12) target bundleno = 850 (0x352), region = 65 }
  0x26   : > { %s3877_s28 = sand.u32 1, %s3791_s10   ;;  %vm319_vm0 = vcmask 1043456   ;;  %v3452_v8 = vld [vmem:[%s6793_s1] sm:$0xff]  ;;  %vm306_vm1 = vcmask 64512   ;;  %v3453_v28 = vld [vmem:[%s6793_s1 + $0x8] sm:$0xff]  ;;  %v3454_v32 = vld [vmem:[%s6793_s1 + $0x10] sm:$0xff] }
  0x27   : > { %s3286_s29 = sshll.u32 %s3877_s28, 5  ;;  %v3456_v9 = vld [vmem:[%s6793_s1 + $0x20] sm:$0xff]  ;;  %v3457_v29 = vld [vmem:[%s6793_s1 + $0x28] sm:$0xff]  ;;  %v3458_v33 = vld [vmem:[%s6793_s1 + $0x30] sm:$0xff]  ;;  %v3801_v58 = vmov 0.0   ;;  %s3287_s22 = sshll.u32 %s3877_s28, 6 }
  0x28   : > { %s194_s6 = scalar_lea.vmem [#allocation2], %s3286_s29  ;;  %v3460_v12 = vld [vmem:[%s6793_s1 + $0x40] sm:$0xff]  ;;  %v3461_v30 = vld [vmem:[%s6793_s1 + $0x48] sm:$0xff]  ;;  %v3462_v34 = vld [vmem:[%s6793_s1 + $0x50] sm:$0xff]  ;;  %v800_v59 = vsel %vm319_vm0, 1.0, %v3801_v58  ;;  %s3449_s23 = sshll.u32 %s3279_s13, 3 }
  0x29   : > { %v214_v10 = vld [vmem:[%s194_s6] sm:$0xf]  ;;  %v215_v11 = vld [vmem:[%s194_s6 + $0x4] sm:$0xf]  ;;  %v216_v16 = vld [vmem:[%s194_s6 + $0x8] sm:$0xf]  ;;  %s3208_s25 = scalar_lea.hbm %s6794_s2, %s3449_s23 }
  0x2a   : > { %v3464_v13 = vld [vmem:[%s6793_s1 + $0x60] sm:$0xff]  ;;  %v321_v14 = vsel %vm319_vm0, %v214_v10, 0  ;;  %v385_v15 = vsel %vm319_vm0, %v215_v11, 0  ;;  %v217_v17 = vld [vmem:[%s194_s6 + $0xc] sm:$0xf]  ;;  %v449_v18 = vsel %vm319_vm0, %v216_v16, 0 }
  0x2b   : > { %330 = vmatpush.bf16.msra.mxu0 %v321_v14  ;;  %394 = vmatpush.bf16.msra.mxu1 %v385_v15  ;;  %v513_v19 = vsel %vm319_vm0, %v217_v17, 0  ;;  %v220_v20 = vld [vmem:[%s194_s6 + $0x18] sm:$0xf]  ;;  %v218_v21 = vld [vmem:[%s194_s6 + $0x10] sm:$0xf]  ;;  %v3465_v31 = vld [vmem:[%s6793_s1 + $0x68] sm:$0xff] }
  0x2c   : > { %458 = vmatpush.bf16.msra.mxu2 %v449_v18  ;;  %522 = vmatpush.bf16.msra.mxu3 %v513_v19  ;;  %v705_v22 = vsel %vm319_vm0, %v220_v20, 0  ;;  %v577_v23 = vsel %vm319_vm0, %v218_v21, 0  ;;  %v221_v24 = vld [vmem:[%s194_s6 + $0x1c] sm:$0xf]  ;;  %v219_v25 = vld [vmem:[%s194_s6 + $0x14] sm:$0xf] }
  0x2d   : > { %v769_v26 = vsel %vm319_vm0, %v221_v24, 0  ;;  %v641_v27 = vsel %vm319_vm0, %v219_v25, 0  ;;  %v3466_v35 = vld [vmem:[%s6793_s1 + $0x70] sm:$0xff]  ;;  %v3455_v36 = vld [vmem:[%s6793_s1 + $0x18] sm:$0xff]  ;;  %v3468_v40 = vld [vmem:[%s6793_s1 + $0x80] sm:$0xff]  ;;  %v801_v60 = vrot.slane %v800_v59, 4 }
  0x2e   : > { %3304 = vmatmul.msk.bf16.vlgmr.msra.gmra.mxu0 %vm306_vm1, %v3452_v8  ;;  %3324 = vmatmul.msk.bf16.vlgmr.msra.gmra.mxu1 %vm306_vm1, %v3456_v9  ;;  %v3459_v37 = vld [vmem:[%s6793_s1 + $0x38] sm:$0xff]  ;;  %v3472_v41 = vld [vmem:[%s6793_s1 + $0xa0] sm:$0xff]  ;;  %v3469_v44 = vld [vmem:[%s6793_s1 + $0x88] sm:$0xff]  ;;  %s212_s26 = scalar_lea.vmem [#allocation3], %s3287_s22  ;;  %s6755_s29 = sshll.u32 %s3208_s25, 4  ;;  %s3212_s29 = int_to_ptr.hbm [resolvable:$true] %s6755_s29 }
  0x2f   : > { %586 = vmatpush.bf16.msrb.mxu0 %v577_v23  ;;  %3344 = vmatmul.msk.bf16.vlgmr.msra.gmra.mxu2 %vm306_vm1, %v3460_v12  ;;  %v3463_v38 = vld [vmem:[%s6793_s1 + $0x58] sm:$0xff]  ;;  %v3476_v42 = vld [vmem:[%s6793_s1 + $0xc0] sm:$0xff]  ;;  %v3473_v45 = vld [vmem:[%s6793_s1 + $0xa8] sm:$0xff]  ;;  %v802_v1 = vadd.f32 %v801_v60, %v800_v59  ;;  %s3209_s27 = sshll.u32 %s212_s26, 4  ;;  %s3198_s30 = scalar_lea.sflag [#allocation4], %s3877_s28  ;;  %s6757_s27 = int_to_ptr.vmem [resolvable:$true] %s3209_s27 }
  0x30   : > { %714 = vmatpush.bf16.msrb.mxu2 %v705_v22  ;;  %3364 = vmatmul.msk.bf16.vlgmr.msra.gmra.mxu3 %vm306_vm1, %v3464_v13  ;;  %v3467_v39 = vld [vmem:[%s6793_s1 + $0x78] sm:$0xff]  ;;  %v3480_v43 = vld [vmem:[%s6793_s1 + $0xe0] sm:$0xff]  ;;  %v3477_v46 = vld [vmem:[%s6793_s1 + $0xc8] sm:$0xff]  ;;  %s3751_s3 = sshra.s32 %s3212_s29, 4  ;;  %s3757_s7 = scalar_lea.hbm %s6794_s2, 128  ;;  %s3752_s3 = int_to_ptr.hbm [resolvable:$true] %s3751_s3 }
  0x31   : > { %778 = vmatpush.bf16.msrb.mxu3 %v769_v26  ;;  %650 = vmatpush.bf16.msrb.mxu1 %v641_v27  ;;  %v3481_v47 = vld [vmem:[%s6793_s1 + $0xe8] sm:$0xff]  ;;  %v3470_v48 = vld [vmem:[%s6793_s1 + $0x90] sm:$0xff]  ;;  %v3471_v52 = vld [vmem:[%s6793_s1 + $0x98] sm:$0xff]  ;;  %v803_v2 = vrot.slane %v802_v1, 2  ;;  %s3753_s4 = scalar_lea.hbm %s3752_s3, 64  ;;  %p3758_p2 = scmp.lt.s32.totalorder %s3752_s3, %s6794_s2 }
  0x32   : > { %v3474_v49 = vld [vmem:[%s6793_s1 + $0xb0] sm:$0xff]  ;;  %v3475_v53 = vld [vmem:[%s6793_s1 + $0xb8] sm:$0xff]  ;;  %p3754_p13 = scmp.ne.s32.totalorder %s3752_s3, %s3753_s4  ;;  %p3759_p3 = scmp.lt.s32.totalorder %s3757_s7, %s3753_s4 }
  0x33   : > { %v3478_v50 = vld [vmem:[%s6793_s1 + $0xd0] sm:$0xff]  ;;  %v3479_v54 = vld [vmem:[%s6793_s1 + $0xd8] sm:$0xff]  ;;  %v804_v7 = vadd.f32 %v803_v2, %v802_v1 }
  0x34   : > { %v3482_v51 = vld [vmem:[%s6793_s1 + $0xf0] sm:$0xff]  ;;  %v3483_v55 = vld [vmem:[%s6793_s1 + $0xf8] sm:$0xff]  ;;  %p3755_p0 = pnand %p3754_p13, %p3858_p6  ;;  %p3760_p4 = por %p3759_p3, %p3758_p2 }
  0x35   : > { %v805_v8 = vrot.slane %v804_v7, 1 }
  0x36   : > { %p3756_p1 = pneg %p3755_p0 }
  0x37   : > { %v806_v13 = vadd.f32 %v805_v8, %v804_v7 }
  0x38   : > { %p3761_p5 = pnand %p3760_p4, %p3756_p1 }
  0x39   : > { %3527 = vrcp.f32 %v806_v13  ;;  %vm812_vm2 = vweird.f32 %v806_v13 }
  0x3e   : > { %3305 = vmatmul.msk.bf16.gmra.mxu0 %vm306_vm1, %v3453_v28  ;;  %3325 = vmatmul.msk.bf16.gmra.mxu1 %vm306_vm1, %v3457_v29 }
  0x3f   : > { %3345 = vmatmul.msk.bf16.gmra.mxu2 %vm306_vm1, %v3461_v30  ;;  %v3528_v18 = vpop.eup %3527  ;;  %v818_v30 = vand.u32 2147483648, %v806_v13 }
  0x40   : > { %3365 = vmatmul.msk.bf16.gmra.mxu3 %vm306_vm1, %v3465_v31  ;;  %v808_v19 = vmul.f32 %v3528_v18, %v806_v13  ;;  %vm813_vm3 = vweird.f32 %v3528_v18 }
  0x41   : > { %vm814_vm4 = vmor %vm812_vm2, %vm813_vm3 }
  0x42   : > { %v809_v24 = vsub.f32 1.0, %v808_v19 }
  0x44   : > { %v810_v25 = vmul.f32 %v3528_v18, %v809_v24 }
  0x46   : > { %v811_v31 = vadd.f32 %v3528_v18, %v810_v25 }
  0x4e   : > { %3306 = vmatmul.msk.bf16.gmra.mxu0 %vm306_vm1, %v3454_v32  ;;  %3326 = vmatmul.msk.bf16.gmra.mxu1 %vm306_vm1, %v3458_v33  ;;  %v816_v32 = vand.u32 2147483647, %v806_v13  ;;  %v819_v33 = vor.u32 1.1754944e-38, %v818_v30 }
  0x4f   : > { %3346 = vmatmul.msk.bf16.gmra.mxu2 %vm306_vm1, %v3462_v34  ;;  %v815_v34 = vsel %vm814_vm4, %v3528_v18, %v811_v31 }
  0x50   : > { %3366 = vmatmul.msk.bf16.gmra.mxu3 %vm306_vm1, %v3466_v35  ;;  %vm817_vm5 = vcmp.eq.f32.partialorder %v816_v32, 8.507059e+37 }
  0x5e   : > { %3307 = vmatmul.msk.bf16.gmra.mxu0 %vm306_vm1, %v3455_v36  ;;  %3327 = vmatmul.msk.bf16.gmra.mxu1 %vm306_vm1, %v3459_v37 }
  0x5f   : > { %3347 = vmatmul.msk.bf16.gmra.mxu2 %vm306_vm1, %v3463_v38 }
  0x60   : > { %3367 = vmatmul.msk.bf16.gmra.mxu3 %vm306_vm1, %v3467_v39  ;;  %v4077_v39 = vsel %vm817_vm5, %v819_v33, %v815_v34 }
  0x6e   : > { %3384 = vmatmul.msk.bf16.vlgmr.msrb.gmra.mxu0 %vm306_vm1, %v3468_v40  ;;  %3404 = vmatmul.msk.bf16.vlgmr.msrb.gmra.mxu1 %vm306_vm1, %v3472_v41 }
  0x6f   : > { %3424 = vmatmul.msk.bf16.vlgmr.msrb.gmra.mxu2 %vm306_vm1, %v3476_v42 }
  0x70   : > { %3444 = vmatmul.msk.bf16.vlgmr.msrb.gmra.mxu3 %vm306_vm1, %v3480_v43 }
  0x7e   : > { %3385 = vmatmul.msk.bf16.gmra.mxu0 %vm306_vm1, %v3469_v44  ;;  %3405 = vmatmul.msk.bf16.gmra.mxu1 %vm306_vm1, %v3473_v45 }
  0x7f   : > { %3425 = vmatmul.msk.bf16.gmra.mxu2 %vm306_vm1, %v3477_v46 }
  0x80   : > { %3445 = vmatmul.msk.bf16.gmra.mxu3 %vm306_vm1, %v3481_v47 }
  0x8e   : > { %3386 = vmatmul.msk.bf16.gmra.mxu0 %vm306_vm1, %v3470_v48  ;;  %3406 = vmatmul.msk.bf16.gmra.mxu1 %vm306_vm1, %v3474_v49 }
  0x8f   : > { %3426 = vmatmul.msk.bf16.gmra.mxu2 %vm306_vm1, %v3478_v50 }
  0x90   : > { %3446 = vmatmul.msk.bf16.gmra.mxu3 %vm306_vm1, %v3482_v51 }
  0x9e   : > { %3387 = vmatmul.msk.bf16.gmra.mxu0 %vm306_vm1, %v3471_v52  ;;  %3407 = vmatmul.msk.bf16.gmra.mxu1 %vm306_vm1, %v3475_v53 }
  0x9f   : > { %3427 = vmatmul.msk.bf16.gmra.mxu2 %vm306_vm1, %v3479_v54 }
  0xa0   : > { %3447 = vmatmul.msk.bf16.gmra.mxu3 %vm306_vm1, %v3483_v55 }
  0xab   : > { %v4016_v56 = vpop.f32.mrf.mxu0  ;;  %v4018_v57 = vpop.f32.mrf.mxu1 }
  0xac   : > { %6973 = vst [vmem:[#allocation6_spill] sm:$0xff] %v4016_v56  ;;  %v822_v40 = vmul.f32 %v4077_v39, %v4016_v56  ;;  %v830_v41 = vmul.f32 %v4077_v39, %v4018_v57 }
  0xad   : > { %6974 = vst [vmem:[#allocation7_spill] sm:$0xff] %v4018_v57 }
  0xae   : > { %v886_v45 = vadd.f32 %v830_v41, %v822_v40 }
  0xb2   : > { %v4021_v61 = vpop.f32.mrf.mxu2 }
  0xb3   : > { %6975 = vst [vmem:[#allocation8_spill] sm:$0xff] %v4021_v61  ;;  %v4023_v62 = vpop.f32.mrf.mxu3  ;;  %v4025_v63 = vpop.f32.mrf.mxu0  ;;  %v838_v42 = vmul.f32 %v4077_v39, %v4021_v61 }
  0xb4   : > { %6976 = vst [vmem:[#allocation9_spill] sm:$0xff] %v4023_v62  ;;  %v4027_v0 = vpop.f32.mrf.mxu1  ;;  %v823_v46 = vmul.f32 %v4077_v39, %v4025_v63  ;;  %v846_v51 = vmul.f32 %v4077_v39, %v4023_v62 }
  0xb5   : > { %6977 = vst [vmem:[#allocation10_spill] sm:$0xff] %v4025_v63  ;;  %v831_v47 = vmul.f32 %v4077_v39, %v4027_v0  ;;  %v887_v50 = vadd.f32 %v886_v45, %v838_v42 }
  0xb6   : > { %6978 = vst [vmem:[#allocation11_spill] sm:$0xff] %v4027_v0 }
  0xb7   : > { %v893_v53 = vadd.f32 %v831_v47, %v823_v46  ;;  %v888_v55 = vadd.f32 %v887_v50, %v846_v51 }
  0xba   : > { %v4029_v3 = vpop.f32.mrf.mxu2 }
  0xbb   : > { %6979 = vst [vmem:[#allocation12_spill] sm:$0xff] %v4029_v3  ;;  %v4031_v4 = vpop.f32.mrf.mxu3  ;;  %v4033_v5 = vpop.f32.mrf.mxu0  ;;  %v839_v52 = vmul.f32 %v4077_v39, %v4029_v3 }
  0xbc   : > { %6980 = vst [vmem:[#allocation13_spill] sm:$0xff] %v4031_v4  ;;  %v4035_v6 = vpop.f32.mrf.mxu1  ;;  %v847_v1 = vmul.f32 %v4077_v39, %v4031_v4  ;;  %v824_v31 = vmul.f32 %v4077_v39, %v4033_v5 }
  0xbd   : > { %6981 = vst [vmem:[#allocation14_spill] sm:$0xff] %v4033_v5  ;;  %v894_v58 = vadd.f32 %v893_v53, %v839_v52  ;;  %v832_v32 = vmul.f32 %v4077_v39, %v4035_v6 }
  0xbe   : > { %6982 = vst [vmem:[#allocation15_spill] sm:$0xff] %v4035_v6 }
  0xbf   : > { %v895_v19 = vadd.f32 %v894_v58, %v847_v1 }
  0xc2   : > { %v4037_v9 = vpop.f32.mrf.mxu2 }
  0xc3   : > { %6983 = vst [vmem:[#allocation16_spill] sm:$0xff] %v4037_v9  ;;  %v4039_v10 = vpop.f32.mrf.mxu3  ;;  %v4041_v11 = vpop.f32.mrf.mxu0  ;;  %v840_v41 = vmul.f32 %v4077_v39, %v4037_v9 }
  0xc4   : > { %6984 = vst [vmem:[#allocation17_spill] sm:$0xff] %v4039_v10  ;;  %v4043_v12 = vpop.f32.mrf.mxu1  ;;  %v825_v46 = vmul.f32 %v4077_v39, %v4041_v11 }
  0xc5   : > { %6985 = vst [vmem:[#allocation18_spill] sm:$0xff] %v4041_v11  ;;  %v833_v47 = vmul.f32 %v4077_v39, %v4043_v12 }
  0xc6   : > { %6986 = vst [vmem:[#allocation19_spill] sm:$0xff] %v4043_v12 }
  0xca   : > { %v4045_v14 = vpop.f32.mrf.mxu2 }
  0xcb   : > { %6987 = vst [vmem:[#allocation20_spill] sm:$0xff] %v4045_v14  ;;  %v4047_v15 = vpop.f32.mrf.mxu3  ;;  %v4049_v16 = vpop.f32.mrf.mxu0 }
  0xcc   : > { %6988 = vst [vmem:[#allocation21_spill] sm:$0xff] %v4047_v15  ;;  %v4051_v17 = vpop.f32.mrf.mxu1 }
  0xcd   : > { %6989 = vst [vmem:[#allocation22_spill] sm:$0xff] %v4049_v16 }
  0xce   : > { %6990 = vst [vmem:[#allocation23_spill] sm:$0xff] %v4051_v17 }
  0xd2   : > { %v4053_v20 = vpop.f32.mrf.mxu2 }
  0xd3   : > { %6991 = vst [vmem:[#allocation24_spill] sm:$0xff] %v4053_v20  ;;  %v4055_v21 = vpop.f32.mrf.mxu3  ;;  %v4057_v22 = vpop.f32.mrf.mxu0 }
  0xd4   : > { %6992 = vst [vmem:[#allocation25_spill] sm:$0xff] %v4055_v21  ;;  %v4059_v23 = vpop.f32.mrf.mxu1 }
  0xd5   : > { %6993 = vst [vmem:[#allocation26_spill] sm:$0xff] %v4057_v22 }
  0xd6   : > { %6994 = vst [vmem:[#allocation27_spill] sm:$0xff] %v4059_v23 }
  0xda   : > { %v4061_v26 = vpop.f32.mrf.mxu2 }
  0xdb   : > { %6995 = vst [vmem:[#allocation28_spill] sm:$0xff] %v4061_v26  ;;  %v4063_v27 = vpop.f32.mrf.mxu3  ;;  %v4065_v28 = vpop.f32.mrf.mxu0 }
  0xdc   : > { %6996 = vst [vmem:[#allocation29_spill] sm:$0xff] %v4063_v27  ;;  %v4067_v29 = vpop.f32.mrf.mxu1 }
  0xdd   : > { %6997 = vst [vmem:[#allocation30_spill] sm:$0xff] %v4065_v28 }
  0xde   : > { %6998 = vst [vmem:[#allocation31_spill] sm:$0xff] %v4067_v29 }
  0xe2   : > { %v4069_v35 = vpop.f32.mrf.mxu2 }
  0xe3   : > { %6999 = vst [vmem:[#allocation32_spill] sm:$0xff] %v4069_v35  ;;  %v4071_v36 = vpop.f32.mrf.mxu3  ;;  %v4073_v37 = vpop.f32.mrf.mxu0 }
  0xe4   : > { %7000 = vst [vmem:[#allocation33_spill] sm:$0xff] %v4071_v36  ;;  %v4075_v38 = vpop.f32.mrf.mxu1 }
  0xe5   : > { %7001 = vst [vmem:[#allocation34_spill] sm:$0xff] %v4073_v37 }
  0xe6   : > { %7002 = vst [vmem:[#allocation35_spill] sm:$0xff] %v4075_v38 }
  0xea   : > { %v4085_v43 = vpop.f32.mrf.mxu2 }
  0xeb   : > { %7003 = vst [vmem:[#allocation36_spill] sm:$0xff] %v4085_v43  ;;  %v4087_v44 = vpop.f32.mrf.mxu3  ;;  %v4093_v48 = vpop.f32.mrf.mxu0 }
  0xec   : > { %7004 = vst [vmem:[#allocation37_spill] sm:$0xff] %v4087_v44  ;;  %v4095_v49 = vpop.f32.mrf.mxu1  ;;  %v854_v54 = vmul.f32 %v4077_v39, %v4093_v48 }
  0xed   : > { %7005 = vst [vmem:[#allocation38_spill] sm:$0xff] %v4093_v48  ;;  %v862_v7 = vmul.f32 %v4077_v39, %v4095_v49 }
  0xee   : > { %7006 = vst [vmem:[#allocation39_spill] sm:$0xff] %v4095_v49  ;;  %v889_v2 = vadd.f32 %v888_v55, %v854_v54  ;;  %v900_v54 = vadd.f32 %v832_v32, %v824_v31  ;;  %v841_v55 = vmul.f32 %v4077_v39, %v4045_v14 }
  0xf0   : > { %v890_v25 = vadd.f32 %v889_v2, %v862_v7  ;;  %v901_v7 = vadd.f32 %v900_v54, %v840_v41  ;;  %v849_v41 = vmul.f32 %v4077_v39, %v4047_v15 }
  0xf2   : > { %v4103_v59 = vpop.f32.mrf.mxu2 }
  0xf3   : > { %7007 = vst [vmem:[#allocation40_spill] sm:$0xff] %v4103_v59  ;;  %v4105_v60 = vpop.f32.mrf.mxu3  ;;  %v4111_v8 = vpop.f32.mrf.mxu0  ;;  %v870_v24 = vmul.f32 %v4077_v39, %v4103_v59 }
  0xf4   : > { %7008 = vst [vmem:[#allocation41_spill] sm:$0xff] %v4105_v60  ;;  %v4113_v13 = vpop.f32.mrf.mxu1  ;;  %v855_v18 = vmul.f32 %v4077_v39, %v4111_v8  ;;  %v878_v34 = vmul.f32 %v4077_v39, %v4105_v60 }
  0xf5   : > { %7009 = vst [vmem:[#allocation42_spill] sm:$0xff] %v4111_v8  ;;  %v891_v33 = vadd.f32 %v890_v25, %v870_v24  ;;  %v863_v40 = vmul.f32 %v4077_v39, %v4113_v13 }
  0xf6   : > { %7010 = vst [vmem:[#allocation43_spill] sm:$0xff] %v4113_v13  ;;  %v896_v30 = vadd.f32 %v895_v19, %v855_v18  ;;  %v848_v18 = vmul.f32 %v4077_v39, %v4039_v10  ;;  %v907_v19 = vadd.f32 %v833_v47, %v825_v46 }
  0xf7   : > { %v4145_v58 = vadd.f32 %v891_v33, %v878_v34 }
  0xf8   : > { %v897_v50 = vadd.f32 %v896_v30, %v863_v40  ;;  %v908_v30 = vadd.f32 %v907_v19, %v841_v55  ;;  %v902_v33 = vadd.f32 %v901_v7, %v848_v18 }
  0xf9   : > { %v942_v31 = vmul.f32 %v4145_v58, %v4145_v58 }
  0xfa   : > { %v4129_v42 = vpop.f32.mrf.mxu2 }
  0xfb   : > { %7011 = vst [vmem:[#allocation44_spill] sm:$0xff] %v4129_v42  ;;  %v4131_v45 = vpop.f32.mrf.mxu3  ;;  %v871_v51 = vmul.f32 %v4077_v39, %v4129_v42  ;;  %v4139_v52 = vpop.f32.mrf.mxu0 }
  0xfc   : > { %7012 = vst [vmem:[#allocation45_spill] sm:$0xff] %v4131_v45  ;;  %v4141_v53 = vpop.f32.mrf.mxu1  ;;  %v879_v2 = vmul.f32 %v4077_v39, %v4131_v45  ;;  %v856_v25 = vmul.f32 %v4077_v39, %v4139_v52 }
  0xfd   : > { %7013 = vst [vmem:[#allocation46_spill] sm:$0xff] %v4139_v52  ;;  %v898_v1 = vadd.f32 %v897_v50, %v871_v51  ;;  %v864_v54 = vmul.f32 %v4077_v39, %v4141_v53 }
  0xfe   : > { %7014 = vst [vmem:[#allocation47_spill] sm:$0xff] %v4141_v53  ;;  %v903_v51 = vadd.f32 %v902_v33, %v856_v25 }
  0xff   : > { %v4151_v24 = vadd.f32 %v898_v1, %v879_v2  ;;  %v909_v1 = vadd.f32 %v908_v30, %v849_v41  ;;  %v842_v30 = vmul.f32 %v4077_v39, %v4053_v20  ;;  %v827_v41 = vmul.f32 %v4077_v39, %v4057_v22 }
 0x100   : > { %v904_v25 = vadd.f32 %v903_v51, %v864_v54  ;;  %v835_v51 = vmul.f32 %v4077_v39, %v4059_v23 }
 0x101   : > { %v943_v32 = vmul.f32 %v4151_v24, %v4151_v24 }
 0x102   : > { %v4159_v34 = vpop.f32.mrf.mxu2 }
 0x103   : > { %7015 = vst [vmem:[#allocation48_spill] sm:$0xff] %v4159_v34  ;;  %v4161_v40 = vpop.f32.mrf.mxu3  ;;  %v950_v46 = vadd.f32 %v943_v32, %v942_v31  ;;  %v4165_v47 = vpop.f32.mrf.mxu0  ;;  %v872_v7 = vmul.f32 %v4077_v39, %v4159_v34  ;;  %v826_v31 = vmul.f32 %v4077_v39, %v4049_v16  ;;  %v834_v32 = vmul.f32 %v4077_v39, %v4051_v17 }
 0x104   : > { %7016 = vst [vmem:[#allocation49_spill] sm:$0xff] %v4161_v40  ;;  %v4167_v50 = vpop.f32.mrf.mxu1  ;;  %v857_v55 = vmul.f32 %v4077_v39, %v4165_v47 }
 0x105   : > { %7017 = vst [vmem:[#allocation50_spill] sm:$0xff] %v4165_v47  ;;  %v951_v2 = vrot.slane %v950_v46, 4  ;;  %v865_v53 = vmul.f32 %v4077_v39, %v4167_v50  ;;  %v905_v34 = vadd.f32 %v904_v25, %v872_v7  ;;  %v914_v16 = vadd.f32 %v834_v32, %v826_v31 }
 0x106   : > { %7018 = vst [vmem:[#allocation51_spill] sm:$0xff] %v4167_v50  ;;  %v910_v19 = vadd.f32 %v909_v1, %v857_v55  ;;  %v843_v7 = vmul.f32 %v4077_v39, %v4061_v26 }
 0x107   : > { %v952_v18 = vadd.f32 %v951_v2, %v950_v46  ;;  %v880_v46 = vmul.f32 %v4077_v39, %v4161_v40  ;;  %v915_v47 = vadd.f32 %v914_v16, %v842_v30 }
 0x108   : > { %v911_v2 = vadd.f32 %v910_v19, %v865_v53  ;;  %v850_v53 = vmul.f32 %v4077_v39, %v4055_v21  ;;  %v921_v19 = vadd.f32 %v835_v51, %v827_v41 }
 0x109   : > { %v953_v33 = vrot.slane %v952_v18, 2 }
 0x10a   : > { %v4187_v55 = vpop.f32.mrf.mxu2  ;;  %v922_v26 = vadd.f32 %v921_v19, %v843_v7  ;;  %v916_v30 = vadd.f32 %v915_v47, %v850_v53  ;;  %v836_v53 = vmul.f32 %v4077_v39, %v4067_v29  ;;  %v852_v29 = vmul.f32 %v4077_v39, %v4071_v36 }
 0x10b   : > { %7019 = vst [vmem:[#allocation52_spill] sm:$0xff] %v4187_v55  ;;  %v4189_v1 = vpop.f32.mrf.mxu3  ;;  %v954_v54 = vadd.f32 %v953_v33, %v952_v18  ;;  %v873_v17 = vmul.f32 %v4077_v39, %v4187_v55  ;;  %v4195_v20 = vpop.f32.mrf.mxu0  ;;  %v4205_v18 = vadd.f32 %v905_v34, %v880_v46 }
 0x10c   : > { %7020 = vst [vmem:[#allocation53_spill] sm:$0xff] %v4189_v1  ;;  %v4197_v22 = vpop.f32.mrf.mxu1  ;;  %v881_v50 = vmul.f32 %v4077_v39, %v4189_v1  ;;  %v858_v32 = vmul.f32 %v4077_v39, %v4195_v20 }
 0x10d   : > { %7021 = vst [vmem:[#allocation54_spill] sm:$0xff] %v4195_v20  ;;  %v955_v25 = vrot.slane %v954_v54, 1  ;;  %v912_v52 = vadd.f32 %v911_v2, %v873_v17  ;;  %v944_v34 = vmul.f32 %v4205_v18, %v4205_v18  ;;  %v866_v47 = vmul.f32 %v4077_v39, %v4197_v22 }
 0x10e   : > { %7022 = vst [vmem:[#allocation55_spill] sm:$0xff] %v4197_v22 }
 0x10f   : > { %v4207_v33 = vadd.f32 %v955_v25, %v954_v54  ;;  %v4209_v31 = vadd.f32 %v912_v52, %v881_v50  ;;  %v851_v50 = vmul.f32 %v4077_v39, %v4063_v27  ;;  %v917_v54 = vadd.f32 %v916_v30, %v858_v32 }
 0x110   : > { %v828_v25 = vmul.f32 %v4077_v39, %v4065_v28 }
 0x111   : > { %v978_v17 = vadd.f32 1.0, %v4207_v33  ;;  %v4215_v2 = vadd.f32 1e-08, %v4207_v33  ;;  %v945_v16 = vmul.f32 %v4209_v31, %v4209_v31  ;;  %v923_v7 = vadd.f32 %v922_v26, %v851_v50 }
 0x112   : > { %v4221_v41 = vpop.f32.mrf.mxu2  ;;  %v918_v30 = vadd.f32 %v917_v54, %v866_v47  ;;  %v928_v26 = vadd.f32 %v836_v53, %v828_v25  ;;  %v844_v50 = vmul.f32 %v4077_v39, %v4069_v35  ;;  %v829_v54 = vmul.f32 %v4077_v39, %v4073_v37 }
 0x113   : > { %7023 = vst [vmem:[#allocation56_spill] sm:$0xff] %v4221_v41  ;;  %v4223_v52 = vpop.f32.mrf.mxu3  ;;  %3529 = vrcp.f32 %v978_v17  ;;  %v4227_v46 = vpop.f32.mrf.mxu0  ;;  %v957_v51 = vadd.f32 %v945_v16, %v944_v34  ;;  %v874_v27 = vmul.f32 %v4077_v39, %v4221_v41  ;;  %v991_v36 = vand.u32 2147483647, %v978_v17 }
 0x114   : > { %7024 = vst [vmem:[#allocation57_spill] sm:$0xff] %v4223_v52  ;;  %3531 = vrsqrt.f32 %v4215_v2  ;;  %v859_v19 = vmul.f32 %v4077_v39, %v4227_v46  ;;  %v4240_v21 = vpop.f32.mrf.mxu1  ;;  %v993_v35 = vand.u32 2147483648, %v978_v17  ;;  %vm987_vm7 = vweird.f32 %v978_v17 }
 0x115   : > { %7025 = vst [vmem:[#allocation58_spill] sm:$0xff] %v4227_v46  ;;  %v958_v20 = vrot.slane %v957_v51, 4  ;;  %v867_v28 = vmul.f32 %v4077_v39, %v4240_v21  ;;  %v919_v41 = vadd.f32 %v918_v30, %v874_v27  ;;  %v837_v30 = vmul.f32 %v4077_v39, %v4075_v38 }
 0x116   : > { %7026 = vst [vmem:[#allocation59_spill] sm:$0xff] %v4240_v21  ;;  %v924_v32 = vadd.f32 %v923_v7, %v859_v19  ;;  %v882_v7 = vmul.f32 %v4077_v39, %v4223_v52  ;;  %vm992_vm8 = vcmp.eq.f32.partialorder %v991_v36, 8.507059e+37  ;;  %vm1052_vm11 = vweird.f32 %v4215_v2 }
 0x117   : > { %v959_v16 = vadd.f32 %v958_v20, %v957_v51 }
 0x118   : > { %v925_v25 = vadd.f32 %v924_v32, %v867_v28  ;;  %v4263_v10 = vadd.f32 %v919_v41, %v882_v7  ;;  %v929_v32 = vadd.f32 %v928_v26, %v844_v50 }
 0x119   : > { %v3530_v34 = vpop.eup %3529  ;;  %v960_v23 = vrot.slane %v959_v16, 2 }
 0x11a   : > { %v3532_v22 = vpop.eup %3531  ;;  %v983_v46 = vmul.f32 %v3530_v34, %v978_v17  ;;  %v4250_v20 = vpop.f32.mrf.mxu2  ;;  %vm988_vm6 = vweird.f32 %v3530_v34  ;;  %v930_v36 = vadd.f32 %v929_v32, %v852_v29 }
 0x11b   : > { %7027 = vst [vmem:[#allocation60_spill] sm:$0xff] %v4250_v20  ;;  %v4252_v51 = vpop.f32.mrf.mxu3  ;;  %v1047_v47 = vmul.f32 %v3532_v22, %v4215_v2  ;;  %v875_v53 = vmul.f32 %v4077_v39, %v4250_v20  ;;  %v961_v27 = vadd.f32 %v960_v23, %v959_v16  ;;  %v4265_v28 = vpop.f32.mrf.mxu0  ;;  %v994_v16 = vor.u32 1.1754944e-38, %v993_v35  ;;  %vm989_vm9 = vmor %vm987_vm7, %vm988_vm6 }
 0x11c   : > { %7028 = vst [vmem:[#allocation61_spill] sm:$0xff] %v4252_v51  ;;  %v984_v19 = vsub.f32 1.0, %v983_v46  ;;  %v883_v55 = vmul.f32 %v4077_v39, %v4252_v51  ;;  %vm1053_vm10 = vweird.f32 %v3532_v22  ;;  %v860_v41 = vmul.f32 %v4077_v39, %v4265_v28  ;;  %v4283_v35 = vpop.f32.mrf.mxu1 }
 0x11d   : > { %v1048_v21 = vmul.f32 %v3532_v22, %v1047_v47  ;;  %v926_v52 = vadd.f32 %v925_v25, %v875_v53  ;;  %v962_v37 = vrot.slane %v961_v27, 1  ;;  %7029 = vst [vmem:[#allocation62_spill] sm:$0xff] %v4265_v28  ;;  %vm1054_vm12 = vmor %vm1052_vm11, %vm1053_vm10  ;;  %v868_v29 = vmul.f32 %v4077_v39, %v4283_v35 }
 0x11e   : > { %v985_v15 = vmul.f32 %v3530_v34, %v984_v19  ;;  %7030 = vst [vmem:[#allocation63_spill] sm:$0xff] %v4283_v35  ;;  %v935_v2 = vadd.f32 %v837_v30, %v829_v54 }
 0x11f   : > { %v1049_v46 = vmul.f32 0.5, %v1048_v21  ;;  %v4267_v20 = vadd.f32 %v926_v52, %v883_v55  ;;  %v4269_v47 = vadd.f32 %v962_v37, %v961_v27  ;;  %v845_v52 = vmul.f32 %v4077_v39, %v4085_v43 }
 0x120   : > { %v986_v23 = vadd.f32 %v3530_v34, %v985_v15  ;;  %v946_v15 = vmul.f32 %v4263_v10, %v4263_v10  ;;  %v931_v27 = vadd.f32 %v930_v36, %v860_v41 }
 0x121   : > { %v1050_v25 = vsub.f32 1.5, %v1049_v46  ;;  %v947_v53 = vmul.f32 %v4267_v20, %v4267_v20  ;;  %v4276_v17 = vadd.f32 1.0, %v4269_v47  ;;  %v4279_v21 = vadd.f32 1e-08, %v4269_v47 }
 0x122   : > { %v990_v7 = vsel %vm989_vm9, %v3530_v34, %v986_v23  ;;  %v4290_v50 = vpop.f32.mrf.mxu2 }
 0x123   : > { %v995_v37 = vsel %vm992_vm8, %v994_v16, %v990_v7  ;;  %v1051_v55 = vmul.f32 %v3532_v22, %v1050_v25  ;;  %3533 = vrcp.f32 %v4276_v17  ;;  %v964_v26 = vadd.f32 %v947_v53, %v946_v15  ;;  %7031 = vst [vmem:[#allocation64_spill] sm:$0xff] %v4290_v50  ;;  %v4303_v25 = vpop.f32.mrf.mxu0  ;;  %v4307_v15 = vpop.f32.mrf.mxu3 }
 0x124   : > { %v996_v34 = vmul.f32 %v995_v37, %v4207_v33  ;;  %3535 = vrsqrt.f32 %v4279_v21  ;;  %v876_v46 = vmul.f32 %v4077_v39, %v4290_v50  ;;  %7032 = vst [vmem:[#allocation65_spill] sm:$0xff] %v4303_v25  ;;  %v1006_v53 = vand.u32 2147483647, %v4276_v17 }
 0x125   : > { %v1055_v19 = vsel %vm1054_vm12, %v3532_v22, %v1051_v55  ;;  %v965_v16 = vrot.slane %v964_v26, 4  ;;  %v936_v22 = vadd.f32 %v935_v2, %v845_v52  ;;  %v1008_v41 = vand.u32 2147483648, %v4276_v17  ;;  %7033 = vst [vmem:[#allocation66_spill] sm:$0xff] %v4307_v15  ;;  %v4331_v2 = vpop.f32.mrf.mxu1 }
 0x126   : > { %v1086_v32 = vmul.f32 %v1055_v19, %v996_v34  ;;  %v932_v7 = vadd.f32 %v931_v27, %v868_v29  ;;  %v853_v55 = vmul.f32 %v4077_v39, %v4087_v44  ;;  %v884_v34 = vmul.f32 %v4077_v39, %v4307_v15  ;;  %7034 = vst [vmem:[#allocation67_spill] sm:$0xff] %v4331_v2 }
 0x127   : > { %v861_v19 = vmul.f32 %v4077_v39, %v4303_v25  ;;  %vm1002_vm13 = vweird.f32 %v4276_v17  ;;  %vm4336_vm14 = vcmp.eq.f32.partialorder %v1006_v53, 8.507059e+37  ;;  %vm1062_vm15 = vweird.f32 %v4279_v21 }
 0x128   : > { %v4298_v33 = vmul.f32 %v1086_v32, %v4145_v58  ;;  %v4301_v23 = vmul.f32 %v1086_v32, %v4151_v24  ;;  %v933_v52 = vadd.f32 %v932_v7, %v876_v46  ;;  %v966_v32 = vadd.f32 %v965_v16, %v964_v26 }
 0x129   : > { %v4309_v54 = vpop.eup %3533  ;;  %v937_v46 = vadd.f32 %v936_v22, %v853_v55  ;;  %v869_v22 = vmul.f32 %v4077_v39, %v4331_v2 }
 0x12a   : > { %v1098_v58 = vmul.f32 %v4298_v33, %v4016_v56  ;;  %v1099_v24 = vmul.f32 %v4301_v23, %v4025_v63  ;;  %v1106_v30 = vmul.f32 %v4298_v33, %v4018_v57  ;;  %v1107_v36 = vmul.f32 %v4301_v23, %v4027_v0  ;;  %v4319_v37 = vpop.eup %3535  ;;  %v4348_v55 = vpop.f32.mrf.mxu2 }
 0x12b   : > { %v1154_v27 = vmul.f32 %v4298_v33, %v4105_v60  ;;  %v1155_v29 = vmul.f32 %v4301_v23, %v4131_v45  ;;  %v998_v63 = vmul.f32 %v4309_v54, %v4276_v17  ;;  %v1009_v60 = vor.u32 1.1754944e-38, %v1008_v41  ;;  %7037 = vst [vmem:[#allocation68_spill] sm:$0xff] %v4348_v55  ;;  %v4359_v50 = vpop.f32.mrf.mxu3 }
 0x12c   : > { %v1162_v0 = vadd.f32 %v1099_v24, %v1098_v58  ;;  %v1190_v57 = vadd.f32 %v1107_v36, %v1106_v30  ;;  %v1057_v45 = vmul.f32 %v4319_v37, %v4279_v21  ;;  %v4343_v16 = vadd.f32 %v933_v52, %v884_v34  ;;  %7038 = vst [vmem:[#allocation69_spill] sm:$0xff] %v4359_v50 }
 0x12d   : > { %v1358_v7 = vadd.f32 %v1155_v29, %v1154_v27  ;;  %v938_v58 = vadd.f32 %v937_v46, %v861_v19  ;;  %v999_v30 = vsub.f32 1.0, %v998_v63  ;;  %v967_v36 = vrot.slane %v966_v32, 2 }
 0x12e   : > { %v1163_v26 = vrot.slane %v1162_v0, 4  ;;  %v1058_v53 = vmul.f32 %v4319_v37, %v1057_v45  ;;  %v1114_v41 = vmul.f32 %v4298_v33, %v4021_v61  ;;  %v1115_v27 = vmul.f32 %v4301_v23, %v4029_v3 }
 0x12f   : > { %v1359_v24 = vrot.slane %v1358_v7, 4  ;;  %v1191_v29 = vrot.slane %v1190_v57, 4  ;;  %vm1003_vm1 = vweird.f32 %v4309_v54  ;;  %v1000_v34 = vmul.f32 %v4309_v54, %v999_v30 }
 0x130   : > { %v1059_v19 = vmul.f32 0.5, %v1058_v53  ;;  %v968_v46 = vadd.f32 %v967_v36, %v966_v32  ;;  %v1164_v63 = vadd.f32 %v1163_v26, %v1162_v0  ;;  %vm1063_vm2 = vweird.f32 %v4319_v37  ;;  %vm1004_vm3 = vmor %vm1002_vm13, %vm1003_vm1 }
 0x131   : > { %v1360_v52 = vadd.f32 %v1359_v24, %v1358_v7  ;;  %v939_v45 = vadd.f32 %v938_v58, %v869_v22  ;;  %v877_v15 = vmul.f32 %v4077_v39, %v4348_v55  ;;  %v1001_v3 = vadd.f32 %v4309_v54, %v1000_v34  ;;  %vm1064_vm4 = vmor %vm1062_vm15, %vm1063_vm2 }
 0x132   : > { %v1060_v2 = vsub.f32 1.5, %v1059_v19  ;;  %v969_v35 = vrot.slane %v968_v46, 1  ;;  %v1122_v7 = vmul.f32 %v4298_v33, %v4023_v62  ;;  %v1123_v32 = vmul.f32 %v4301_v23, %v4031_v4 }
 0x133   : > { %v1361_v61 = vrot.slane %v1360_v52, 2  ;;  %v4366_v0 = vadd.f32 %v1115_v27, %v1114_v41  ;;  %v940_v26 = vadd.f32 %v939_v45, %v877_v15  ;;  %v1005_v58 = vsel %vm1004_vm3, %v4309_v54, %v1001_v3 }
 0x134   : > { %v1061_v22 = vmul.f32 %v4319_v37, %v1060_v2  ;;  %v4374_v24 = vadd.f32 %v969_v35, %v968_v46  ;;  %v885_v30 = vmul.f32 %v4077_v39, %v4359_v50  ;;  %v1192_v53 = vadd.f32 %v1191_v29, %v1190_v57 }
 0x135   : > { %v1362_v36 = vadd.f32 %v1361_v61, %v1360_v52  ;;  %v1010_v41 = vsel %vm4336_vm14, %v1009_v60, %v1005_v58  ;;  %v1165_v17 = vrot.slane %v1164_v63, 2  ;;  %v4393_v57 = vmul.f32 %v4301_v23, %v4111_v8 }
 0x136   : > { %v1011_v3 = vmul.f32 %v1010_v41, %v4269_v47  ;;  %v1065_v15 = vsel %vm1064_vm4, %v4319_v37, %v1061_v22  ;;  %v4387_v35 = vadd.f32 1.0, %v4374_v24  ;;  %v4389_v54 = vadd.f32 %v940_v26, %v885_v30 }
 0x137   : > { %v4397_v56 = vmul.f32 %v4301_v23, %v4113_v13  ;;  %v4400_v61 = vadd.f32 1e-08, %v4374_v24  ;;  %v1219_v39 = vrot.slane %v4366_v0, 4  ;;  %v4403_v60 = vadd.f32 %v1123_v32, %v1122_v7 }
 0x138   : > { %v1087_v47 = vmul.f32 %v1065_v15, %v1011_v3  ;;  %3537 = vrcp.f32 %v4387_v35  ;;  %v1363_v21 = vrot.slane %v1362_v36, 1  ;;  %v1166_v37 = vadd.f32 %v1165_v17, %v1164_v63 }
 0x139   : > { %3539 = vrsqrt.f32 %v4400_v61  ;;  %v1193_v2 = vrot.slane %v1192_v53, 2  ;;  %v948_v52 = vmul.f32 %v4343_v16, %v4343_v16  ;;  %v949_v34 = vmul.f32 %v4389_v54, %v4389_v54 }
 0x13a   : > { %v4408_v27 = vmul.f32 %v1087_v47, %v4205_v18  ;;  %v4411_v29 = vmul.f32 %v1087_v47, %v4209_v31  ;;  %v4419_v19 = vmul.f32 %v4298_v33, %v4093_v48  ;;  %v4423_v46 = vmul.f32 %v4298_v33, %v4095_v49 }
 0x13b   : > { %v4427_v18 = vmul.f32 %v4298_v33, %v4103_v59  ;;  %v4431_v31 = vmul.f32 %v4301_v23, %v4129_v42  ;;  %v4441_v26 = vadd.f32 %v1363_v21, %v1362_v36  ;;  %v1021_v33 = vand.u32 2147483647, %v4387_v35 }
 0x13c   : > { %v1100_v63 = vmul.f32 %v4408_v27, %v4033_v5  ;;  %v1101_v45 = vmul.f32 %v4411_v29, %v4041_v11  ;;  %v1108_v7 = vmul.f32 %v4408_v27, %v4035_v6  ;;  %v1109_v32 = vmul.f32 %v4411_v29, %v4043_v12 }
 0x13d   : > { %7039 = vst [vmem:[#allocation70_spill] sm:$0xff] %v4441_v26  ;;  %v1167_v58 = vrot.slane %v1166_v37, 1  ;;  %v4444_v22 = vadd.f32 %v1193_v2, %v1192_v53  ;;  %v1156_v30 = vmul.f32 %v4408_v27, %v4161_v40  ;;  %v1157_v41 = vmul.f32 %v4411_v29, %v4189_v1 }
 0x13e   : > { %v3538_v23 = vpop.eup %3537  ;;  %vm1017_vm5 = vweird.f32 %v4387_v35  ;;  %v1023_v17 = vand.u32 2147483648, %v4387_v35  ;;  %v971_v3 = vadd.f32 %v949_v34, %v948_v52  ;;  %v1116_v36 = vmul.f32 %v4408_v27, %v4037_v9 }
 0x13f   : > { %v3540_v15 = vpop.eup %3539  ;;  %v1117_v53 = vmul.f32 %v4411_v29, %v4045_v14  ;;  %v1169_v47 = vadd.f32 %v1101_v45, %v1100_v63  ;;  %v1197_v21 = vadd.f32 %v1109_v32, %v1108_v7  ;;  %v1365_v2 = vadd.f32 %v1157_v41, %v1156_v30 }
 0x140   : > { %v1013_v40 = vmul.f32 %v3538_v23, %v4387_v35  ;;  %v1067_v42 = vmul.f32 %v3540_v15, %v4400_v61  ;;  %vm1072_vm6 = vweird.f32 %v4400_v61  ;;  %vm4459_vm7 = vcmp.eq.f32.partialorder %v1021_v33, 8.507059e+37 }
 0x141   : > { %v1170_v1 = vrot.slane %v1169_v47, 4  ;;  %v1198_v59 = vrot.slane %v1197_v21, 4  ;;  %v4463_v34 = vadd.f32 %v1167_v58, %v1166_v37  ;;  %v1366_v13 = vrot.slane %v1365_v2, 4 }
 0x142   : > { %v1014_v49 = vsub.f32 1.0, %v1013_v40  ;;  %v1068_v8 = vmul.f32 %v3540_v15, %v1067_v42  ;;  %v972_v63 = vrot.slane %v971_v3, 4  ;;  %v1225_v32 = vadd.f32 %v1117_v53, %v1116_v36  ;;  %v7043_v40 = vld [vmem:[#allocation17_spill] sm:$0xff]  ;;  %v7045_v53 = vld [vmem:[#allocation50_spill] sm:$0xff] }
 0x143   : > { %7042 = vst [vmem:[#allocation71_spill] sm:$0xff] %v4463_v34  ;;  %v1171_v45 = vadd.f32 %v1170_v1, %v1169_v47  ;;  %v1199_v7 = vadd.f32 %v1198_v59, %v1197_v21  ;;  %vm1018_vm8 = vweird.f32 %v3538_v23  ;;  %v1367_v30 = vadd.f32 %v1366_v13, %v1365_v2 }
 0x144   : > { %v1015_v41 = vmul.f32 %v3538_v23, %v1014_v49  ;;  %v1069_v48 = vmul.f32 0.5, %v1068_v8  ;;  %v973_v4 = vadd.f32 %v972_v63, %v971_v3  ;;  %v1024_v62 = vor.u32 1.1754944e-38, %v1023_v17  ;;  %vm1019_vm10 = vmor %vm1017_vm5, %vm1018_vm8  ;;  %v7044_v8 = vld [vmem:[#allocation21_spill] sm:$0xff] }
 0x145   : > { %vm1073_vm9 = vweird.f32 %v3540_v15  ;;  %v1172_v33 = vrot.slane %v1171_v45, 2  ;;  %v1220_v14 = vadd.f32 %v1219_v39, %v4366_v0  ;;  %v1368_v9 = vrot.slane %v1367_v30, 2 }
 0x146   : > { %v1016_v37 = vadd.f32 %v3538_v23, %v1015_v41  ;;  %v1070_v58 = vsub.f32 1.5, %v1069_v48  ;;  %v974_v12 = vrot.slane %v973_v4, 2  ;;  %v1124_v42 = vmul.f32 %v4408_v27, %v7043_v40  ;;  %vm1074_vm11 = vmor %vm1072_vm6, %vm1073_vm9 }
 0x147   : > { %v1226_v1 = vrot.slane %v1225_v32, 4  ;;  %v1173_v49 = vadd.f32 %v1172_v33, %v1171_v45  ;;  %v1200_v59 = vrot.slane %v1199_v7, 2  ;;  %v1125_v13 = vmul.f32 %v4411_v29, %v7044_v8 }
 0x148   : > { %v1020_v17 = vsel %vm1019_vm10, %v3538_v23, %v1016_v37  ;;  %v1071_v3 = vmul.f32 %v3540_v15, %v1070_v58  ;;  %v975_v0 = vadd.f32 %v974_v12, %v973_v4  ;;  %v1369_v39 = vadd.f32 %v1368_v9, %v1367_v30  ;;  %v7046_v4 = vld [vmem:[#allocation51_spill] sm:$0xff]  ;;  %v7047_v30 = vld [vmem:[#allocation46_spill] sm:$0xff] }
 0x149   : > { %v1025_v48 = vsel %vm4459_vm7, %v1024_v62, %v1020_v17  ;;  %v1195_v36 = vrot.slane %v4444_v22, 1  ;;  %v1221_v35 = vrot.slane %v1220_v14, 2  ;;  %v4481_v47 = vmul.f32 %v4411_v29, %v7045_v53  ;;  %v7048_v37 = vld [vmem:[#allocation47_spill] sm:$0xff] }
 0x14a   : > { %v1026_v21 = vmul.f32 %v1025_v48, %v4374_v24  ;;  %v1075_v23 = vsel %vm1074_vm11, %v3540_v15, %v1071_v3  ;;  %v976_v2 = vrot.slane %v975_v0, 1  ;;  %v4486_v9 = vmul.f32 %v4411_v29, %v7046_v4  ;;  %v7049_v15 = vld [vmem:[#allocation48_spill] sm:$0xff]  ;;  %v7054_v48 = vld [vmem:[#allocation26_spill] sm:$0xff] }
 0x14b   : > { %v1174_v62 = vrot.slane %v1173_v49, 1  ;;  %v1201_v12 = vadd.f32 %v1200_v59, %v1199_v7  ;;  %v1227_v52 = vadd.f32 %v1226_v1, %v1225_v32  ;;  %v1253_v61 = vadd.f32 %v1125_v13, %v1124_v42  ;;  %v7050_v42 = vld [vmem:[#allocation52_spill] sm:$0xff] }
 0x14c   : > { %v1088_v63 = vmul.f32 %v1075_v23, %v1026_v21  ;;  %v4488_v45 = vadd.f32 %v976_v2, %v975_v0  ;;  %v4492_v41 = vmul.f32 %v4408_v27, %v7047_v30  ;;  %v1370_v33 = vrot.slane %v1369_v39, 1  ;;  %v7053_v0 = vld [vmem:[#allocation22_spill] sm:$0xff]  ;;  %v7056_v21 = vld [vmem:[#allocation27_spill] sm:$0xff]  ;;  %v7058_v23 = vld [vmem:[#allocation24_spill] sm:$0xff] }
 0x14d   : > { %v4496_v24 = vmul.f32 %v4408_v27, %v7048_v37  ;;  %v4500_v58 = vmul.f32 %v4408_v27, %v7049_v15  ;;  %v1222_v17 = vadd.f32 %v1221_v35, %v1220_v14  ;;  %v4510_v1 = vmul.f32 %v4411_v29, %v7050_v42  ;;  %v7055_v35 = vld [vmem:[#allocation23_spill] sm:$0xff]  ;;  %v7059_v2 = vld [vmem:[#allocation28_spill] sm:$0xff]  ;;  %v7060_v42 = vld [vmem:[#allocation57_spill] sm:$0xff] }
 0x14e   : > { %v4503_v7 = vmul.f32 %v1088_v63, %v4263_v10  ;;  %v4506_v32 = vmul.f32 %v1088_v63, %v4267_v20  ;;  %v4513_v59 = vadd.f32 %v1195_v36, %v4444_v22  ;;  %v4516_v13 = vadd.f32 1.0, %v4488_v45 }
 0x14f   : > { %v4518_v3 = vadd.f32 %v1174_v62, %v1173_v49  ;;  %v1202_v27 = vrot.slane %v1201_v12, 1  ;;  %v1228_v14 = vrot.slane %v1227_v52, 2  ;;  %v4528_v36 = vadd.f32 %v1370_v33, %v1369_v39 }
 0x150   : > { %7051 = vst [vmem:[#allocation72_spill] sm:$0xff] %v4513_v59  ;;  %v1102_v10 = vmul.f32 %v4503_v7, %v7053_v0  ;;  %v1103_v20 = vmul.f32 %v4506_v32, %v7054_v48  ;;  %v1110_v29 = vmul.f32 %v4503_v7, %v7055_v35  ;;  %v1111_v22 = vmul.f32 %v4506_v32, %v7056_v21 }
 0x151   : > { %7052 = vst [vmem:[#allocation73_spill] sm:$0xff] %v4518_v3  ;;  %v1118_v49 = vmul.f32 %v4503_v7, %v7058_v23  ;;  %v1119_v62 = vmul.f32 %v4506_v32, %v7059_v2  ;;  %v1223_v63 = vrot.slane %v1222_v17, 1  ;;  %v1158_v15 = vmul.f32 %v4503_v7, %v7060_v42  ;;  %v7062_v42 = vld [vmem:[#allocation25_spill] sm:$0xff] }
 0x152   : > { %7057 = vst [vmem:[#allocation74_spill] sm:$0xff] %v4528_v36  ;;  %v1159_v4 = vmul.f32 %v4506_v32, %v4252_v51  ;;  %v4539_v37 = vadd.f32 1e-08, %v4488_v45  ;;  %v1247_v53 = vrot.slane %v4403_v60, 4  ;;  %v1176_v39 = vadd.f32 %v1103_v20, %v1102_v10  ;;  %v7063_v51 = vld [vmem:[#allocation29_spill] sm:$0xff] }
 0x153   : > { %v1204_v33 = vadd.f32 %v1111_v22, %v1110_v29  ;;  %v1232_v30 = vadd.f32 %v1119_v62, %v1118_v49  ;;  %v4542_v8 = vadd.f32 %v1202_v27, %v1201_v12  ;;  %3541 = vrcp.f32 %v4516_v13  ;;  %v7065_v49 = vld [vmem:[#allocation58_spill] sm:$0xff] }
 0x154   : > { %v1372_v40 = vadd.f32 %v1159_v4, %v1158_v15  ;;  %v4545_v2 = vadd.f32 %v1228_v14, %v1227_v52  ;;  %v1254_v23 = vrot.slane %v1253_v61, 4  ;;  %v1126_v21 = vmul.f32 %v4503_v7, %v7062_v42 }
 0x155   : > { %7061 = vst [vmem:[#allocation75_spill] sm:$0xff] %v4542_v8  ;;  %v1127_v35 = vmul.f32 %v4506_v32, %v7063_v51  ;;  %v1177_v6 = vrot.slane %v1176_v39, 4  ;;  %v1205_v48 = vrot.slane %v1204_v33, 4  ;;  %v1036_v10 = vand.u32 2147483647, %v4516_v13 }
 0x156   : > { %v1373_v0 = vrot.slane %v1372_v40, 4  ;;  %3543 = vrsqrt.f32 %v4539_v37  ;;  %v4553_v12 = vadd.f32 %v1223_v63, %v1222_v17  ;;  %v1233_v52 = vrot.slane %v1232_v30, 4 }
 0x157   : > { %v1178_v4 = vadd.f32 %v1177_v6, %v1176_v39  ;;  %v1206_v15 = vadd.f32 %v1205_v48, %v1204_v33  ;;  %v1038_v27 = vand.u32 2147483648, %v4516_v13  ;;  %v1248_v29 = vadd.f32 %v1247_v53, %v4403_v60  ;;  %v7066_v6 = vld [vmem:[#allocation59_spill] sm:$0xff] }
 0x158   : > { %7064 = vst [vmem:[#allocation76_spill] sm:$0xff] %v4553_v12  ;;  %v1374_v20 = vadd.f32 %v1373_v0, %v1372_v40  ;;  %v1255_v22 = vadd.f32 %v1254_v23, %v1253_v61  ;;  %v1135_v62 = vmul.f32 %v4506_v32, %v7065_v49  ;;  %v1260_v51 = vadd.f32 %v1127_v35, %v1126_v21  ;;  %v7069_v35 = vld [vmem:[#allocation54_spill] sm:$0xff]  ;;  %v7071_v12 = vld [vmem:[#allocation56_spill] sm:$0xff] }
 0x159   : > { %v1179_v42 = vrot.slane %v1178_v4, 2  ;;  %v1230_v17 = vrot.slane %v4545_v2, 1  ;;  %v3542_v63 = vpop.eup %3541  ;;  %v1143_v48 = vmul.f32 %v4506_v32, %v7066_v6  ;;  %vm1032_vm12 = vweird.f32 %v4516_v13 }
 0x15a   : > { %v1375_v39 = vrot.slane %v1374_v20, 2  ;;  %v1207_v33 = vrot.slane %v1206_v15, 2  ;;  %v1028_v40 = vmul.f32 %v3542_v63, %v4516_v13  ;;  %vm4566_vm13 = vcmp.eq.f32.partialorder %v1036_v10, 8.507059e+37  ;;  %v7070_v10 = vld [vmem:[#allocation55_spill] sm:$0xff] }
 0x15b   : > { %v1039_v53 = vor.u32 1.1754944e-38, %v1038_v27  ;;  %v1234_v61 = vadd.f32 %v1233_v52, %v1232_v30  ;;  %v1134_v21 = vmul.f32 %v4503_v7, %v7069_v35  ;;  %v1180_v23 = vadd.f32 %v1179_v42, %v1178_v4  ;;  %v7072_v52 = vld [vmem:[#allocation60_spill] sm:$0xff] }
 0x15c   : > { %v3544_v0 = vpop.eup %3543  ;;  %v1249_v14 = vrot.slane %v1248_v29, 2  ;;  %v1256_v49 = vrot.slane %v1255_v22, 2  ;;  %v1376_v6 = vadd.f32 %v1375_v39, %v1374_v20  ;;  %v1029_v11 = vsub.f32 1.0, %v1028_v40 }
 0x15d   : > { %v1077_v5 = vmul.f32 %v3544_v0, %v4539_v37  ;;  %vm1082_vm14 = vweird.f32 %v4539_v37  ;;  %v1261_v36 = vrot.slane %v1260_v51, 4  ;;  %v1142_v26 = vmul.f32 %v4503_v7, %v7070_v10 }
 0x15e   : > { %v4578_v30 = vmul.f32 %v4503_v7, %v7071_v12  ;;  %v4582_v27 = vmul.f32 %v4506_v32, %v7072_v52  ;;  %v1208_v42 = vadd.f32 %v1207_v33, %v1206_v15  ;;  %v1030_v4 = vmul.f32 %v3542_v63, %v1029_v11 }
 0x15f   : > { %vm1033_vm15 = vweird.f32 %v3542_v63  ;;  %v1078_v20 = vmul.f32 %v3544_v0, %v1077_v5  ;;  %v1235_v39 = vrot.slane %v1234_v61, 2  ;;  %vm1083_vm1 = vweird.f32 %v3544_v0 }
 0x160   : > { %v1181_v40 = vrot.slane %v1180_v23, 1  ;;  %v1250_v35 = vadd.f32 %v1249_v14, %v1248_v29  ;;  %v1257_v59 = vadd.f32 %v1256_v49, %v1255_v22  ;;  %v1377_v8 = vrot.slane %v1376_v6, 1  ;;  %vm1034_vm2 = vmor %vm1032_vm12, %vm1033_vm15 }
 0x161   : > { %v1031_v34 = vadd.f32 %v3542_v63, %v1030_v4  ;;  %v1079_v10 = vmul.f32 0.5, %v1078_v20  ;;  %v1262_v3 = vadd.f32 %v1261_v36, %v1260_v51  ;;  %v1209_v7 = vrot.slane %v1208_v42, 1  ;;  %vm1084_vm3 = vmor %vm1082_vm14, %vm1083_vm1  ;;  %v7079_v4 = vld [vmem:[#allocation34_spill] sm:$0xff]  ;;  %v7080_v20 = vld [vmem:[#allocation31_spill] sm:$0xff] }
 0x162   : > { %v1274_v32 = vadd.f32 %v4393_v57, %v4419_v19  ;;  %v1281_v11 = vadd.f32 %v4481_v47, %v4492_v41  ;;  %v1288_v5 = vadd.f32 %v1135_v62, %v1134_v21  ;;  %v1302_v14 = vadd.f32 %v4397_v56, %v4423_v46 }
 0x163   : > { %v1035_v15 = vsel %vm1034_vm2, %v3542_v63, %v1031_v34  ;;  %v1080_v33 = vsub.f32 1.5, %v1079_v10  ;;  %v1263_v52 = vrot.slane %v1262_v3, 2  ;;  %v1236_v36 = vadd.f32 %v1235_v39, %v1234_v61 }
 0x164   : > { %v1040_v51 = vsel %vm4566_vm13, %v1039_v53, %v1035_v15  ;;  %v1275_v13 = vrot.slane %v1274_v32, 4  ;;  %v1282_v29 = vrot.slane %v1281_v11, 4  ;;  %v1251_v57 = vrot.slane %v1250_v35, 1 }
 0x165   : > { %v1041_v22 = vmul.f32 %v1040_v51, %v4488_v45  ;;  %v1081_v49 = vmul.f32 %v3544_v0, %v1080_v33  ;;  %v1289_v19 = vrot.slane %v1288_v5, 4  ;;  %v4599_v34 = vadd.f32 %v1230_v17, %v4545_v2 }
 0x166   : > { %v1264_v47 = vadd.f32 %v1263_v52, %v1262_v3  ;;  %v1276_v56 = vadd.f32 %v1275_v13, %v1274_v32  ;;  %v1303_v46 = vrot.slane %v1302_v14, 4  ;;  %v1283_v62 = vadd.f32 %v1282_v29, %v1281_v11 }
 0x167   : > { %7073 = vst [vmem:[#allocation77_spill] sm:$0xff] %v4599_v34  ;;  %v1085_v41 = vsel %vm1084_vm3, %v3544_v0, %v1081_v49  ;;  %v1309_v63 = vadd.f32 %v4486_v9, %v4496_v24  ;;  %v1316_v60 = vadd.f32 %v1143_v48, %v1142_v26  ;;  %v4603_v45 = vadd.f32 %v1377_v8, %v1376_v6  ;;  %v7078_v48 = vld [vmem:[#allocation30_spill] sm:$0xff] }
 0x168   : > { %v1089_v53 = vmul.f32 %v1085_v41, %v1041_v22  ;;  %v4605_v61 = vadd.f32 %v1181_v40, %v1180_v23  ;;  %v1258_v21 = vrot.slane %v1257_v59, 1  ;;  %v4607_v37 = vadd.f32 %v1209_v7, %v1208_v42  ;;  %v7082_v7 = vld [vmem:[#allocation33_spill] sm:$0xff] }
 0x169   : > { %7074 = vst [vmem:[#allocation78_spill] sm:$0xff] %v4603_v45  ;;  %v1237_v10 = vrot.slane %v1236_v36, 1  ;;  %v4609_v2 = vadd.f32 %v1251_v57, %v1250_v35  ;;  %v1290_v3 = vadd.f32 %v1289_v19, %v1288_v5  ;;  %v1265_v52 = vrot.slane %v1264_v47, 1 }
 0x16a   : > { %7075 = vst [vmem:[#allocation79_spill] sm:$0xff] %v4605_v61  ;;  %v1096_v17 = vmul.f32 %v1089_v53, %v4343_v16  ;;  %v4613_v0 = vmul.f32 %v1089_v53, %v4389_v54  ;;  %v1304_v9 = vadd.f32 %v1303_v46, %v1302_v14  ;;  %v1277_v26 = vrot.slane %v1276_v56, 2  ;;  %v7081_v16 = vld [vmem:[#allocation32_spill] sm:$0xff] }
 0x16b   : > { %7076 = vst [vmem:[#allocation80_spill] sm:$0xff] %v4607_v37  ;;  %v1284_v8 = vrot.slane %v1283_v62, 2  ;;  %v1310_v24 = vrot.slane %v1309_v63, 4  ;;  %v1317_v6 = vrot.slane %v1316_v60, 4  ;;  %v4630_v33 = vadd.f32 %v1237_v10, %v1236_v36  ;;  %v7086_v10 = vld [vmem:[#allocation63_spill] sm:$0xff] }
 0x16c   : > { %7077 = vst [vmem:[#allocation81_spill] sm:$0xff] %v4609_v2  ;;  %v1104_v23 = vmul.f32 %v1096_v17, %v7078_v48  ;;  %v1105_v42 = vmul.f32 %v4613_v0, %v7079_v4  ;;  %v1112_v35 = vmul.f32 %v1096_v17, %v7080_v20  ;;  %v1113_v39 = vmul.f32 %v4613_v0, %v4075_v38 }
 0x16d   : > { %v1120_v40 = vmul.f32 %v1096_v17, %v7081_v16  ;;  %v1121_v54 = vmul.f32 %v4613_v0, %v4085_v43  ;;  %v1128_v32 = vmul.f32 %v1096_v17, %v7082_v7  ;;  %v1129_v11 = vmul.f32 %v4613_v0, %v4087_v44  ;;  %7083 = vst [vmem:[#allocation82_spill] sm:$0xff] %v4630_v33 }
 0x16e   : > { %v1136_v5 = vmul.f32 %v1096_v17, %v4265_v28  ;;  %v1137_v15 = vmul.f32 %v4613_v0, %v4303_v25  ;;  %v4632_v14 = vadd.f32 %v1258_v21, %v1257_v59  ;;  %v4634_v51 = vadd.f32 %v1265_v52, %v1264_v47 }
 0x16f   : > { %v1278_v13 = vadd.f32 %v1277_v26, %v1276_v56  ;;  %v1291_v29 = vrot.slane %v1290_v3, 2  ;;  %v1305_v22 = vrot.slane %v1304_v9, 2  ;;  %v1183_v49 = vadd.f32 %v1105_v42, %v1104_v23  ;;  %v7087_v42 = vld [vmem:[#allocation67_spill] sm:$0xff] }
 0x170   : > { %7084 = vst [vmem:[#allocation83_spill] sm:$0xff] %v4632_v14  ;;  %v1211_v57 = vadd.f32 %v1113_v39, %v1112_v35  ;;  %v1239_v19 = vadd.f32 %v1121_v54, %v1120_v40  ;;  %v1267_v46 = vadd.f32 %v1129_v11, %v1128_v32  ;;  %v1285_v41 = vadd.f32 %v1284_v8, %v1283_v62  ;;  %v7088_v40 = vld [vmem:[#allocation64_spill] sm:$0xff] }
 0x171   : > { %7085 = vst [vmem:[#allocation84_spill] sm:$0xff] %v4634_v51  ;;  %v1295_v53 = vadd.f32 %v1137_v15, %v1136_v5  ;;  %v1311_v12 = vadd.f32 %v1310_v24, %v1309_v63  ;;  %v1318_v28 = vadd.f32 %v1317_v6, %v1316_v60  ;;  %v1184_v44 = vrot.slane %v1183_v49, 4  ;;  %v7089_v15 = vld [vmem:[#allocation66_spill] sm:$0xff] }
 0x172   : > { %v1212_v7 = vrot.slane %v1211_v57, 4  ;;  %v1240_v25 = vrot.slane %v1239_v19, 4  ;;  %v1268_v36 = vrot.slane %v1267_v46, 4  ;;  %v1144_v59 = vmul.f32 %v1096_v17, %v7086_v10 }
 0x173   : > { %v1292_v21 = vadd.f32 %v1291_v29, %v1290_v3  ;;  %v1296_v47 = vrot.slane %v1295_v53, 4  ;;  %v1306_v52 = vadd.f32 %v1305_v22, %v1304_v9  ;;  %v1185_v56 = vadd.f32 %v1184_v44, %v1183_v49 }
 0x174   : > { %v1213_v26 = vadd.f32 %v1212_v7, %v1211_v57  ;;  %v1241_v43 = vadd.f32 %v1240_v25, %v1239_v19  ;;  %v1269_v23 = vadd.f32 %v1268_v36, %v1267_v46  ;;  %v1145_v35 = vmul.f32 %v4613_v0, %v7087_v42 }
 0x175   : > { %v1297_v62 = vadd.f32 %v1296_v47, %v1295_v53  ;;  %v1312_v8 = vrot.slane %v1311_v12, 2  ;;  %v1319_v63 = vrot.slane %v1318_v28, 2  ;;  %v1186_v60 = vrot.slane %v1185_v56, 2 }
 0x176   : > { %v1214_v24 = vrot.slane %v1213_v26, 2  ;;  %v1279_v6 = vrot.slane %v1278_v13, 1  ;;  %v1286_v39 = vrot.slane %v1285_v41, 1  ;;  %v1152_v54 = vmul.f32 %v1096_v17, %v7088_v40 }
 0x177   : > { %v1242_v32 = vrot.slane %v1241_v43, 2  ;;  %v1270_v3 = vrot.slane %v1269_v23, 2  ;;  %v1293_v11 = vrot.slane %v1292_v21, 1  ;;  %v1298_v9 = vrot.slane %v1297_v62, 2 }
 0x178   : > { %v1307_v44 = vrot.slane %v1306_v52, 1  ;;  %v1313_v7 = vadd.f32 %v1312_v8, %v1311_v12  ;;  %v1320_v25 = vadd.f32 %v1319_v63, %v1318_v28  ;;  %v1153_v5 = vmul.f32 %v4613_v0, %v4348_v55 }
 0x179   : > { %v1160_v29 = vmul.f32 %v1096_v17, %v7089_v15  ;;  %v1187_v22 = vadd.f32 %v1186_v60, %v1185_v56  ;;  %v1323_v49 = vadd.f32 %v1145_v35, %v1144_v59  ;;  %v1161_v57 = vmul.f32 %v4613_v0, %v4359_v50 }
 0x17a   : > { %v1215_v19 = vadd.f32 %v1214_v24, %v1213_v26  ;;  %v4645_v46 = vadd.f32 %v1279_v6, %v1278_v13  ;;  %v4647_v53 = vadd.f32 %v1286_v39, %v1285_v41  ;;  %v1243_v36 = vadd.f32 %v1242_v32, %v1241_v43 }
 0x17b   : > { %v1271_v47 = vadd.f32 %v1270_v3, %v1269_v23  ;;  %v4649_v40 = vadd.f32 %v1293_v11, %v1292_v21  ;;  %v1324_v28 = vrot.slane %v1323_v49, 4  ;;  %v1299_v12 = vadd.f32 %v1298_v9, %v1297_v62 }
 0x17c   : > { %7090 = vst [vmem:[#allocation85_spill] sm:$0xff] %v4645_v46  ;;  %v4651_v8 = vadd.f32 %v1307_v44, %v1306_v52  ;;  %v1314_v63 = vrot.slane %v1313_v7, 1  ;;  %v1321_v17 = vrot.slane %v1320_v25, 1  ;;  %v1188_v56 = vrot.slane %v1187_v22, 1 }
 0x17d   : > { %7091 = vst [vmem:[#allocation86_spill] sm:$0xff] %v4647_v53  ;;  %v1325_v59 = vadd.f32 %v1324_v28, %v1323_v49  ;;  %v1330_v0 = vadd.f32 %v4431_v31, %v4427_v18  ;;  %v1337_v13 = vadd.f32 %v4510_v1, %v4500_v58  ;;  %v1216_v41 = vrot.slane %v1215_v19, 1 }
 0x17e   : > { %7092 = vst [vmem:[#allocation87_spill] sm:$0xff] %v4649_v40  ;;  %v1344_v43 = vadd.f32 %v4582_v27, %v4578_v30  ;;  %v1351_v21 = vadd.f32 %v1153_v5, %v1152_v54  ;;  %v1379_v26 = vadd.f32 %v1161_v57, %v1160_v29  ;;  %v1244_v23 = vrot.slane %v1243_v36, 1 }
 0x17f   : > { %7093 = vst [vmem:[#allocation88_spill] sm:$0xff] %v4651_v8  ;;  %v1272_v35 = vrot.slane %v1271_v47, 1  ;;  %v1331_v52 = vrot.slane %v1330_v0, 4  ;;  %v1338_v62 = vrot.slane %v1337_v13, 4  ;;  %v1326_v60 = vrot.slane %v1325_v59, 2 }
 0x180   : > { %v1345_v24 = vrot.slane %v1344_v43, 4  ;;  %v1352_v6 = vrot.slane %v1351_v21, 4  ;;  %v1380_v39 = vrot.slane %v1379_v26, 4  ;;  %v1300_v32 = vrot.slane %v1299_v12, 1 }
 0x181   : > { %v4659_v3 = vadd.f32 %v1314_v63, %v1313_v7  ;;  %v1332_v18 = vadd.f32 %v1331_v52, %v1330_v0  ;;  %v1339_v31 = vadd.f32 %v1338_v62, %v1337_v13  ;;  %v4661_v58 = vadd.f32 %v1321_v17, %v1320_v25  ;;  %v7099_v0 = vld [vmem:[#allocation73_spill] sm:$0xff]  ;;  %v7100_v25 = vld [vmem:[#allocation71_spill] sm:$0xff] }
 0x182   : > { %v1346_v1 = vadd.f32 %v1345_v24, %v1344_v43  ;;  %v1353_v11 = vadd.f32 %v1352_v6, %v1351_v21  ;;  %v1381_v30 = vadd.f32 %v1380_v39, %v1379_v26  ;;  %v4663_v27 = vadd.f32 %v1188_v56, %v1187_v22  ;;  %v7101_v22 = vld [vmem:[#allocation75_spill] sm:$0xff]  ;;  %v7102_v56 = vld [vmem:[#allocation72_spill] sm:$0xff] }
 0x183   : > { %7094 = vst [vmem:[#allocation89_spill] sm:$0xff] %v4659_v3  ;;  %v4665_v54 = vadd.f32 %v1216_v41, %v1215_v19  ;;  %v1333_v9 = vrot.slane %v1332_v18, 2  ;;  %v1340_v44 = vrot.slane %v1339_v31, 2  ;;  %v1327_v5 = vadd.f32 %v1326_v60, %v1325_v59  ;;  %v7105_v39 = vld [vmem:[#allocation76_spill] sm:$0xff] }
 0x184   : > { %7095 = vst [vmem:[#allocation90_spill] sm:$0xff] %v4661_v58  ;;  %v1347_v29 = vrot.slane %v1346_v1, 2  ;;  %v1354_v49 = vrot.slane %v1353_v11, 2  ;;  %v1382_v57 = vrot.slane %v1381_v30, 2  ;;  %v4667_v28 = vadd.f32 %v1244_v23, %v1243_v36 }
 0x185   : > { %7096 = vst [vmem:[#allocation91_spill] sm:$0xff] %v4663_v27  ;;  %v1334_v7 = vadd.f32 %v1333_v9, %v1332_v18  ;;  %v1341_v63 = vadd.f32 %v1340_v44, %v1339_v31  ;;  %v1418_v17 = vmax.f32 %v7100_v25, %v7099_v0  ;;  %v1421_v19 = vmax.f32 %v7102_v56, %v7101_v22 }
 0x186   : > { %7097 = vst [vmem:[#allocation92_spill] sm:$0xff] %v4665_v54  ;;  %v1348_v13 = vadd.f32 %v1347_v29, %v1346_v1  ;;  %v1355_v43 = vadd.f32 %v1354_v49, %v1353_v11  ;;  %v1383_v21 = vadd.f32 %v1382_v57, %v1381_v30  ;;  %v4673_v41 = vadd.f32 %v1272_v35, %v1271_v47 }
 0x187   : > { %7098 = vst [vmem:[#allocation93_spill] sm:$0xff] %v4667_v28  ;;  %v1335_v26 = vrot.slane %v1334_v7, 1  ;;  %v1342_v59 = vrot.slane %v1341_v63, 1  ;;  %v1419_v52 = vmax.f32 %v1418_v17, %v4605_v61  ;;  %v1328_v62 = vrot.slane %v1327_v5, 1 }
 0x188   : > { %7103 = vst [vmem:[#allocation94_spill] sm:$0xff] %v4673_v41  ;;  %v1349_v36 = vrot.slane %v1348_v13, 1  ;;  %v1384_v23 = vrot.slane %v1383_v21, 1  ;;  %v1422_v60 = vmax.f32 %v1421_v19, %v4607_v37  ;;  %v1356_v6 = vrot.slane %v1355_v43, 1  ;;  %v7112_v19 = vld [vmem:[#allocation70_spill] sm:$0xff] }
 0x189   : > { %v4677_v24 = vadd.f32 %v1342_v59, %v1341_v63  ;;  %v1424_v18 = vmax.f32 %v7105_v39, %v4599_v34  ;;  %v1427_v31 = vmax.f32 %v4609_v2, %v4632_v14  ;;  %v4683_v47 = vadd.f32 %v1300_v32, %v1299_v12 }
 0x18a   : > { %v1420_v35 = vmax.f32 %v1419_v52, %v4663_v27  ;;  %v4687_v1 = vmax.f32 %v1422_v60, %v4665_v54  ;;  %v1430_v11 = vmax.f32 %v4645_v46, %v4647_v53  ;;  %v4691_v30 = vadd.f32 %v1335_v26, %v1334_v7  ;;  %v7113_v26 = vld [vmem:[#allocation74_spill] sm:$0xff] }
 0x18b   : > { %7104 = vst [vmem:[#allocation95_spill] sm:$0xff] %v4677_v24  ;;  %v4693_v9 = vadd.f32 %v1349_v36, %v1348_v13  ;;  %v1425_v44 = vmax.f32 %v1424_v18, %v4630_v33  ;;  %v1428_v29 = vmax.f32 %v1427_v31, %v4634_v51  ;;  %v4697_v49 = vadd.f32 %v1328_v62, %v1327_v5 }
 0x18c   : > { %7106 = vst [vmem:[#allocation96_spill] sm:$0xff] %v4683_v47  ;;  %v4699_v12 = vadd.f32 %v1384_v23, %v1383_v21  ;;  %v1431_v32 = vmax.f32 %v1430_v11, %v4649_v40  ;;  %v1433_v57 = vmax.f32 %v4651_v8, %v4659_v3  ;;  %v4704_v63 = vadd.f32 %v1356_v6, %v1355_v43 }
 0x18d   : > { %7107 = vst [vmem:[#allocation97_spill] sm:$0xff] %v4691_v30  ;;  %v1426_v7 = vmax.f32 %v1425_v44, %v4667_v28  ;;  %v4708_v17 = vmax.f32 %v1428_v29, %v4673_v41  ;;  %v1436_v13 = vmax.f32 %v4691_v30, %v4677_v24  ;;  %v7114_v59 = vmax.f32 %v7112_v19, %v7113_v26 }
 0x18e   : > { %7108 = vst [vmem:[#allocation98_spill] sm:$0xff] %v4693_v9  ;;  %v4713_v5 = vmax.f32 %v1431_v32, %v4683_v47  ;;  %v1434_v21 = vmax.f32 %v1433_v57, %v4661_v58  ;;  %v1442_v43 = vsub.f32 %v7100_v25, %v1420_v35  ;;  %v1443_v36 = vsub.f32 %v7099_v0, %v1420_v35 }
 0x18f   : > { %7109 = vst [vmem:[#allocation99_spill] sm:$0xff] %v4697_v49  ;;  %v1440_v52 = vmax.f32 %v7114_v59, %v4603_v45  ;;  %v1437_v62 = vmax.f32 %v1436_v13, %v4693_v9  ;;  %v1444_v23 = vsub.f32 %v4605_v61, %v1420_v35  ;;  %v1445_v60 = vsub.f32 %v4663_v27, %v1420_v35 }
 0x190   : > { %7110 = vst [vmem:[#allocation100_spill] sm:$0xff] %v4699_v12  ;;  %v4726_v6 = vmax.f32 %v1434_v21, %v4697_v49  ;;  %v1446_v31 = vsub.f32 %v7102_v56, %v4687_v1  ;;  %v1447_v11 = vsub.f32 %v7101_v22, %v4687_v1  ;;  %v1448_v29 = vsub.f32 %v4607_v37, %v4687_v1 }
 0x191   : > { %7111 = vst [vmem:[#allocation101_spill] sm:$0xff] %v4704_v63  ;;  %v4729_v18 = vmax.f32 %v1440_v52, %v4699_v12  ;;  %v4736_v44 = vmax.f32 %v1437_v62, %v4704_v63  ;;  %v1449_v35 = vsub.f32 %v4665_v54, %v4687_v1  ;;  %v1450_v32 = vsub.f32 %v7105_v39, %v1426_v7 }
 0x192   : > { %v1451_v57 = vsub.f32 %v4599_v34, %v1426_v7  ;;  %v1452_v13 = vsub.f32 %v4630_v33, %v1426_v7  ;;  %v1453_v21 = vsub.f32 %v4667_v28, %v1426_v7  ;;  %v1454_v59 = vsub.f32 %v4609_v2, %v4708_v17 }
 0x193   : > { %v1455_v52 = vsub.f32 %v4632_v14, %v4708_v17  ;;  %v1456_v62 = vsub.f32 %v4634_v51, %v4708_v17  ;;  %v1457_v1 = vsub.f32 %v4673_v41, %v4708_v17  ;;  %v1458_v54 = vsub.f32 %v4645_v46, %v4713_v5 }
 0x194   : > { %v1459_v27 = vsub.f32 %v4647_v53, %v4713_v5  ;;  %v1460_v7 = vsub.f32 %v4649_v40, %v4713_v5  ;;  %v1461_v28 = vsub.f32 %v4683_v47, %v4713_v5  ;;  %v1462_v33 = vsub.f32 %v4651_v8, %v4726_v6 }
 0x195   : > { %v1463_v51 = vsub.f32 %v4659_v3, %v4726_v6  ;;  %v1474_v37 = vmul.f32 1.442695, %v1442_v43  ;;  %v1476_v17 = vmul.f32 1.442695, %v1443_v36  ;;  %v1478_v41 = vmul.f32 1.442695, %v1444_v23 }
 0x196   : > { %v1464_v61 = vsub.f32 %v4661_v58, %v4726_v6  ;;  %v1465_v53 = vsub.f32 %v4697_v49, %v4726_v6  ;;  %v1466_v40 = vsub.f32 %v4691_v30, %v4736_v44  ;;  %v1480_v46 = vmul.f32 1.442695, %v1445_v60 }
 0x197   : > { %v1467_v5 = vsub.f32 %v4677_v24, %v4736_v44  ;;  %v1468_v47 = vsub.f32 %v4693_v9, %v4736_v44  ;;  %3545 = vpow2.f32 %v1474_v37  ;;  %v1482_v43 = vmul.f32 1.442695, %v1446_v31 }
 0x198   : > { %3547 = vpow2.f32 %v1476_v17  ;;  %v1484_v6 = vmul.f32 1.442695, %v1447_v11  ;;  %v1486_v58 = vmul.f32 1.442695, %v1448_v29  ;;  %v1488_v31 = vmul.f32 1.442695, %v1449_v35 }
 0x199   : > { %3549 = vpow2.f32 %v1478_v41  ;;  %v1490_v9 = vmul.f32 1.442695, %v1450_v32  ;;  %v1492_v36 = vmul.f32 1.442695, %v1451_v57  ;;  %v1494_v24 = vmul.f32 1.442695, %v1452_v13 }
 0x19a   : > { %3551 = vpow2.f32 %v1480_v46  ;;  %v1496_v23 = vmul.f32 1.442695, %v1453_v21  ;;  %v1498_v11 = vmul.f32 1.442695, %v1454_v59  ;;  %v1500_v17 = vmul.f32 1.442695, %v1455_v52 }
 0x19b   : > { %3553 = vpow2.f32 %v1482_v43  ;;  %v1502_v30 = vmul.f32 1.442695, %v1456_v62  ;;  %v1504_v60 = vmul.f32 1.442695, %v1457_v1  ;;  %v1506_v41 = vmul.f32 1.442695, %v1458_v54 }
 0x19c   : > { %3555 = vpow2.f32 %v1484_v6  ;;  %v1508_v29 = vmul.f32 1.442695, %v1459_v27  ;;  %v1510_v46 = vmul.f32 1.442695, %v1460_v7  ;;  %v1512_v35 = vmul.f32 1.442695, %v1461_v28 }
 0x19d   : > { %v4786_v49 = vpop.eup %3545  ;;  %3557 = vpow2.f32 %v1486_v58  ;;  %v1514_v32 = vmul.f32 1.442695, %v1462_v33  ;;  %v4792_v57 = vmul.f32 1.442695, %v1463_v51  ;;  %v4794_v13 = vmul.f32 1.442695, %v1464_v61 }
 0x19e   : > { %v4788_v3 = vpop.eup %3547  ;;  %3559 = vpow2.f32 %v1488_v31  ;;  %vm1571_vm4 = vcmask 1041409   ;;  %vm1574_vm5 = vcmask 1042434   ;;  %vm1577_vm6 = vcmask 1043459  }
 0x19f   : > { %v4790_v43 = vpop.eup %3549  ;;  %3561 = vpow2.f32 %v1490_v9  ;;  %v1570_v21 = vrot.slane %v4788_v3, 7  ;;  %v1520_v54 = vmul.f32 1.442695, %v1465_v53  ;;  %v1522_v28 = vmul.f32 1.442695, %v1466_v40 }
 0x1a0   : > { %v4797_v59 = vpop.eup %3551  ;;  %3563 = vpow2.f32 %v1492_v36  ;;  %v1573_v58 = vrot.slane %v4790_v43, 6  ;;  %v4810_v62 = vmul.f32 1.442695, %v1467_v5  ;;  %v4816_v36 = vmul.f32 1.442695, %v1468_v47 }
 0x1a1   : > { %v4800_v27 = vpop.eup %3553  ;;  %3565 = vpow2.f32 %v1494_v24  ;;  %v1572_v33 = vsel %vm1571_vm4, %v1570_v21, %v4786_v49  ;;  %v1576_v51 = vrot.slane %v4797_v59, 5  ;;  %v7115_v47 = vsub.f32 %v4704_v63, %v4736_v44 }
 0x1a2   : > { %v4805_v61 = vpop.eup %3555  ;;  %3567 = vpow2.f32 %v1496_v23  ;;  %v1575_v9 = vsel %vm1574_vm5, %v1573_v58, %v1572_v33  ;;  %v7116_v21 = vsub.f32 %v7112_v19, %v4729_v18  ;;  %v7117_v44 = vsub.f32 %v7113_v26, %v4729_v18 }
 0x1a3   : > { %v4808_v52 = vpop.eup %3557  ;;  %3569 = vpow2.f32 %v1498_v11  ;;  %v1578_v24 = vsel %vm1577_vm6, %v1576_v51, %v1575_v9  ;;  %v1579_v1 = vrot.slane %v4805_v61, 7 }
 0x1a4   : > { %v4814_v7 = vpop.eup %3559  ;;  %3571 = vpow2.f32 %v1500_v17  ;;  %v1581_v23 = vrot.slane %v4808_v52, 6  ;;  %v1629_v40 = vsel %vm319_vm0, %v1578_v24, 0.0  ;;  %v1528_v17 = vmul.f32 1.442695, %v7115_v47 }
 0x1a5   : > { %v4820_v53 = vpop.eup %3561  ;;  %3573 = vpow2.f32 %v1502_v30  ;;  %v1580_v5 = vsel %vm1571_vm4, %v1579_v1, %v4800_v27  ;;  %v1583_v6 = vrot.slane %v4814_v7, 5  ;;  %v1630_v31 = vrot.slane %v1629_v40, 4 }
 0x1a6   : > { %v4825_v11 = vpop.eup %3563  ;;  %3575 = vpow2.f32 %v1504_v60  ;;  %v1530_v58 = vmul.f32 1.442695, %v7116_v21  ;;  %v1582_v33 = vsel %vm1574_vm5, %v1581_v23, %v1580_v5  ;;  %v1532_v60 = vmul.f32 1.442695, %v7117_v44 }
 0x1a7   : > { %v4834_v30 = vpop.eup %3565  ;;  %3577 = vpow2.f32 %v1506_v41  ;;  %v1584_v51 = vsel %vm1577_vm6, %v1583_v6, %v1582_v33  ;;  %v1585_v9 = vrot.slane %v4825_v11, 7  ;;  %v1631_v24 = vadd.f32 %v1630_v31, %v1629_v40 }
 0x1a8   : > { %v4838_v1 = vpop.eup %3567  ;;  %3579 = vpow2.f32 %v1508_v29  ;;  %v1587_v47 = vrot.slane %v4834_v30, 6  ;;  %v1636_v21 = vsel %vm319_vm0, %v1584_v51, 0.0  ;;  %v7118_v29 = vsub.f32 %v4603_v45, %v4729_v18 }
 0x1a9   : > { %v4845_v23 = vpop.eup %3569  ;;  %3581 = vpow2.f32 %v1510_v46  ;;  %v1586_v41 = vsel %vm1571_vm4, %v1585_v9, %v4820_v53  ;;  %v1589_v5 = vrot.slane %v4838_v1, 5  ;;  %v1632_v40 = vrot.slane %v1631_v24, 2 }
 0x1aa   : > { %v4850_v6 = vpop.eup %3571  ;;  %3583 = vpow2.f32 %v1512_v35  ;;  %v1534_v31 = vmul.f32 1.442695, %v7118_v29  ;;  %v1588_v33 = vsel %vm1574_vm5, %v1587_v47, %v1586_v41  ;;  %v1637_v44 = vrot.slane %v1636_v21, 4 }
 0x1ab   : > { %v4856_v51 = vpop.eup %3573  ;;  %3585 = vpow2.f32 %v1514_v32  ;;  %v1590_v46 = vsel %vm1577_vm6, %v1589_v5, %v1588_v33  ;;  %v1591_v9 = vrot.slane %v4850_v6, 7  ;;  %v1633_v37 = vadd.f32 %v1632_v40, %v1631_v24 }
 0x1ac   : > { %v4860_v63 = vpop.eup %3575  ;;  %3587 = vpow2.f32 %v4792_v57  ;;  %v1593_v35 = vrot.slane %v4856_v51, 6  ;;  %v1638_v26 = vadd.f32 %v1637_v44, %v1636_v21  ;;  %v1643_v29 = vsel %vm319_vm0, %v1590_v46, 0.0 }
 0x1ad   : > { %v4865_v45 = vpop.eup %3577  ;;  %3589 = vpow2.f32 %v4794_v13  ;;  %v1592_v32 = vsel %vm1571_vm4, %v1591_v9, %v4845_v23  ;;  %v1595_v47 = vrot.slane %v4860_v63, 5  ;;  %v1634_v41 = vrot.slane %v1633_v37, 1 }
 0x1ae   : > { %v4871_v24 = vpop.eup %3579  ;;  %3591 = vpow2.f32 %v1520_v54  ;;  %v1594_v57 = vsel %vm1574_vm5, %v1593_v35, %v1592_v32  ;;  %v1639_v5 = vrot.slane %v1638_v26, 2  ;;  %v1644_v40 = vrot.slane %v1643_v29, 4 }
 0x1af   : > { %v4874_v21 = vpop.eup %3581  ;;  %3593 = vpow2.f32 %v1522_v28  ;;  %v7119_v33 = vsub.f32 %v4699_v12, %v4729_v18  ;;  %v1596_v44 = vsel %vm1577_vm6, %v1595_v47, %v1594_v57  ;;  %v1597_v46 = vrot.slane %v4871_v24, 7 }
 0x1b0   : > { %v4881_v9 = vpop.eup %3583  ;;  %3595 = vpow2.f32 %v4810_v62  ;;  %v1599_v54 = vrot.slane %v4874_v21, 6  ;;  %v1640_v35 = vadd.f32 %v1639_v5, %v1638_v26  ;;  %v1645_v32 = vadd.f32 %v1644_v40, %v1643_v29 }
 0x1b1   : > { %v1536_v13 = vmul.f32 1.442695, %v7119_v33  ;;  %v4885_v19 = vpop.eup %3585  ;;  %3597 = vpow2.f32 %v4816_v36  ;;  %v1598_v18 = vsel %vm1571_vm4, %v1597_v46, %v4865_v45  ;;  %v1601_v28 = vrot.slane %v4881_v9, 5 }
 0x1b2   : > { %v1650_v47 = vsel %vm319_vm0, %v1596_v44, 0.0  ;;  %v4892_v57 = vpop.eup %3587  ;;  %3599 = vpow2.f32 %v1528_v17  ;;  %v1600_v62 = vsel %vm1574_vm5, %v1599_v54, %v1598_v18  ;;  %v1635_v33 = vadd.f32 %v1634_v41, %v1633_v37 }
 0x1b3   : > { %v1646_v12 = vrot.slane %v1645_v32, 2  ;;  %v4895_v26 = vpop.eup %3589  ;;  %3601 = vpow2.f32 %v1530_v58  ;;  %v1602_v29 = vsel %vm1577_vm6, %v1601_v28, %v1600_v62  ;;  %v1603_v36 = vrot.slane %v4892_v57, 7 }
 0x1b4   : > { %v1651_v5 = vrot.slane %v1650_v47, 4  ;;  %v4899_v40 = vpop.eup %3591  ;;  %3603 = vpow2.f32 %v1532_v60  ;;  %v1605_v44 = vrot.slane %v4895_v26, 6  ;;  %v1641_v46 = vrot.slane %v1640_v35, 1 }
 0x1b5   : > { %v1647_v8 = vadd.f32 %v1646_v12, %v1645_v32  ;;  %v4902_v17 = vpop.eup %3593  ;;  %3605 = vpow2.f32 %v1534_v31  ;;  %v1604_v37 = vsel %vm1571_vm4, %v1603_v36, %v4885_v19  ;;  %v1607_v58 = vrot.slane %v4899_v40, 5 }
 0x1b6   : > { %v1652_v41 = vadd.f32 %v1651_v5, %v1650_v47  ;;  %v4907_v54 = vpop.eup %3595  ;;  %3607 = vpow2.f32 %v1536_v13  ;;  %v1606_v18 = vsel %vm1574_vm5, %v1605_v44, %v1604_v37  ;;  %v1657_v60 = vsel %vm319_vm0, %v1602_v29, 0.0 }
 0x1b7   : > { %v1648_v28 = vrot.slane %v1647_v8, 1  ;;  %v4911_v62 = vpop.eup %3597  ;;  %v1608_v12 = vsel %vm1577_vm6, %v1607_v58, %v1606_v18  ;;  %v1609_v31 = vrot.slane %v4907_v54, 7  ;;  %v1658_v14 = vrot.slane %v1657_v60, 4 }
 0x1b8   : > { %v1653_v32 = vrot.slane %v1652_v41, 2  ;;  %v4915_v36 = vpop.eup %3599  ;;  %v1611_v47 = vrot.slane %v4911_v62, 6  ;;  %v1642_v5 = vadd.f32 %v1641_v46, %v1640_v35  ;;  %v1664_v13 = vsel %vm319_vm0, %v1608_v12, 0.0 }
 0x1b9   : > { %v4919_v2 = vperm.slane %v1635_v33, 0  ;;  %v4921_v44 = vpop.eup %3601  ;;  %v1610_v29 = vsel %vm1571_vm4, %v1609_v31, %v4902_v17  ;;  %v1613_v37 = vrot.slane %v4915_v36, 5  ;;  %v1659_v18 = vadd.f32 %v1658_v14, %v1657_v60 }
 0x1ba   : > { %v1654_v58 = vadd.f32 %v1653_v32, %v1652_v41  ;;  %v4926_v34 = vpop.eup %3603  ;;  %v1612_v39 = vsel %vm1574_vm5, %v1611_v47, %v1610_v29  ;;  %v1649_v22 = vadd.f32 %v1648_v28, %v1647_v8  ;;  %v1665_v56 = vrot.slane %v1664_v13, 4 }
 0x1bb   : > { %v4929_v35 = vpop.eup %3605  ;;  %v1614_v33 = vsel %vm1577_vm6, %v1613_v37, %v1612_v39  ;;  %v1615_v46 = vrot.slane %v4926_v34, 7  ;;  %v1660_v0 = vrot.slane %v1659_v18, 2  ;;  %3609 = vrcp.f32 %v4919_v2 }
 0x1bc   : > { %v1655_v12 = vrot.slane %v1654_v58, 1  ;;  %v4933_v25 = vpop.eup %3607  ;;  %v1617_v31 = vrot.slane %v4929_v35, 6  ;;  %v1666_v41 = vadd.f32 %v1665_v56, %v1664_v13  ;;  %v1671_v14 = vsel %vm319_vm0, %v1614_v33, 0.0 }
 0x1bd   : > { %v1616_v8 = vsel %vm1571_vm4, %v1615_v46, %v4921_v44  ;;  %v1619_v28 = vrot.slane %v4933_v25, 5  ;;  %v1661_v60 = vadd.f32 %v1660_v0, %v1659_v18  ;;  %v4941_v39 = vperm.slane %v1642_v5, 0 }
 0x1be   : > { %v1618_v32 = vsel %vm1574_vm5, %v1617_v31, %v1616_v8  ;;  %v1667_v47 = vrot.slane %v1666_v41, 2  ;;  %v1672_v29 = vrot.slane %v1671_v14, 4  ;;  %v1656_v56 = vadd.f32 %v1655_v12, %v1654_v58 }
 0x1bf   : > { %v1620_v37 = vsel %vm1577_vm6, %v1619_v28, %v1618_v32  ;;  %v1662_v50 = vrot.slane %v1661_v60, 1  ;;  %v4946_v42 = vperm.slane %v1649_v22, 0  ;;  %3611 = vrcp.f32 %v4941_v39 }
 0x1c0   : > { %v1668_v13 = vadd.f32 %v1667_v47, %v1666_v41  ;;  %v1673_v33 = vadd.f32 %v1672_v29, %v1671_v14  ;;  %v1678_v15 = vsel %vm319_vm0, %v1620_v37, 0.0  ;;  %v1702_v31 = vand.u32 2147483647, %v4919_v2 }
 0x1c1   : > { %v1679_v55 = vrot.slane %v1678_v15, 4  ;;  %v3610_v0 = vpop.eup %3609  ;;  %v1663_v5 = vadd.f32 %v1662_v50, %v1661_v60  ;;  %v4951_v58 = vperm.slane %v1656_v56, 0  ;;  %vm1698_vm7 = vweird.f32 %v4919_v2 }
 0x1c2   : > { %v1669_v18 = vrot.slane %v1668_v13, 1  ;;  %v1674_v46 = vrot.slane %v1673_v33, 2  ;;  %v1694_v28 = vmul.f32 %v3610_v0, %v4919_v2  ;;  %v1704_v22 = vand.u32 2147483648, %v4919_v2 }
 0x1c3   : > { %v1680_v8 = vadd.f32 %v1679_v55, %v1678_v15  ;;  %3613 = vrcp.f32 %v4946_v42  ;;  %v4956_v60 = vperm.slane %v1663_v5, 0  ;;  %vm4958_vm8 = vcmp.eq.f32.partialorder %v1702_v31, 8.507059e+37 }
 0x1c4   : > { %v1675_v32 = vadd.f32 %v1674_v46, %v1673_v33  ;;  %v1695_v41 = vsub.f32 1.0, %v1694_v28  ;;  %v1670_v14 = vadd.f32 %v1669_v18, %v1668_v13  ;;  %vm1699_vm9 = vweird.f32 %v3610_v0 }
 0x1c5   : > { %v1681_v12 = vrot.slane %v1680_v8, 2  ;;  %v3612_v55 = vpop.eup %3611  ;;  %v1720_v37 = vand.u32 2147483647, %v4941_v39  ;;  %v1722_v33 = vand.u32 2147483648, %v4941_v39  ;;  %v1738_v46 = vand.u32 2147483647, %v4946_v42  ;;  %vm1700_vm10 = vmor %vm1698_vm7, %vm1699_vm9 }
 0x1c6   : > { %v1676_v50 = vrot.slane %v1675_v32, 1  ;;  %v1696_v29 = vmul.f32 %v3610_v0, %v1695_v41  ;;  %v1712_v56 = vmul.f32 %v3612_v55, %v4941_v39  ;;  %3615 = vrcp.f32 %v4951_v58 }
 0x1c7   : > { %v1682_v15 = vadd.f32 %v1681_v12, %v1680_v8  ;;  %v1740_v31 = vand.u32 2147483648, %v4946_v42  ;;  %v4968_v28 = vperm.slane %v1670_v14, 0  ;;  %v1705_v8 = vor.u32 1.1754944e-38, %v1704_v22 }
 0x1c8   : > { %v1677_v13 = vadd.f32 %v1676_v50, %v1675_v32  ;;  %v1697_v18 = vadd.f32 %v3610_v0, %v1696_v29  ;;  %v1713_v12 = vsub.f32 1.0, %v1712_v56  ;;  %vm1716_vm11 = vweird.f32 %v4941_v39 }
 0x1c9   : > { %v1683_v5 = vrot.slane %v1682_v15, 1  ;;  %v3614_v41 = vpop.eup %3613  ;;  %vm4973_vm12 = vcmp.eq.f32.partialorder %v1720_v37, 8.507059e+37  ;;  %vm1734_vm13 = vweird.f32 %v4946_v42  ;;  %3617 = vrcp.f32 %v4956_v60 }
 0x1ca   : > { %v1701_v16 = vsel %vm1700_vm10, %v3610_v0, %v1697_v18  ;;  %v1714_v2 = vmul.f32 %v3612_v55, %v1713_v12  ;;  %vm1717_vm14 = vweird.f32 %v3612_v55  ;;  %v1730_v22 = vmul.f32 %v3614_v41, %v4946_v42 }
 0x1cb   : > { %v1684_v10 = vadd.f32 %v1683_v5, %v1682_v15  ;;  %v1706_v32 = vsel %vm4958_vm8, %v1705_v8, %v1701_v16  ;;  %v4982_v14 = vperm.slane %v1677_v13, 0  ;;  %v1723_v50 = vor.u32 1.1754944e-38, %v1722_v33  ;;  %vm1718_vm2 = vmor %vm1716_vm11, %vm1717_vm14 }
 0x1cc   : > { %vm4984_vm15 = vcmp.eq.f32.partialorder %v1738_v46, 8.507059e+37  ;;  %v1741_v15 = vor.u32 1.1754944e-38, %v1740_v31  ;;  %v3616_v29 = vpop.eup %3615  ;;  %v1715_v37 = vadd.f32 %v3612_v55, %v1714_v2  ;;  %v1731_v56 = vsub.f32 1.0, %v1730_v22 }
 0x1cd   : > { %vm1752_vm1 = vweird.f32 %v4951_v58  ;;  %v1756_v47 = vand.u32 2147483647, %v4951_v58  ;;  %v1758_v16 = vand.u32 2147483648, %v4951_v58  ;;  %v4991_v5 = vperm.slane %v1684_v10, 0 }
 0x1ce   : > { %v4994_v13 = vmul.f32 %v4786_v49, %v1706_v32  ;;  %vm1735_vm3 = vweird.f32 %v3614_v41  ;;  %v1748_v33 = vmul.f32 %v3616_v29, %v4951_v58  ;;  %v5000_v46 = vmul.f32 %v4788_v3, %v1706_v32 }
 0x1cf   : > { %v5003_v18 = vmul.f32 %v4790_v43, %v1706_v32  ;;  %v1719_v31 = vsel %vm1718_vm2, %v3612_v55, %v1715_v37  ;;  %v1732_v8 = vmul.f32 %v3614_v41, %v1731_v56  ;;  %v5005_v12 = vpop.eup %3617  ;;  %v5008_v10 = vmul.f32 %v4797_v59, %v1706_v32  ;;  %vm1736_vm10 = vmor %vm1734_vm13, %vm1735_vm3 }
 0x1d0   : > { %v1724_v49 = vsel %vm4973_vm12, %v1723_v50, %v1719_v31  ;;  %v1749_v39 = vsub.f32 1.0, %v1748_v33  ;;  %3619 = vrcp.f32 %v4968_v28  ;;  %vm1753_vm7 = vweird.f32 %v3616_v29 }
 0x1d1   : > { %vm5013_vm8 = vcmp.eq.f32.partialorder %v1756_v47, 8.507059e+37  ;;  %v1759_v43 = vor.u32 1.1754944e-38, %v1758_v16  ;;  %v1774_v55 = vand.u32 2147483647, %v4956_v60  ;;  %v1733_v2 = vadd.f32 %v3614_v41, %v1732_v8  ;;  %vm1754_vm12 = vmor %vm1752_vm1, %vm1753_vm7 }
 0x1d2   : > { %v1750_v22 = vmul.f32 %v3616_v29, %v1749_v39  ;;  %v1766_v59 = vmul.f32 %v5005_v12, %v4956_v60  ;;  %vm1770_vm9 = vweird.f32 %v4956_v60  ;;  %v1776_v38 = vand.u32 2147483648, %v4956_v60 }
 0x1d3   : > { %v5023_v32 = vmul.f32 %v4800_v27, %v1724_v49  ;;  %v5026_v50 = vmul.f32 %v4805_v61, %v1724_v49  ;;  %v5029_v37 = vmul.f32 %v4808_v52, %v1724_v49  ;;  %v1794_v56 = vand.u32 2147483648, %v4968_v28 }
 0x1d4   : > { %v1737_v47 = vsel %vm1736_vm10, %v3614_v41, %v1733_v2  ;;  %v1751_v16 = vadd.f32 %v3616_v29, %v1750_v22  ;;  %v1767_v33 = vsub.f32 1.0, %v1766_v59  ;;  %3621 = vrcp.f32 %v4982_v14 }
 0x1d5   : > { %v5037_v27 = vmul.f32 %v4814_v7, %v1724_v49  ;;  %v1742_v61 = vsel %vm4984_vm15, %v1741_v15, %v1737_v47  ;;  %vm1771_vm11 = vweird.f32 %v5005_v12  ;;  %v1792_v52 = vand.u32 2147483647, %v4968_v28 }
 0x1d6   : > { %v3620_v31 = vpop.eup %3619  ;;  %v5044_v42 = vmul.f32 %v4820_v53, %v1742_v61  ;;  %vm5049_vm13 = vcmp.eq.f32.partialorder %v1774_v55, 8.507059e+37  ;;  %v1777_v7 = vor.u32 1.1754944e-38, %v1776_v38  ;;  %v1795_v8 = vor.u32 1.1754944e-38, %v1794_v56  ;;  %vm1772_vm3 = vmor %vm1770_vm9, %vm1771_vm11 }
 0x1d7   : > { %v5054_v0 = vmul.f32 %v4825_v11, %v1742_v61  ;;  %v1755_v15 = vsel %vm1754_vm12, %v3616_v29, %v1751_v16  ;;  %v1768_v49 = vmul.f32 %v5005_v12, %v1767_v33  ;;  %v1784_v39 = vmul.f32 %v3620_v31, %v4968_v28 }
 0x1d8   : > { %vm1788_vm14 = vweird.f32 %v4968_v28  ;;  %v1760_v53 = vsel %vm5013_vm8, %v1759_v43, %v1755_v15  ;;  %v1810_v58 = vand.u32 2147483647, %v4982_v14  ;;  %v1812_v55 = vand.u32 2147483648, %v4982_v14 }
 0x1d9   : > { %3623 = vrcp.f32 %v4991_v5  ;;  %v5065_v2 = vmul.f32 %v4834_v30, %v1742_v61  ;;  %v5068_v11 = vmul.f32 %v4838_v1, %v1742_v61  ;;  %v5071_v29 = vmul.f32 %v4845_v23, %v1760_v53 }
 0x1da   : > { %vm1789_vm15 = vweird.f32 %v3620_v31  ;;  %vm5073_vm1 = vcmp.eq.f32.partialorder %v1792_v52, 8.507059e+37  ;;  %v3622_v3 = vpop.eup %3621  ;;  %v5078_v43 = vmul.f32 %v4850_v6, %v1760_v53  ;;  %v5081_v59 = vmul.f32 %v4856_v51, %v1760_v53 }
 0x1db   : > { %v1769_v30 = vadd.f32 %v5005_v12, %v1768_v49  ;;  %v1785_v38 = vsub.f32 1.0, %v1784_v39  ;;  %vm1806_vm2 = vweird.f32 %v4982_v14  ;;  %v5086_v1 = vmul.f32 %v4860_v63, %v1760_v53  ;;  %vm1790_vm11 = vmor %vm1788_vm14, %vm1789_vm15 }
 0x1dc   : > { %v1802_v23 = vmul.f32 %v3622_v3, %v4982_v14  ;;  %vm1807_vm7 = vweird.f32 %v3622_v3  ;;  %v1813_v6 = vor.u32 1.1754944e-38, %v1812_v55  ;;  %vm5094_vm8 = vcmp.eq.f32.partialorder %v1810_v58, 8.507059e+37 }
 0x1dd   : > { %v1773_v51 = vsel %vm1772_vm3, %v5005_v12, %v1769_v30  ;;  %v1786_v56 = vmul.f32 %v3620_v31, %v1785_v38  ;;  %v1828_v16 = vand.u32 2147483647, %v4991_v5  ;;  %v1830_v63 = vand.u32 2147483648, %v4991_v5 }
 0x1de   : > { %v1778_v33 = vsel %vm5049_vm13, %v1777_v7, %v1773_v51  ;;  %v1803_v60 = vsub.f32 1.0, %v1802_v23  ;;  %v1837_v61 = vperm.slane %v4994_v13, 0  ;;  %v1838_v52 = vperm.slane %v5000_v46, 0  ;;  %vm1808_vm13 = vmor %vm1806_vm2, %vm1807_vm7  ;;  %v7145_v13 = vld [vmem:[#allocation22_spill] sm:$0xff] }
 0x1df   : > { %v3624_v15 = vpop.eup %3623  ;;  %v5105_v12 = vmul.f32 %v4865_v45, %v1778_v33  ;;  %v5108_v49 = vmul.f32 %v4871_v24, %v1778_v33  ;;  %v5111_v39 = vmul.f32 %v4874_v21, %v1778_v33  ;;  %v5114_v53 = vmul.f32 %v4881_v9, %v1778_v33 }
 0x1e0   : > { %v1787_v41 = vadd.f32 %v3620_v31, %v1786_v56  ;;  %v1804_v7 = vmul.f32 %v3622_v3, %v1803_v60  ;;  %v1820_v58 = vmul.f32 %v3624_v15, %v4991_v5  ;;  %vm1824_vm9 = vweird.f32 %v4991_v5 }
 0x1e1   : > { %vm1825_vm10 = vweird.f32 %v3624_v15  ;;  %v1831_v45 = vor.u32 1.1754944e-38, %v1830_v63  ;;  %v1839_v24 = vperm.slane %v5003_v18, 0  ;;  %v1840_v21 = vperm.slane %v5008_v10, 0 }
 0x1e2   : > { %v1841_v55 = vperm.slane %v5023_v32, 0  ;;  %v1791_v9 = vsel %vm1790_vm11, %v3620_v31, %v1787_v41  ;;  %v1805_v30 = vadd.f32 %v3622_v3, %v1804_v7  ;;  %v1821_v38 = vsub.f32 1.0, %v1820_v58  ;;  %vm1826_vm14 = vmor %vm1824_vm9, %vm1825_vm10  ;;  %v7137_v41 = vld [vmem:[#allocation6_spill] sm:$0xff] }
 0x1e3   : > { %vm5124_vm12 = vcmp.eq.f32.partialorder %v1828_v16, 8.507059e+37  ;;  %v1842_v51 = vperm.slane %v5026_v50, 0  ;;  %v1796_v28 = vsel %vm5073_vm1, %v1795_v8, %v1791_v9  ;;  %v1843_v56 = vperm.slane %v5029_v37, 0  ;;  %v7139_v58 = vld [vmem:[#allocation10_spill] sm:$0xff] }
 0x1e4   : > { %v1844_v18 = vperm.slane %v5037_v27, 0  ;;  %v1845_v10 = vperm.slane %v5044_v42, 0  ;;  %v5135_v32 = vmul.f32 %v4885_v19, %v1796_v28  ;;  %v5138_v31 = vmul.f32 %v4892_v57, %v1796_v28 }
 0x1e5   : > { %v5141_v16 = vmul.f32 %v4895_v26, %v1796_v28  ;;  %v5144_v50 = vmul.f32 %v4899_v40, %v1796_v28  ;;  %v1809_v37 = vsel %vm1808_vm13, %v3622_v3, %v1805_v30  ;;  %v1822_v27 = vmul.f32 %v3624_v15, %v1821_v38  ;;  %v7143_v38 = vld [vmem:[#allocation18_spill] sm:$0xff] }
 0x1e6   : > { %v1846_v42 = vperm.slane %v5054_v0, 0  ;;  %v1847_v19 = vperm.slane %v5065_v2, 0  ;;  %v1814_v57 = vsel %vm5094_vm8, %v1813_v6, %v1809_v37  ;;  %v1848_v8 = vperm.slane %v5068_v11, 0  ;;  %v7147_v28 = vld [vmem:[#allocation26_spill] sm:$0xff] }
 0x1e7   : > { %v1849_v26 = vperm.slane %v5071_v29, 0  ;;  %v1850_v40 = vperm.slane %v5078_v43, 0  ;;  %v5157_v22 = vmul.f32 %v4902_v17, %v1814_v57  ;;  %v5160_v14 = vmul.f32 %v4907_v54, %v1814_v57 }
 0x1e8   : > { %v5163_v3 = vmul.f32 %v4911_v62, %v1814_v57  ;;  %v5166_v0 = vmul.f32 %v4915_v36, %v1814_v57  ;;  %v1823_v2 = vadd.f32 %v3624_v15, %v1822_v27  ;;  %v1851_v6 = vperm.slane %v5081_v59, 0  ;;  %v7152_v27 = vld [vmem:[#allocation11_spill] sm:$0xff] }
 0x1e9   : > { %v1852_v11 = vperm.slane %v5086_v1, 0  ;;  %v1853_v29 = vperm.slane %v5105_v12, 0  ;;  %v1854_v17 = vperm.slane %v5108_v49, 0  ;;  %v1855_v54 = vperm.slane %v5111_v39, 0 }
 0x1ea   : > { %7136 = vst [vmem:[#allocation102_spill] sm:$0xff] %v5163_v3  ;;  %v1856_v62 = vperm.slane %v5114_v53, 0  ;;  %v1857_v36 = vperm.slane %v5135_v32, 0  ;;  %v1827_v43 = vsel %vm1826_vm14, %v3624_v15, %v1823_v2  ;;  %v1858_v47 = vperm.slane %v5138_v31, 0  ;;  %v7191_v3 = vld [vmem:[#allocation44_spill] sm:$0xff] }
 0x1eb   : > { %v1859_v59 = vperm.slane %v5141_v16, 0  ;;  %v1860_v1 = vperm.slane %v5144_v50, 0  ;;  %v1832_v63 = vsel %vm5124_vm12, %v1831_v45, %v1827_v43  ;;  %v1861_v5 = vperm.slane %v5157_v22, 0  ;;  %v7151_v50 = vld [vmem:[#allocation7_spill] sm:$0xff] }
 0x1ec   : > { %v1862_v33 = vperm.slane %v5160_v14, 0  ;;  %v5187_v12 = vmul.f32 %v4921_v44, %v1832_v63  ;;  %v5190_v15 = vmul.f32 %v4926_v34, %v1832_v63  ;;  %v5193_v49 = vmul.f32 %v4929_v35, %v1832_v63  ;;  %v7141_v34 = vld [vmem:[#allocation14_spill] sm:$0xff]  ;;  %v7153_v22 = vld [vmem:[#allocation15_spill] sm:$0xff] }
 0x1ed   : > { %v5196_v39 = vmul.f32 %v4933_v25, %v1832_v63  ;;  %v1864_v53 = vperm.slane %v5166_v0, 0  ;;  %v5202_v7 = vmul.f32 %v1837_v61, %v7137_v41  ;;  %v5207_v44 = vmul.f32 %v1837_v61, %v7139_v58  ;;  %v7155_v0 = vld [vmem:[#allocation23_spill] sm:$0xff]  ;;  %v7171_v58 = vld [vmem:[#allocation29_spill] sm:$0xff] }
 0x1ee   : > { %v5212_v35 = vmul.f32 %v1838_v52, %v7141_v34  ;;  %v1865_v25 = vperm.slane %v5187_v12, 0  ;;  %v1866_v45 = vperm.slane %v5190_v15, 0  ;;  %v1867_v9 = vperm.slane %v5193_v49, 0  ;;  %v7156_v43 = vld [vmem:[#allocation27_spill] sm:$0xff]  ;;  %v7158_v49 = vld [vmem:[#allocation8_spill] sm:$0xff]  ;;  %v7169_v34 = vld [vmem:[#allocation21_spill] sm:$0xff] }
 0x1ef   : > { %7138 = vst [vmem:[#allocation103_spill] sm:$0xff] %v5202_v7  ;;  %v1868_v30 = vperm.slane %v5196_v39, 0  ;;  %v5221_v23 = vmul.f32 %v1838_v52, %v7143_v38  ;;  %v5224_v61 = vmul.f32 %v1839_v24, %v7145_v13  ;;  %v5227_v32 = vmul.f32 %v1839_v24, %v7147_v28  ;;  %v7154_v52 = vld [vmem:[#allocation19_spill] sm:$0xff]  ;;  %v7161_v28 = vld [vmem:[#allocation20_spill] sm:$0xff]  ;;  %v7173_v41 = vld [vmem:[#allocation37_spill] sm:$0xff] }
 0x1f0   : > { %7140 = vst [vmem:[#allocation104_spill] sm:$0xff] %v5207_v44  ;;  %v5230_v31 = vmul.f32 %v1840_v21, %v7078_v48  ;;  %v5233_v16 = vmul.f32 %v1840_v21, %v7079_v4  ;;  %v1877_v37 = vmul.f32 %v1841_v55, %v7151_v50  ;;  %v1878_v57 = vmul.f32 %v1841_v55, %v7152_v27  ;;  %v7157_v12 = vld [vmem:[#allocation35_spill] sm:$0xff]  ;;  %v7159_v21 = vld [vmem:[#allocation12_spill] sm:$0xff]  ;;  %v7167_v50 = vld [vmem:[#allocation13_spill] sm:$0xff] }
 0x1f1   : > { %7142 = vst [vmem:[#allocation105_spill] sm:$0xff] %v5212_v35  ;;  %v1879_v46 = vmul.f32 %v1842_v51, %v7153_v22  ;;  %v1880_v14 = vmul.f32 %v1842_v51, %v7154_v52  ;;  %v1881_v2 = vmul.f32 %v1843_v56, %v7155_v0  ;;  %v1882_v63 = vmul.f32 %v1843_v56, %v7156_v43  ;;  %v7160_v4 = vld [vmem:[#allocation16_spill] sm:$0xff]  ;;  %v7166_v43 = vld [vmem:[#allocation9_spill] sm:$0xff]  ;;  %v7185_v35 = vld [vmem:[#allocation51_spill] sm:$0xff] }
 0x1f2   : > { %7144 = vst [vmem:[#allocation106_spill] sm:$0xff] %v5221_v23  ;;  %v1883_v24 = vmul.f32 %v1844_v18, %v7080_v20  ;;  %v1884_v15 = vmul.f32 %v1844_v18, %v7157_v12  ;;  %v1885_v39 = vmul.f32 %v1845_v10, %v7158_v49  ;;  %v1886_v60 = vmul.f32 %v1845_v10, %v7159_v21  ;;  %v7162_v13 = vld [vmem:[#allocation24_spill] sm:$0xff]  ;;  %v7168_v12 = vld [vmem:[#allocation17_spill] sm:$0xff]  ;;  %v7183_v23 = vld [vmem:[#allocation43_spill] sm:$0xff] }
 0x1f3   : > { %7146 = vst [vmem:[#allocation107_spill] sm:$0xff] %v5224_v61  ;;  %v1887_v48 = vmul.f32 %v1846_v42, %v7160_v4  ;;  %v1888_v55 = vmul.f32 %v1846_v42, %v7161_v28  ;;  %v1889_v22 = vmul.f32 %v1847_v19, %v7162_v13  ;;  %v7163_v27 = vld [vmem:[#allocation28_spill] sm:$0xff]  ;;  %v1893_v20 = vmul.f32 %v1849_v26, %v7166_v43  ;;  %v7170_v21 = vld [vmem:[#allocation25_spill] sm:$0xff]  ;;  %v7187_v44 = vld [vmem:[#allocation59_spill] sm:$0xff] }
 0x1f4   : > { %7148 = vst [vmem:[#allocation108_spill] sm:$0xff] %v5227_v32  ;;  %v1890_v51 = vmul.f32 %v1847_v19, %v7163_v27  ;;  %v7164_v52 = vld [vmem:[#allocation32_spill] sm:$0xff]  ;;  %v1894_v18 = vmul.f32 %v1849_v26, %v7167_v50  ;;  %v1895_v49 = vmul.f32 %v1850_v40, %v7168_v12  ;;  %v1896_v10 = vmul.f32 %v1850_v40, %v7169_v34  ;;  %v7172_v28 = vld [vmem:[#allocation33_spill] sm:$0xff]  ;;  %v7174_v27 = vld [vmem:[#allocation38_spill] sm:$0xff] }
 0x1f5   : > { %7149 = vst [vmem:[#allocation109_spill] sm:$0xff] %v5230_v31  ;;  %v1891_v0 = vmul.f32 %v1848_v8, %v7164_v52  ;;  %v7165_v38 = vld [vmem:[#allocation36_spill] sm:$0xff]  ;;  %v1897_v4 = vmul.f32 %v1851_v6, %v7170_v21  ;;  %v1898_v42 = vmul.f32 %v1851_v6, %v7171_v58  ;;  %v1899_v13 = vmul.f32 %v1852_v11, %v7172_v28  ;;  %v7177_v31 = vld [vmem:[#allocation50_spill] sm:$0xff]  ;;  %v7181_v61 = vld [vmem:[#allocation65_spill] sm:$0xff] }
 0x1f6   : > { %7150 = vst [vmem:[#allocation110_spill] sm:$0xff] %v5233_v16  ;;  %v1892_v56 = vmul.f32 %v1848_v8, %v7165_v38  ;;  %v1900_v19 = vmul.f32 %v1852_v11, %v7173_v41  ;;  %v1901_v52 = vmul.f32 %v1853_v29, %v7174_v27  ;;  %v7175_v16 = vld [vmem:[#allocation42_spill] sm:$0xff]  ;;  %v1904_v26 = vmul.f32 %v1854_v17, %v7177_v31  ;;  %v7182_v58 = vld [vmem:[#allocation39_spill] sm:$0xff] }
 0x1f7   : > { %v1902_v8 = vmul.f32 %v1853_v29, %v7175_v16  ;;  %v7176_v38 = vld [vmem:[#allocation46_spill] sm:$0xff]  ;;  %v1908_v6 = vmul.f32 %v1856_v62, %v7181_v61  ;;  %v1909_v28 = vmul.f32 %v1857_v36, %v7182_v58  ;;  %v1910_v11 = vmul.f32 %v1857_v36, %v7183_v23  ;;  %v7184_v41 = vld [vmem:[#allocation47_spill] sm:$0xff]  ;;  %v7192_v61 = vld [vmem:[#allocation48_spill] sm:$0xff] }
 0x1f8   : > { %v1903_v43 = vmul.f32 %v1854_v17, %v7176_v38  ;;  %v7178_v50 = vld [vmem:[#allocation54_spill] sm:$0xff]  ;;  %v1911_v27 = vmul.f32 %v1858_v47, %v7184_v41  ;;  %v1912_v29 = vmul.f32 %v1858_v47, %v7185_v35  ;;  %v7186_v16 = vld [vmem:[#allocation55_spill] sm:$0xff]  ;;  %v1914_v17 = vmul.f32 %v1859_v59, %v7187_v44  ;;  %v7193_v23 = vld [vmem:[#allocation52_spill] sm:$0xff] }
 0x1f9   : > { %v1905_v12 = vmul.f32 %v1855_v54, %v7178_v50  ;;  %v7179_v32 = vld [vmem:[#allocation58_spill] sm:$0xff]  ;;  %v1913_v38 = vmul.f32 %v1859_v59, %v7186_v16  ;;  %v7188_v31 = vld [vmem:[#allocation63_spill] sm:$0xff]  ;;  %v1919_v58 = vmul.f32 %v1862_v33, %v7192_v61  ;;  %v1920_v36 = vmul.f32 %v1862_v33, %v7193_v23  ;;  %v7194_v41 = vld [vmem:[#allocation56_spill] sm:$0xff] }
 0x1fa   : > { %v1906_v40 = vmul.f32 %v1855_v54, %v7179_v32  ;;  %v7180_v34 = vld [vmem:[#allocation62_spill] sm:$0xff]  ;;  %v1915_v50 = vmul.f32 %v1860_v1, %v7188_v31  ;;  %v7189_v7 = vld [vmem:[#allocation67_spill] sm:$0xff]  ;;  %v7190_v32 = vld [vmem:[#allocation40_spill] sm:$0xff] }
 0x1fb   : > { %v1907_v21 = vmul.f32 %v1856_v62, %v7180_v34  ;;  %v1916_v54 = vmul.f32 %v1860_v1, %v7189_v7  ;;  %v1917_v34 = vmul.f32 %v1861_v5, %v7190_v32  ;;  %v1918_v62 = vmul.f32 %v1861_v5, %v7191_v3  ;;  %v7195_v35 = vld [vmem:[#allocation102_spill] sm:$0xff]  ;;  %v7197_v44 = vld [vmem:[#allocation60_spill] sm:$0xff]  ;;  %v7201_v5 = vld [vmem:[#allocation41_spill] sm:$0xff] }
 0x1fc   : > { %v7196_v47 = vperm.slane %v7195_v35, 0  ;;  %v7199_v1 = vld [vmem:[#allocation64_spill] sm:$0xff]  ;;  %v1925_v61 = vmul.f32 %v1865_v25, %v7201_v5  ;;  %v7202_v23 = vld [vmem:[#allocation45_spill] sm:$0xff]  ;;  %v7207_v5 = vld [vmem:[#allocation66_spill] sm:$0xff] }
 0x1fd   : > { %v1923_v7 = vmul.f32 %v1864_v53, %v7199_v1  ;;  %v7200_v32 = vld [vmem:[#allocation68_spill] sm:$0xff]  ;;  %v1926_v33 = vmul.f32 %v1865_v25, %v7202_v23  ;;  %v7204_v35 = vld [vmem:[#allocation53_spill] sm:$0xff]  ;;  %v1931_v23 = vmul.f32 %v1868_v30, %v7207_v5 }
 0x1fe   : > { %v1921_v16 = vmul.f32 %v7196_v47, %v7194_v41  ;;  %v7198_v59 = vmov %v7196_v47  ;;  %v1924_v3 = vmul.f32 %v1864_v53, %v7200_v32  ;;  %v7203_v41 = vld [vmem:[#allocation49_spill] sm:$0xff] }
 0x1ff   : > { %v1922_v31 = vmul.f32 %v7198_v59, %v7197_v44  ;;  %v1927_v47 = vmul.f32 %v1866_v45, %v7203_v41  ;;  %v1928_v44 = vmul.f32 %v1866_v45, %v7204_v35  ;;  %v7205_v59 = vld [vmem:[#allocation57_spill] sm:$0xff]  ;;  %v7209_v35 = vld [vmem:[#allocation103_spill] sm:$0xff] }
 0x200   : > { %v1929_v1 = vmul.f32 %v1867_v9, %v7205_v59  ;;  %v7206_v32 = vld [vmem:[#allocation61_spill] sm:$0xff]  ;;  %v1933_v45 = vadd.f32 %v1877_v37, %v7209_v35  ;;  %v7210_v59 = vld [vmem:[#allocation104_spill] sm:$0xff]  ;;  %v7213_v35 = vld [vmem:[#allocation107_spill] sm:$0xff] }
 0x201   : > { %v1930_v53 = vmul.f32 %v1867_v9, %v7206_v32  ;;  %v7208_v25 = vld [vmem:[#allocation69_spill] sm:$0xff]  ;;  %v1940_v9 = vadd.f32 %v1878_v57, %v7210_v59  ;;  %v1961_v37 = vadd.f32 %v1881_v2, %v7213_v35  ;;  %v7214_v57 = vld [vmem:[#allocation108_spill] sm:$0xff]  ;;  %v7216_v35 = vld [vmem:[#allocation110_spill] sm:$0xff] }
 0x202   : > { %v1932_v41 = vmul.f32 %v1868_v30, %v7208_v25  ;;  %v7211_v32 = vld [vmem:[#allocation105_spill] sm:$0xff]  ;;  %v7212_v25 = vld [vmem:[#allocation106_spill] sm:$0xff]  ;;  %v1968_v59 = vadd.f32 %v1882_v63, %v7214_v57  ;;  %v1982_v57 = vadd.f32 %v1884_v15, %v7216_v35 }
 0x203   : > { %v1947_v5 = vadd.f32 %v1879_v46, %v7211_v32  ;;  %v1954_v30 = vadd.f32 %v1880_v14, %v7212_v25  ;;  %v7215_v32 = vld [vmem:[#allocation109_spill] sm:$0xff]  ;;  %v1934_v14 = vadd.f32 %v1933_v45, %v1885_v39  ;;  %v1941_v25 = vadd.f32 %v1940_v9, %v1886_v60 }
 0x204   : > { %v1975_v46 = vadd.f32 %v1883_v24, %v7215_v32  ;;  %v1962_v24 = vadd.f32 %v1961_v37, %v1889_v22  ;;  %v1969_v32 = vadd.f32 %v1968_v59, %v1890_v51 }
 0x205   : > { %v1948_v2 = vadd.f32 %v1947_v5, %v1887_v48  ;;  %v1955_v63 = vadd.f32 %v1954_v30, %v1888_v55  ;;  %v1935_v45 = vadd.f32 %v1934_v14, %v1893_v20  ;;  %v1942_v9 = vadd.f32 %v1941_v25, %v1894_v18 }
 0x206   : > { %v1976_v39 = vadd.f32 %v1975_v46, %v1891_v0  ;;  %v1983_v5 = vadd.f32 %v1982_v57, %v1892_v56  ;;  %v1963_v15 = vadd.f32 %v1962_v24, %v1897_v4  ;;  %v1970_v35 = vadd.f32 %v1969_v32, %v1898_v42 }
 0x207   : > { %v1949_v60 = vadd.f32 %v1948_v2, %v1895_v49  ;;  %v1956_v48 = vadd.f32 %v1955_v63, %v1896_v10  ;;  %v1936_v55 = vadd.f32 %v1935_v45, %v1901_v52  ;;  %v1943_v22 = vadd.f32 %v1942_v9, %v1902_v8 }
 0x208   : > { %v1977_v30 = vadd.f32 %v1976_v39, %v1899_v13  ;;  %v1984_v51 = vadd.f32 %v1983_v5, %v1900_v19  ;;  %v1964_v0 = vadd.f32 %v1963_v15, %v1905_v12  ;;  %v1971_v46 = vadd.f32 %v1970_v35, %v1906_v40 }
 0x209   : > { %v1950_v37 = vadd.f32 %v1949_v60, %v1903_v43  ;;  %v1957_v59 = vadd.f32 %v1956_v48, %v1904_v26  ;;  %v1937_v20 = vadd.f32 %v1936_v55, %v1909_v28  ;;  %v1944_v18 = vadd.f32 %v1943_v22, %v1910_v11 }
 0x20a   : > { %v1978_v14 = vadd.f32 %v1977_v30, %v1907_v21  ;;  %v1985_v2 = vadd.f32 %v1984_v51, %v1908_v6  ;;  %v1965_v56 = vadd.f32 %v1964_v0, %v1913_v38  ;;  %v1972_v57 = vadd.f32 %v1971_v46, %v1914_v17 }
 0x20b   : > { %v1951_v25 = vadd.f32 %v1950_v37, %v1911_v27  ;;  %v1958_v49 = vadd.f32 %v1957_v59, %v1912_v29  ;;  %v1938_v63 = vadd.f32 %v1937_v20, %v1917_v34  ;;  %v1945_v4 = vadd.f32 %v1944_v18, %v1918_v62 }
 0x20c   : > { %v1979_v10 = vadd.f32 %v1978_v14, %v1915_v50  ;;  %v1986_v13 = vadd.f32 %v1985_v2, %v1916_v54  ;;  %v1966_v8 = vadd.f32 %v1965_v56, %v1921_v16  ;;  %v1973_v43 = vadd.f32 %v1972_v57, %v1922_v31 }
 0x20d   : > { %v1952_v42 = vadd.f32 %v1951_v25, %v1919_v58  ;;  %v1959_v52 = vadd.f32 %v1958_v49, %v1920_v36  ;;  %v5303_v26 = vadd.f32 %v1938_v63, %v1925_v61  ;;  %v5305_v12 = vadd.f32 %v1945_v4, %v1926_v33 }
 0x20e   : > { %v1980_v19 = vadd.f32 %v1979_v10, %v1923_v7  ;;  %v1987_v27 = vadd.f32 %v1986_v13, %v1924_v3  ;;  %v5311_v38 = vadd.f32 %v1966_v8, %v1929_v1  ;;  %v5313_v50 = vadd.f32 %v1973_v43, %v1930_v53 }
 0x20f   : > { %v5307_v28 = vadd.f32 %v1952_v42, %v1927_v47  ;;  %v5309_v21 = vadd.f32 %v1959_v52, %v1928_v44  ;;  %v1989_v7 = vmul.f32 %v5303_v26, %v5303_v26  ;;  %v1990_v61 = vmul.f32 %v5305_v12, %v5305_v12 }
 0x210   : > { %v5315_v34 = vadd.f32 %v1980_v19, %v1931_v23  ;;  %v5317_v58 = vadd.f32 %v1987_v27, %v1932_v41  ;;  %v1993_v44 = vmul.f32 %v5311_v38, %v5311_v38  ;;  %v1994_v23 = vmul.f32 %v5313_v50, %v5313_v50 }
 0x211   : > { %v1991_v31 = vmul.f32 %v5307_v28, %v5307_v28  ;;  %v1992_v3 = vmul.f32 %v5309_v21, %v5309_v21  ;;  %v1997_v40 = vadd.f32 %v1990_v61, %v1989_v7 }
 0x212   : > { %v1995_v41 = vmul.f32 %v5315_v34, %v5315_v34  ;;  %v1996_v16 = vmul.f32 %v5317_v58, %v5317_v58  ;;  %v2011_v11 = vadd.f32 %v1994_v23, %v1993_v44 }
 0x213   : > { %v2004_v6 = vadd.f32 %v1992_v3, %v1991_v31  ;;  %v1998_v29 = vrot.slane %v1997_v40, 4 }
 0x214   : > { %v2018_v17 = vadd.f32 %v1996_v16, %v1995_v41  ;;  %v2012_v62 = vrot.slane %v2011_v11, 4 }
 0x215   : > { %v2005_v54 = vrot.slane %v2004_v6, 4  ;;  %v1999_v36 = vadd.f32 %v1998_v29, %v1997_v40 }
 0x216   : > { %v2019_v1 = vrot.slane %v2018_v17, 4  ;;  %v2013_v47 = vadd.f32 %v2012_v62, %v2011_v11 }
 0x217   : > { %v2006_v33 = vadd.f32 %v2005_v54, %v2004_v6  ;;  %v2000_v53 = vrot.slane %v1999_v36, 2 }
 0x218   : > { %v2020_v24 = vadd.f32 %v2019_v1, %v2018_v17  ;;  %v2014_v39 = vrot.slane %v2013_v47, 2 }
 0x219   : > { %v2007_v32 = vrot.slane %v2006_v33, 2  ;;  %v2001_v45 = vadd.f32 %v2000_v53, %v1999_v36 }
 0x21a   : > { %v2021_v9 = vrot.slane %v2020_v24, 2  ;;  %v2015_v5 = vadd.f32 %v2014_v39, %v2013_v47 }
 0x21b   : > { %v2008_v60 = vadd.f32 %v2007_v32, %v2006_v33  ;;  %v2002_v48 = vrot.slane %v2001_v45, 1 }
 0x21c   : > { %v2022_v15 = vadd.f32 %v2021_v9, %v2020_v24  ;;  %v2016_v30 = vrot.slane %v2015_v5, 1 }
 0x21d   : > { %v2009_v35 = vrot.slane %v2008_v60, 1  ;;  %v5335_v55 = vadd.f32 %v2002_v48, %v2001_v45 }
 0x21e   : > { %v2023_v22 = vrot.slane %v2022_v15, 1  ;;  %v5339_v51 = vadd.f32 %v2016_v30, %v2015_v5 }
 0x21f   : > { %v5337_v37 = vadd.f32 %v2009_v35, %v2008_v60  ;;  %v2025_v0 = vadd.f32 1.0, %v5335_v55  ;;  %v5353_v18 = vadd.f32 1e-08, %v5335_v55 }
 0x220   : > { %v5341_v59 = vadd.f32 %v2023_v22, %v2022_v15  ;;  %v5346_v14 = vadd.f32 1.0, %v5339_v51  ;;  %v5360_v49 = vadd.f32 1e-08, %v5339_v51 }
 0x221   : > { %v2026_v46 = vadd.f32 1.0, %v5337_v37  ;;  %3625 = vrcp.f32 %v2025_v0  ;;  %v5356_v25 = vadd.f32 1e-08, %v5337_v37  ;;  %v2040_v2 = vand.u32 2147483648, %v2025_v0 }
 0x222   : > { %v5349_v20 = vadd.f32 1.0, %v5341_v59  ;;  %v2038_v56 = vand.u32 2147483647, %v2025_v0  ;;  %vm2034_vm15 = vweird.f32 %v2025_v0  ;;  %v5364_v13 = vadd.f32 1e-08, %v5341_v59 }
 0x223   : > { %3627 = vrcp.f32 %v2026_v46  ;;  %v2053_v57 = vand.u32 2147483647, %v2026_v46  ;;  %v2055_v63 = vand.u32 2147483648, %v2026_v46  ;;  %vm2049_vm1 = vweird.f32 %v2026_v46 }
 0x224   : > { %3629 = vrcp.f32 %v5346_v14  ;;  %v2041_v8 = vor.u32 1.1754944e-38, %v2040_v2  ;;  %vm2064_vm2 = vweird.f32 %v5346_v14  ;;  %vm5369_vm3 = vcmp.eq.f32.partialorder %v2038_v56, 8.507059e+37 }
 0x225   : > { %3631 = vrcp.f32 %v5349_v20  ;;  %vm5373_vm7 = vcmp.eq.f32.partialorder %v2053_v57, 8.507059e+37  ;;  %v2068_v31 = vand.u32 2147483647, %v5346_v14  ;;  %v2056_v23 = vor.u32 1.1754944e-38, %v2055_v63 }
 0x226   : > { %3633 = vrsqrt.f32 %v5353_v18  ;;  %v2070_v41 = vand.u32 2147483648, %v5346_v14  ;;  %vm2079_vm9 = vweird.f32 %v5349_v20  ;;  %v2083_v17 = vand.u32 2147483647, %v5349_v20 }
 0x227   : > { %v3626_v10 = vpop.eup %3625  ;;  %3635 = vrsqrt.f32 %v5356_v25  ;;  %vm5399_vm13 = vcmp.eq.f32.partialorder %v2068_v31, 8.507059e+37  ;;  %v2085_v22 = vand.u32 2147483648, %v5349_v20 }
 0x228   : > { %v2030_v42 = vmul.f32 %v3626_v10, %v2025_v0  ;;  %3637 = vrsqrt.f32 %v5360_v49  ;;  %vm2035_vm8 = vweird.f32 %v3626_v10  ;;  %v2071_v39 = vor.u32 1.1754944e-38, %v2070_v41 }
 0x229   : > { %v3628_v4 = vpop.eup %3627  ;;  %3639 = vrsqrt.f32 %v5364_v13  ;;  %vm5395_vm12 = vmor %vm2034_vm15, %vm2035_vm8  ;;  %vm2099_vm8 = vweird.f32 %v5353_v18 }
 0x22a   : > { %v3630_v52 = vpop.eup %3629  ;;  %v2045_v43 = vmul.f32 %v3628_v4, %v2026_v46  ;;  %v2031_v19 = vsub.f32 1.0, %v2030_v42  ;;  %vm2050_vm10 = vweird.f32 %v3628_v4 }
 0x22b   : > { %v2060_v61 = vmul.f32 %v3630_v52, %v5346_v14  ;;  %v5379_v3 = vpop.eup %3631  ;;  %vm2065_vm11 = vweird.f32 %v3630_v52  ;;  %vm5408_vm14 = vmor %vm2049_vm1, %vm2050_vm10  ;;  %vm2109_vm10 = vweird.f32 %v5356_v25 }
 0x22c   : > { %v2046_v44 = vsub.f32 1.0, %v2045_v43  ;;  %v2032_v16 = vmul.f32 %v3626_v10, %v2031_v19  ;;  %v2075_v6 = vmul.f32 %v5379_v3, %v5349_v20  ;;  %v5386_v11 = vpop.eup %3633  ;;  %vm5419_vm15 = vmor %vm2064_vm2, %vm2065_vm11  ;;  %vm2080_vm1 = vweird.f32 %v5379_v3  ;;  %v7245_v43 = vld [vmem:[#allocation16_spill] sm:$0xff] }
 0x22d   : > { %v2061_v40 = vsub.f32 1.0, %v2060_v61  ;;  %v3636_v54 = vpop.eup %3635  ;;  %v2094_v33 = vmul.f32 %v5386_v11, %v5353_v18  ;;  %vm2100_vm2 = vweird.f32 %v5386_v11 }
 0x22e   : > { %v2047_v29 = vmul.f32 %v3628_v4, %v2046_v44  ;;  %v2033_v62 = vadd.f32 %v3626_v10, %v2032_v16  ;;  %v2076_v1 = vsub.f32 1.0, %v2075_v6  ;;  %v5391_v47 = vpop.eup %3637  ;;  %v2104_v45 = vmul.f32 %v3636_v54, %v5356_v25 }
 0x22f   : > { %v2062_v36 = vmul.f32 %v3630_v52, %v2061_v40  ;;  %v2095_v15 = vmul.f32 %v5386_v11, %v2094_v33  ;;  %v2114_v46 = vmul.f32 %v5391_v47, %v5360_v49  ;;  %v3640_v2 = vpop.eup %3639  ;;  %vm2110_vm11 = vweird.f32 %v3636_v54 }
 0x230   : > { %v2048_v24 = vadd.f32 %v3628_v4, %v2047_v29  ;;  %v2037_v9 = vsel %vm5395_vm12, %v3626_v10, %v2033_v62  ;;  %v2077_v48 = vmul.f32 %v5379_v3, %v2076_v1  ;;  %v2105_v0 = vmul.f32 %v3636_v54, %v2104_v45  ;;  %vm5442_vm12 = vmor %vm2079_vm9, %vm2080_vm1 }
 0x231   : > { %v2063_v5 = vadd.f32 %v3630_v52, %v2062_v36  ;;  %v2042_v14 = vsel %vm5369_vm3, %v2041_v8, %v2037_v9  ;;  %v2096_v63 = vmul.f32 0.5, %v2095_v15  ;;  %v2115_v42 = vmul.f32 %v5391_v47, %v2114_v46  ;;  %vm2101_vm3 = vmor %vm2099_vm8, %vm2100_vm2  ;;  %v7240_v46 = vld [vmem:[#allocation26_spill] sm:$0xff] }
 0x232   : > { %v2052_v35 = vsel %vm5408_vm14, %v3628_v4, %v2048_v24  ;;  %v2078_v57 = vadd.f32 %v5379_v3, %v2077_v48  ;;  %v2106_v4 = vmul.f32 0.5, %v2105_v0  ;;  %v2124_v27 = vmul.f32 %v3640_v2, %v5364_v13  ;;  %vm2111_vm9 = vmor %vm2109_vm10, %vm2110_vm11  ;;  %v7236_v48 = vld [vmem:[#allocation11_spill] sm:$0xff] }
 0x233   : > { %v2067_v56 = vsel %vm5419_vm15, %v3630_v52, %v2063_v5  ;;  %v2057_v10 = vsel %vm5373_vm7, %v2056_v23, %v2052_v35  ;;  %v2097_v8 = vsub.f32 1.5, %v2096_v63  ;;  %v2043_v7 = vmul.f32 %v2042_v14, %v5335_v55  ;;  %v7237_v35 = vld [vmem:[#allocation15_spill] sm:$0xff]  ;;  %v7243_v63 = vld [vmem:[#allocation8_spill] sm:$0xff] }
 0x234   : > { %v2072_v52 = vsel %vm5399_vm13, %v2071_v39, %v2067_v56  ;;  %v2107_v19 = vsub.f32 1.5, %v2106_v4  ;;  %v2058_v61 = vmul.f32 %v2057_v10, %v5337_v37  ;;  %v2082_v31 = vsel %vm5442_vm12, %v5379_v3, %v2078_v57  ;;  %v7241_v56 = vld [vmem:[#allocation23_spill] sm:$0xff] }
 0x235   : > { %v2116_v44 = vmul.f32 0.5, %v2115_v42  ;;  %v2086_v23 = vor.u32 1.1754944e-38, %v2085_v22  ;;  %v2098_v20 = vmul.f32 %v5386_v11, %v2097_v8  ;;  %v2125_v16 = vmul.f32 %v3640_v2, %v2124_v27  ;;  %v7242_v14 = vld [vmem:[#allocation27_spill] sm:$0xff]  ;;  %v7244_v42 = vld [vmem:[#allocation12_spill] sm:$0xff] }
 0x236   : > { %v2108_v41 = vmul.f32 %v3636_v54, %v2107_v19  ;;  %v2073_v40 = vmul.f32 %v2072_v52, %v5339_v51  ;;  %vm2084_vm7 = vcmp.eq.f32.partialorder %v2083_v17, 8.507059e+37  ;;  %vm2120_vm13 = vweird.f32 %v5391_v47  ;;  %v7246_v19 = vld [vmem:[#allocation20_spill] sm:$0xff] }
 0x237   : > { %v2117_v55 = vsub.f32 1.5, %v2116_v44  ;;  %v2087_v37 = vsel %vm2084_vm7, %v2086_v23, %v2082_v31  ;;  %v2102_v3 = vsel %vm2101_vm3, %v5386_v11, %v2098_v20  ;;  %v2126_v29 = vmul.f32 0.5, %v2125_v16  ;;  %v7248_v31 = vld [vmem:[#allocation34_spill] sm:$0xff]  ;;  %v7249_v23 = vld [vmem:[#allocation24_spill] sm:$0xff] }
 0x238   : > { %v2112_v6 = vsel %vm2111_vm9, %v3636_v54, %v2108_v41  ;;  %vm2119_vm14 = vweird.f32 %v5360_v49  ;;  %v2133_v62 = vmul.f32 %v2102_v3, %v2043_v7  ;;  %vm2130_vm1 = vweird.f32 %v3640_v2  ;;  %v7247_v7 = vld [vmem:[#allocation30_spill] sm:$0xff]  ;;  %v7250_v41 = vld [vmem:[#allocation28_spill] sm:$0xff] }
 0x239   : > { %v2118_v18 = vmul.f32 %v5391_v47, %v2117_v55  ;;  %v2134_v36 = vmul.f32 %v2112_v6, %v2058_v61  ;;  %vm2121_vm15 = vmor %vm2119_vm14, %vm2120_vm13  ;;  %v2127_v51 = vsub.f32 1.5, %v2126_v29  ;;  %v2088_v25 = vmul.f32 %v2087_v37, %v5341_v59  ;;  %v7252_v37 = vld [vmem:[#allocation35_spill] sm:$0xff]  ;;  %v7253_v6 = vld [vmem:[#allocation32_spill] sm:$0xff] }
 0x23a   : > { %vm2129_vm8 = vweird.f32 %v5364_v13  ;;  %v5469_v11 = vmul.f32 %v2133_v62, %v5303_v26  ;;  %v5472_v54 = vmul.f32 %v2133_v62, %v5305_v12  ;;  %v7231_v26 = vld [vmem:[#allocation6_spill] sm:$0xff] }
 0x23b   : > { %v2122_v17 = vsel %vm2121_vm15, %v5391_v47, %v2118_v18  ;;  %v2128_v1 = vmul.f32 %v3640_v2, %v2127_v51  ;;  %vm2131_vm2 = vmor %vm2129_vm8, %vm2130_vm1  ;;  %v5475_v49 = vmul.f32 %v2134_v36, %v5307_v28  ;;  %v5478_v24 = vmul.f32 %v2134_v36, %v5309_v21  ;;  %v7232_v12 = vld [vmem:[#allocation10_spill] sm:$0xff]  ;;  %v7254_v18 = vld [vmem:[#allocation36_spill] sm:$0xff] }
 0x23c   : > { %v2135_v33 = vmul.f32 %v2122_v17, %v2073_v40  ;;  %v2145_v32 = vmul.f32 %v5469_v11, %v7231_v26  ;;  %v2146_v39 = vmul.f32 %v5472_v54, %v7232_v12  ;;  %v7233_v21 = vld [vmem:[#allocation14_spill] sm:$0xff]  ;;  %v2154_v15 = vmul.f32 %v5472_v54, %v7236_v48  ;;  %v7251_v40 = vld [vmem:[#allocation31_spill] sm:$0xff]  ;;  %v7255_v36 = vld [vmem:[#allocation9_spill] sm:$0xff] }
 0x23d   : > { %v2132_v53 = vsel %vm2131_vm2, %v3640_v2, %v2128_v1  ;;  %v2147_v9 = vmul.f32 %v5475_v49, %v7233_v21  ;;  %v2155_v30 = vmul.f32 %v5475_v49, %v7237_v35  ;;  %v5518_v4 = vmul.f32 %v5469_v11, %v7243_v63  ;;  %v7257_v1 = vld [vmem:[#allocation17_spill] sm:$0xff]  ;;  %v7265_v63 = vld [vmem:[#allocation46_spill] sm:$0xff]  ;;  %v7275_v35 = vld [vmem:[#allocation39_spill] sm:$0xff] }
 0x23e   : > { %v2136_v59 = vmul.f32 %v2132_v53, %v2088_v25  ;;  %v5481_v47 = vmul.f32 %v2135_v33, %v5311_v38  ;;  %v5484_v13 = vmul.f32 %v2135_v33, %v5313_v50  ;;  %v7234_v38 = vld [vmem:[#allocation7_spill] sm:$0xff]  ;;  %v7235_v50 = vld [vmem:[#allocation18_spill] sm:$0xff]  ;;  %v5522_v52 = vmul.f32 %v5472_v54, %v7244_v42  ;;  %v7256_v25 = vld [vmem:[#allocation13_spill] sm:$0xff] }
 0x23f   : > { %v2153_v60 = vmul.f32 %v5469_v11, %v7234_v38  ;;  %v2148_v5 = vmul.f32 %v5478_v24, %v7235_v50  ;;  %v5526_v8 = vmul.f32 %v5475_v49, %v7245_v43  ;;  %v5530_v27 = vmul.f32 %v5478_v24, %v7246_v19  ;;  %v7258_v53 = vld [vmem:[#allocation21_spill] sm:$0xff]  ;;  %v7263_v43 = vld [vmem:[#allocation38_spill] sm:$0xff]  ;;  %v7277_v48 = vld [vmem:[#allocation43_spill] sm:$0xff] }
 0x240   : > { %v5491_v28 = vmul.f32 %v2136_v59, %v5315_v34  ;;  %v5494_v45 = vmul.f32 %v2136_v59, %v5317_v58  ;;  %v7238_v34 = vld [vmem:[#allocation19_spill] sm:$0xff]  ;;  %v7239_v58 = vld [vmem:[#allocation22_spill] sm:$0xff]  ;;  %v2150_v2 = vmul.f32 %v5484_v13, %v7240_v46  ;;  %v2157_v57 = vmul.f32 %v5481_v47, %v7241_v56  ;;  %v7262_v19 = vld [vmem:[#allocation37_spill] sm:$0xff] }
 0x241   : > { %v2156_v22 = vmul.f32 %v5478_v24, %v7238_v34  ;;  %v2149_v0 = vmul.f32 %v5481_v47, %v7239_v58  ;;  %v2158_v10 = vmul.f32 %v5484_v13, %v7242_v14  ;;  %v5538_v20 = vmul.f32 %v5481_v47, %v7249_v23  ;;  %v7261_v23 = vld [vmem:[#allocation33_spill] sm:$0xff]  ;;  %v7264_v42 = vld [vmem:[#allocation42_spill] sm:$0xff]  ;;  %v7279_v38 = vld [vmem:[#allocation47_spill] sm:$0xff] }
 0x242   : > { %v2151_v61 = vmul.f32 %v5491_v28, %v7247_v7  ;;  %v2152_v44 = vmul.f32 %v5494_v45, %v7248_v31  ;;  %v5542_v16 = vmul.f32 %v5484_v13, %v7250_v41  ;;  %v2159_v55 = vmul.f32 %v5491_v28, %v7251_v40  ;;  %v7260_v41 = vld [vmem:[#allocation29_spill] sm:$0xff]  ;;  %v7267_v40 = vld [vmem:[#allocation54_spill] sm:$0xff]  ;;  %v7281_v31 = vld [vmem:[#allocation51_spill] sm:$0xff] }
 0x243   : > { %v2160_v3 = vmul.f32 %v5494_v45, %v7252_v37  ;;  %v5550_v29 = vmul.f32 %v5491_v28, %v7253_v6  ;;  %v5554_v62 = vmul.f32 %v5494_v45, %v7254_v18  ;;  %v5558_v51 = vmul.f32 %v5469_v11, %v7255_v36  ;;  %v7259_v6 = vld [vmem:[#allocation25_spill] sm:$0xff]  ;;  %v7266_v37 = vld [vmem:[#allocation50_spill] sm:$0xff]  ;;  %v7283_v7 = vld [vmem:[#allocation55_spill] sm:$0xff] }
 0x244   : > { %v5562_v17 = vmul.f32 %v5472_v54, %v7256_v25  ;;  %v5566_v33 = vmul.f32 %v5475_v49, %v7257_v1  ;;  %v5570_v59 = vmul.f32 %v5478_v24, %v7258_v53  ;;  %v5574_v18 = vmul.f32 %v5481_v47, %v7259_v6  ;;  %v7269_v14 = vld [vmem:[#allocation58_spill] sm:$0xff]  ;;  %v7273_v34 = vld [vmem:[#allocation65_spill] sm:$0xff]  ;;  %v7285_v46 = vld [vmem:[#allocation59_spill] sm:$0xff] }
 0x245   : > { %v5578_v36 = vmul.f32 %v5484_v13, %v7260_v41  ;;  %v5582_v25 = vmul.f32 %v5491_v28, %v7261_v23  ;;  %v5586_v1 = vmul.f32 %v5494_v45, %v7262_v19  ;;  %v5590_v53 = vmul.f32 %v5469_v11, %v7263_v43  ;;  %v7271_v56 = vld [vmem:[#allocation62_spill] sm:$0xff]  ;;  %v7287_v58 = vld [vmem:[#allocation63_spill] sm:$0xff]  ;;  %v7291_v21 = vld [vmem:[#allocation40_spill] sm:$0xff] }
 0x246   : > { %v5594_v6 = vmul.f32 %v5472_v54, %v7264_v42  ;;  %v5598_v41 = vmul.f32 %v5475_v49, %v7265_v63  ;;  %v5602_v23 = vmul.f32 %v5478_v24, %v7266_v37  ;;  %v5606_v19 = vmul.f32 %v5481_v47, %v7267_v40  ;;  %v7289_v50 = vld [vmem:[#allocation67_spill] sm:$0xff]  ;;  %v7293_v12 = vld [vmem:[#allocation44_spill] sm:$0xff] }
 0x247   : > { %v5610_v43 = vmul.f32 %v5484_v13, %v7269_v14  ;;  %v5614_v42 = vmul.f32 %v5491_v28, %v7271_v56  ;;  %v5618_v63 = vmul.f32 %v5494_v45, %v7273_v34  ;;  %v5622_v37 = vmul.f32 %v5469_v11, %v7275_v35  ;;  %v7295_v26 = vld [vmem:[#allocation48_spill] sm:$0xff] }
 0x248   : > { %7268 = vst [vmem:[#allocation102_spill] sm:$0xff] %v5606_v19  ;;  %v5626_v40 = vmul.f32 %v5472_v54, %v7277_v48  ;;  %v5630_v14 = vmul.f32 %v5475_v49, %v7279_v38  ;;  %v5634_v56 = vmul.f32 %v5478_v24, %v7281_v31  ;;  %v5638_v34 = vmul.f32 %v5481_v47, %v7283_v7 }
 0x249   : > { %7270 = vst [vmem:[#allocation103_spill] sm:$0xff] %v5610_v43  ;;  %v5642_v35 = vmul.f32 %v5484_v13, %v7285_v46  ;;  %v5646_v48 = vmul.f32 %v5491_v28, %v7287_v58  ;;  %v5650_v38 = vmul.f32 %v5494_v45, %v7289_v50  ;;  %v5654_v31 = vmul.f32 %v5469_v11, %v7291_v21 }
 0x24a   : > { %7272 = vst [vmem:[#allocation104_spill] sm:$0xff] %v5614_v42  ;;  %v5658_v7 = vmul.f32 %v5472_v54, %v7293_v12  ;;  %v5662_v46 = vmul.f32 %v5475_v49, %v7295_v26  ;;  %v2223_v12 = vadd.f32 %v2150_v2, %v2149_v0 }
 0x24b   : > { %7274 = vst [vmem:[#allocation105_spill] sm:$0xff] %v5618_v63 }
 0x24c   : > { %7276 = vst [vmem:[#allocation106_spill] sm:$0xff] %v5622_v37  ;;  %v2258_v37 = vadd.f32 %v2160_v3, %v2159_v55 }
 0x24d   : > { %7278 = vst [vmem:[#allocation107_spill] sm:$0xff] %v5626_v40  ;;  %v2251_v40 = vadd.f32 %v2158_v10, %v2157_v57  ;;  %v7303_v57 = vld [vmem:[#allocation64_spill] sm:$0xff] }
 0x24e   : > { %7280 = vst [vmem:[#allocation108_spill] sm:$0xff] %v5630_v14  ;;  %v2244_v14 = vadd.f32 %v2156_v22, %v2155_v30  ;;  %v2259_v19 = vrot.slane %v2258_v37, 4  ;;  %v5678_v10 = vmul.f32 %v5491_v28, %v7303_v57 }
 0x24f   : > { %7282 = vst [vmem:[#allocation109_spill] sm:$0xff] %v5634_v56  ;;  %v2237_v56 = vadd.f32 %v2154_v15, %v2153_v60  ;;  %v2252_v43 = vrot.slane %v2251_v40, 4 }
 0x250   : > { %7284 = vst [vmem:[#allocation110_spill] sm:$0xff] %v5638_v34  ;;  %v2216_v34 = vadd.f32 %v2148_v5, %v2147_v9  ;;  %v2245_v42 = vrot.slane %v2244_v14, 4  ;;  %v2260_v15 = vadd.f32 %v2259_v19, %v2258_v37  ;;  %v7312_v37 = vld [vmem:[#allocation69_spill] sm:$0xff] }
 0x251   : > { %7286 = vst [vmem:[#allocation111_spill] sm:$0xff] %v5642_v35  ;;  %v7297_v35 = vld [vmem:[#allocation52_spill] sm:$0xff]  ;;  %v2238_v63 = vrot.slane %v2237_v56, 4  ;;  %v2253_v60 = vadd.f32 %v2252_v43, %v2251_v40  ;;  %v7306_v43 = vld [vmem:[#allocation45_spill] sm:$0xff] }
 0x252   : > { %7288 = vst [vmem:[#allocation112_spill] sm:$0xff] %v5646_v48  ;;  %v5666_v58 = vmul.f32 %v5478_v24, %v7297_v35  ;;  %v7299_v48 = vld [vmem:[#allocation56_spill] sm:$0xff]  ;;  %v2224_v35 = vrot.slane %v2223_v12, 4  ;;  %v5694_v19 = vmul.f32 %v5472_v54, %v7306_v43  ;;  %v7311_v54 = vld [vmem:[#allocation66_spill] sm:$0xff] }
 0x253   : > { %7290 = vst [vmem:[#allocation113_spill] sm:$0xff] %v5650_v38  ;;  %v5670_v50 = vmul.f32 %v5481_v47, %v7299_v48  ;;  %v7301_v38 = vld [vmem:[#allocation60_spill] sm:$0xff]  ;;  %v5714_v55 = vmul.f32 %v5491_v28, %v7311_v54  ;;  %v2272_v28 = vadd.f32 %v5530_v27, %v5526_v8 }
 0x254   : > { %7292 = vst [vmem:[#allocation114_spill] sm:$0xff] %v5654_v31  ;;  %v5674_v21 = vmul.f32 %v5484_v13, %v7301_v38  ;;  %v2209_v31 = vadd.f32 %v2146_v39, %v2145_v32  ;;  %v2225_v38 = vadd.f32 %v2224_v35, %v2223_v12  ;;  %v2239_v32 = vadd.f32 %v2238_v63, %v2237_v56  ;;  %v7305_v63 = vld [vmem:[#allocation41_spill] sm:$0xff] }
 0x255   : > { %7294 = vst [vmem:[#allocation115_spill] sm:$0xff] %v5658_v7  ;;  %v2230_v7 = vadd.f32 %v2152_v44, %v2151_v61  ;;  %v2246_v39 = vadd.f32 %v2245_v42, %v2244_v14  ;;  %v2254_v56 = vrot.slane %v2253_v60, 2  ;;  %v2261_v14 = vrot.slane %v2260_v15, 2 }
 0x256   : > { %7296 = vst [vmem:[#allocation116_spill] sm:$0xff] %v5662_v46  ;;  %v2210_v26 = vrot.slane %v2209_v31, 4  ;;  %v2217_v46 = vrot.slane %v2216_v34, 4  ;;  %v2226_v30 = vrot.slane %v2225_v38, 2  ;;  %v2240_v0 = vrot.slane %v2239_v32, 2 }
 0x257   : > { %7298 = vst [vmem:[#allocation117_spill] sm:$0xff] %v5666_v58  ;;  %v2231_v58 = vrot.slane %v2230_v7, 4  ;;  %v2247_v2 = vrot.slane %v2246_v39, 2  ;;  %v5690_v42 = vmul.f32 %v5469_v11, %v7305_v63  ;;  %v7310_v11 = vld [vmem:[#allocation61_spill] sm:$0xff] }
 0x258   : > { %7300 = vst [vmem:[#allocation118_spill] sm:$0xff] %v5670_v50  ;;  %v2211_v48 = vadd.f32 %v2210_v26, %v2209_v31  ;;  %v2218_v50 = vadd.f32 %v2217_v46, %v2216_v34  ;;  %v7304_v26 = vld [vmem:[#allocation68_spill] sm:$0xff]  ;;  %v7307_v31 = vld [vmem:[#allocation49_spill] sm:$0xff]  ;;  %v5710_v40 = vmul.f32 %v5484_v13, %v7310_v11  ;;  %v2265_v13 = vadd.f32 %v5522_v52, %v5518_v4 }
 0x259   : > { %7302 = vst [vmem:[#allocation119_spill] sm:$0xff] %v5674_v21  ;;  %v2232_v21 = vadd.f32 %v2231_v58, %v2230_v7  ;;  %v5682_v34 = vmul.f32 %v5494_v45, %v7304_v26  ;;  %v5684_v58 = vadd.f32 %v2226_v30, %v2225_v38  ;;  %v2241_v7 = vadd.f32 %v2240_v0, %v2239_v32  ;;  %v7308_v38 = vld [vmem:[#allocation53_spill] sm:$0xff] }
 0x25a   : > { %v2212_v9 = vrot.slane %v2211_v48, 2  ;;  %v2219_v5 = vrot.slane %v2218_v50, 2  ;;  %v2248_v61 = vadd.f32 %v2247_v2, %v2246_v39  ;;  %v2293_v0 = vadd.f32 %v5562_v17, %v5558_v51 }
 0x25b   : > { %v2233_v22 = vrot.slane %v2232_v21, 2  ;;  %v2273_v2 = vrot.slane %v2272_v28, 4  ;;  %v2307_v4 = vadd.f32 %v5578_v36, %v5574_v18  ;;  %v2314_v52 = vadd.f32 %v5586_v1, %v5582_v25 }
 0x25c   : > { %v2213_v12 = vadd.f32 %v2212_v9, %v2211_v48  ;;  %v2220_v35 = vadd.f32 %v2219_v5, %v2218_v50  ;;  %v5698_v48 = vmul.f32 %v5475_v49, %v7307_v31  ;;  %v7309_v50 = vld [vmem:[#allocation57_spill] sm:$0xff]  ;;  %v5718_v49 = vmul.f32 %v5494_v45, %v7312_v37 }
 0x25d   : > { %v5686_v46 = vadd.f32 %v2233_v22, %v2232_v21  ;;  %v5702_v21 = vmul.f32 %v5478_v24, %v7308_v38  ;;  %v5706_v44 = vmul.f32 %v5481_v47, %v7309_v50  ;;  %v2228_v24 = vrot.slane %v5684_v58, 1 }
 0x25e   : > { %v2214_v3 = vrot.slane %v2213_v12, 1  ;;  %v2221_v32 = vrot.slane %v2220_v35, 1  ;;  %v2255_v47 = vadd.f32 %v2254_v56, %v2253_v60  ;;  %v2262_v9 = vadd.f32 %v2261_v14, %v2260_v15 }
 0x25f   : > { %v2235_v39 = vrot.slane %v5686_v46, 1  ;;  %v2242_v5 = vrot.slane %v2241_v7, 1  ;;  %v2249_v30 = vrot.slane %v2248_v61, 1  ;;  %v2279_v45 = vadd.f32 %v5542_v16, %v5538_v20 }
 0x260   : > { %v2286_v22 = vadd.f32 %v5554_v62, %v5550_v29  ;;  %v2300_v60 = vadd.f32 %v5570_v59, %v5566_v33  ;;  %v2266_v15 = vrot.slane %v2265_v13, 4  ;;  %v2294_v20 = vrot.slane %v2293_v0, 4 }
 0x261   : > { %v2280_v8 = vrot.slane %v2279_v45, 4  ;;  %v2274_v29 = vadd.f32 %v2273_v2, %v2272_v28  ;;  %v2308_v62 = vrot.slane %v2307_v4, 4  ;;  %v2315_v14 = vrot.slane %v2314_v52, 4 }
 0x262   : > { %v2287_v27 = vrot.slane %v2286_v22, 4  ;;  %v2301_v16 = vrot.slane %v2300_v60, 4  ;;  %v2267_v56 = vadd.f32 %v2266_v15, %v2265_v13  ;;  %v2295_v37 = vadd.f32 %v2294_v20, %v2293_v0 }
 0x263   : > { %v2281_v51 = vadd.f32 %v2280_v8, %v2279_v45  ;;  %v2275_v54 = vrot.slane %v2274_v29, 2  ;;  %v2309_v11 = vadd.f32 %v2308_v62, %v2307_v4  ;;  %v2316_v50 = vadd.f32 %v2315_v14, %v2314_v52 }
 0x264   : > { %v2288_v17 = vadd.f32 %v2287_v27, %v2286_v22  ;;  %v2302_v33 = vadd.f32 %v2301_v16, %v2300_v60  ;;  %v2268_v59 = vrot.slane %v2267_v56, 2  ;;  %v2296_v38 = vrot.slane %v2295_v37, 2  ;;  %v7319_v16 = vld [vmem:[#allocation107_spill] sm:$0xff] }
 0x265   : > { %v2282_v18 = vrot.slane %v2281_v51, 2  ;;  %v2256_v1 = vrot.slane %v2255_v47, 1  ;;  %v2263_v31 = vrot.slane %v2262_v9, 1  ;;  %v2276_v63 = vadd.f32 %v2275_v54, %v2274_v29  ;;  %v7320_v29 = vld [vmem:[#allocation108_spill] sm:$0xff] }
 0x266   : > { %v2289_v36 = vrot.slane %v2288_v17, 2  ;;  %v2303_v25 = vrot.slane %v2302_v33, 2  ;;  %v2269_v43 = vadd.f32 %v2268_v59, %v2267_v56  ;;  %v2310_v45 = vrot.slane %v2309_v11, 2 }
 0x267   : > { %v5738_v13 = vadd.f32 %v2282_v18, %v2281_v51  ;;  %v2317_v22 = vrot.slane %v2316_v50, 2  ;;  %v5742_v0 = vadd.f32 %v2214_v3, %v2213_v12  ;;  %v5744_v60 = vadd.f32 %v2221_v32, %v2220_v35  ;;  %v7322_v51 = vld [vmem:[#allocation110_spill] sm:$0xff] }
 0x268   : > { %v5740_v28 = vadd.f32 %v2289_v36, %v2288_v17  ;;  %v2297_v15 = vadd.f32 %v2296_v38, %v2295_v37  ;;  %v2304_v2 = vadd.f32 %v2303_v25, %v2302_v33  ;;  %v5747_v4 = vadd.f32 %v2228_v24, %v5684_v58  ;;  %v7323_v17 = vld [vmem:[#allocation111_spill] sm:$0xff]  ;;  %v7325_v33 = vld [vmem:[#allocation113_spill] sm:$0xff] }
 0x269   : > { %v5750_v52 = vadd.f32 %v2235_v39, %v5686_v46  ;;  %v5752_v8 = vadd.f32 %v2242_v5, %v2241_v7  ;;  %v5754_v54 = vadd.f32 %v2249_v30, %v2248_v61  ;;  %v5756_v27 = vadd.f32 %v2256_v1, %v2255_v47  ;;  %v7314_v61 = vld [vmem:[#allocation102_spill] sm:$0xff]  ;;  %v7315_v39 = vld [vmem:[#allocation103_spill] sm:$0xff]  ;;  %v7316_v47 = vld [vmem:[#allocation104_spill] sm:$0xff] }
 0x26a   : > { %v5758_v20 = vadd.f32 %v2263_v31, %v2262_v9  ;;  %v2270_v12 = vrot.slane %v2269_v43, 1  ;;  %v2277_v3 = vrot.slane %v2276_v63, 1  ;;  %v2284_v35 = vrot.slane %v5738_v13, 1  ;;  %v7317_v9 = vld [vmem:[#allocation105_spill] sm:$0xff]  ;;  %v7318_v30 = vld [vmem:[#allocation106_spill] sm:$0xff] }
 0x26b   : > { %v2291_v38 = vrot.slane %v5740_v28, 1  ;;  %v2311_v37 = vadd.f32 %v2310_v45, %v2309_v11  ;;  %v2318_v58 = vadd.f32 %v2317_v22, %v2316_v50  ;;  %v2298_v32 = vrot.slane %v2297_v15, 1  ;;  %v7321_v11 = vld [vmem:[#allocation109_spill] sm:$0xff] }
 0x26c   : > { %7313 = vst [vmem:[#allocation120_spill] sm:$0xff] %v5758_v20  ;;  %v2305_v24 = vrot.slane %v2304_v2, 1  ;;  %v2321_v46 = vadd.f32 %v5594_v6, %v5590_v53  ;;  %v2328_v7 = vadd.f32 %v5602_v23, %v5598_v41  ;;  %v2335_v31 = vadd.f32 %v7315_v39, %v7314_v61  ;;  %v7324_v53 = vld [vmem:[#allocation112_spill] sm:$0xff] }
 0x26d   : > { %v2342_v5 = vadd.f32 %v7317_v9, %v7316_v47  ;;  %v2349_v56 = vadd.f32 %v7319_v16, %v7318_v30  ;;  %v2356_v50 = vadd.f32 %v7321_v11, %v7320_v29  ;;  %v2363_v6 = vadd.f32 %v7323_v17, %v7322_v51 }
 0x26e   : > { %v2322_v62 = vrot.slane %v2321_v46, 4  ;;  %v2329_v14 = vrot.slane %v2328_v7, 4  ;;  %v2370_v23 = vadd.f32 %v7325_v33, %v7324_v53  ;;  %v2336_v41 = vrot.slane %v2335_v31, 4 }
 0x26f   : > { %v2343_v59 = vrot.slane %v2342_v5, 4  ;;  %v2350_v18 = vrot.slane %v2349_v56, 4  ;;  %v2357_v36 = vrot.slane %v2356_v50, 4  ;;  %v2364_v45 = vrot.slane %v2363_v6, 4 }
 0x270   : > { %v2323_v25 = vadd.f32 %v2322_v62, %v2321_v46  ;;  %v2330_v1 = vadd.f32 %v2329_v14, %v2328_v7  ;;  %v2371_v22 = vrot.slane %v2370_v23, 4  ;;  %v2337_v61 = vadd.f32 %v2336_v41, %v2335_v31 }
 0x271   : > { %v2344_v39 = vadd.f32 %v2343_v59, %v2342_v5  ;;  %v2351_v47 = vadd.f32 %v2350_v18, %v2349_v56  ;;  %v2358_v9 = vadd.f32 %v2357_v36, %v2356_v50  ;;  %v2365_v29 = vadd.f32 %v2364_v45, %v2363_v6 }
 0x272   : > { %v2324_v30 = vrot.slane %v2323_v25, 2  ;;  %v2331_v16 = vrot.slane %v2330_v1, 2  ;;  %v2372_v11 = vadd.f32 %v2371_v22, %v2370_v23  ;;  %v2338_v51 = vrot.slane %v2337_v61, 2 }
 0x273   : > { %v2345_v17 = vrot.slane %v2344_v39, 2  ;;  %v2352_v26 = vrot.slane %v2351_v47, 2  ;;  %v2359_v53 = vrot.slane %v2358_v9, 2  ;;  %v2312_v33 = vrot.slane %v2311_v37, 1 }
 0x274   : > { %v2319_v57 = vrot.slane %v2318_v58, 1  ;;  %v5778_v20 = vadd.f32 %v2324_v30, %v2323_v25  ;;  %v5780_v46 = vadd.f32 %v2331_v16, %v2330_v1  ;;  %v5782_v7 = vadd.f32 %v2338_v51, %v2337_v61  ;;  %v7331_v25 = vld [vmem:[#allocation119_spill] sm:$0xff] }
 0x275   : > { %v5784_v31 = vadd.f32 %v2345_v17, %v2344_v39  ;;  %v2366_v5 = vrot.slane %v2365_v29, 2  ;;  %v2373_v56 = vrot.slane %v2372_v11, 2  ;;  %v5786_v50 = vadd.f32 %v2270_v12, %v2269_v43 }
 0x276   : > { %v5788_v62 = vadd.f32 %v2277_v3, %v2276_v63  ;;  %v5790_v14 = vadd.f32 %v2352_v26, %v2351_v47  ;;  %v5792_v6 = vadd.f32 %v2359_v53, %v2358_v9  ;;  %v5795_v23 = vadd.f32 %v2284_v35, %v5738_v13 }
 0x277   : > { %v5798_v41 = vadd.f32 %v2291_v38, %v5740_v28  ;;  %v5800_v59 = vadd.f32 %v2298_v32, %v2297_v15  ;;  %v5802_v18 = vadd.f32 %v2305_v24, %v2304_v2  ;;  %v5804_v36 = vadd.f32 %v2312_v33, %v2311_v37  ;;  %v7326_v2 = vld [vmem:[#allocation114_spill] sm:$0xff]  ;;  %v7327_v38 = vld [vmem:[#allocation115_spill] sm:$0xff]  ;;  %v7328_v32 = vld [vmem:[#allocation116_spill] sm:$0xff] }
 0x278   : > { %v5806_v43 = vadd.f32 %v2319_v57, %v2318_v58  ;;  %v2326_v63 = vrot.slane %v5778_v20, 1  ;;  %v2333_v26 = vrot.slane %v5780_v46, 1  ;;  %v2340_v12 = vrot.slane %v5782_v7, 1  ;;  %v7329_v57 = vld [vmem:[#allocation117_spill] sm:$0xff]  ;;  %v7330_v24 = vld [vmem:[#allocation118_spill] sm:$0xff] }
 0x279   : > { %v2347_v13 = vrot.slane %v5784_v31, 1  ;;  %v2367_v3 = vadd.f32 %v2366_v5, %v2365_v29  ;;  %v2374_v35 = vadd.f32 %v2373_v56, %v2372_v11  ;;  %v2354_v28 = vrot.slane %v5790_v14, 1 }
 0x27a   : > { %v2361_v15 = vrot.slane %v5792_v6, 1  ;;  %v2377_v37 = vadd.f32 %v7327_v38, %v7326_v2  ;;  %v2384_v58 = vadd.f32 %v7329_v57, %v7328_v32  ;;  %v2391_v1 = vadd.f32 %v7331_v25, %v7330_v24 }
 0x27b   : > { %v2398_v45 = vadd.f32 %v5682_v34, %v5678_v10  ;;  %v2405_v22 = vadd.f32 %v5694_v19, %v5690_v42  ;;  %v2412_v61 = vadd.f32 %v5702_v21, %v5698_v48  ;;  %v2419_v9 = vadd.f32 %v5710_v40, %v5706_v44 }
 0x27c   : > { %v2378_v39 = vrot.slane %v2377_v37, 4  ;;  %v2385_v47 = vrot.slane %v2384_v58, 4  ;;  %v2426_v30 = vadd.f32 %v5718_v49, %v5714_v55  ;;  %v2392_v16 = vrot.slane %v2391_v1, 4 }
 0x27d   : > { %v2399_v29 = vrot.slane %v2398_v45, 4  ;;  %v2406_v11 = vrot.slane %v2405_v22, 4  ;;  %v2413_v51 = vrot.slane %v2412_v61, 4  ;;  %v2420_v34 = vrot.slane %v2419_v9, 4 }
 0x27e   : > { %v2379_v17 = vadd.f32 %v2378_v39, %v2377_v37  ;;  %v2386_v10 = vadd.f32 %v2385_v47, %v2384_v58  ;;  %v2427_v53 = vrot.slane %v2426_v30, 4  ;;  %v2393_v42 = vadd.f32 %v2392_v16, %v2391_v1 }
 0x27f   : > { %v2400_v19 = vadd.f32 %v2399_v29, %v2398_v45  ;;  %v2407_v33 = vadd.f32 %v2406_v11, %v2405_v22  ;;  %v2414_v48 = vadd.f32 %v2413_v51, %v2412_v61  ;;  %v2421_v56 = vadd.f32 %v2420_v34, %v2419_v9 }
 0x280   : > { %v2380_v21 = vrot.slane %v2379_v17, 2  ;;  %v2387_v5 = vrot.slane %v2386_v10, 2  ;;  %v2428_v2 = vadd.f32 %v2427_v53, %v2426_v30  ;;  %v2394_v44 = vrot.slane %v2393_v42, 2 }
 0x281   : > { %v2401_v40 = vrot.slane %v2400_v19, 2  ;;  %v2408_v38 = vrot.slane %v2407_v33, 2  ;;  %v2415_v55 = vrot.slane %v2414_v48, 2  ;;  %v2422_v57 = vrot.slane %v2421_v56, 2 }
 0x282   : > { %v2381_v49 = vadd.f32 %v2380_v21, %v2379_v17  ;;  %v2388_v32 = vadd.f32 %v2387_v5, %v2386_v10  ;;  %v2429_v24 = vrot.slane %v2428_v2, 2  ;;  %v2395_v37 = vadd.f32 %v2394_v44, %v2393_v42 }
 0x283   : > { %v2402_v58 = vadd.f32 %v2401_v40, %v2400_v19  ;;  %v2409_v25 = vadd.f32 %v2408_v38, %v2407_v33  ;;  %v2416_v39 = vadd.f32 %v2415_v55, %v2414_v48  ;;  %v2368_v1 = vrot.slane %v2367_v3, 1 }
 0x284   : > { %v2375_v45 = vrot.slane %v2374_v35, 1  ;;  %v2423_v22 = vadd.f32 %v2422_v57, %v2421_v56  ;;  %v2430_v61 = vadd.f32 %v2429_v24, %v2428_v2  ;;  %v2382_v47 = vrot.slane %v2381_v49, 1 }
 0x285   : > { %v2389_v16 = vrot.slane %v2388_v32, 1  ;;  %v2396_v9 = vrot.slane %v2395_v37, 1  ;;  %v2403_v30 = vrot.slane %v2402_v58, 1  ;;  %v2410_v29 = vrot.slane %v2409_v25, 1 }
 0x286   : > { %v2417_v11 = vrot.slane %v2416_v39, 1  ;;  %v2424_v51 = vrot.slane %v2423_v22, 1  ;;  %v2431_v34 = vrot.slane %v2430_v61, 1  ;;  %v2327_v17 = vadd.f32 %v2326_v63, %v5778_v20  ;;  %v7332_v63 = vld [vmem:[#allocation71_spill] sm:$0xff] }
 0x287   : > { %v2334_v10 = vadd.f32 %v2333_v26, %v5780_v46  ;;  %v2341_v53 = vadd.f32 %v2340_v12, %v5782_v7  ;;  %v2348_v42 = vadd.f32 %v2347_v13, %v5784_v31  ;;  %v2355_v19 = vadd.f32 %v2354_v28, %v5790_v14  ;;  %v7333_v7 = vld [vmem:[#allocation73_spill] sm:$0xff]  ;;  %v7334_v14 = vld [vmem:[#allocation72_spill] sm:$0xff]  ;;  %v7335_v26 = vld [vmem:[#allocation75_spill] sm:$0xff] }
 0x288   : > { %v2362_v33 = vadd.f32 %v2361_v15, %v5792_v6  ;;  %v2369_v48 = vadd.f32 %v2368_v1, %v2367_v3  ;;  %v2376_v21 = vadd.f32 %v2375_v45, %v2374_v35  ;;  %v2383_v5 = vadd.f32 %v2382_v47, %v2381_v49  ;;  %v7336_v13 = vld [vmem:[#allocation76_spill] sm:$0xff]  ;;  %v7337_v35 = vld [vmem:[#allocation77_spill] sm:$0xff]  ;;  %v7339_v15 = vld [vmem:[#allocation83_spill] sm:$0xff] }
 0x289   : > { %v2390_v56 = vadd.f32 %v2389_v16, %v2388_v32  ;;  %v2397_v2 = vadd.f32 %v2396_v9, %v2395_v37  ;;  %v2404_v44 = vadd.f32 %v2403_v30, %v2402_v58  ;;  %v2411_v40 = vadd.f32 %v2410_v29, %v2409_v25  ;;  %v7338_v28 = vld [vmem:[#allocation81_spill] sm:$0xff]  ;;  %v7344_v58 = vld [vmem:[#allocation79_spill] sm:$0xff]  ;;  %v7345_v25 = vld [vmem:[#allocation80_spill] sm:$0xff] }
 0x28a   : > { %v2418_v38 = vadd.f32 %v2417_v11, %v2416_v39  ;;  %v2425_v55 = vadd.f32 %v2424_v51, %v2423_v22  ;;  %v2432_v20 = vadd.f32 %v2431_v34, %v2430_v61  ;;  %v5838_v46 = vadd.f32 %v5742_v0, %v7332_v63  ;;  %v7340_v49 = vld [vmem:[#allocation85_spill] sm:$0xff]  ;;  %v7347_v45 = vld [vmem:[#allocation95_spill] sm:$0xff]  ;;  %v7348_v61 = vld [vmem:[#allocation82_spill] sm:$0xff] }
 0x28b   : > { %v5842_v31 = vadd.f32 %v5744_v60, %v7333_v7  ;;  %v5846_v6 = vadd.f32 %v5752_v8, %v7334_v14  ;;  %v5850_v12 = vadd.f32 %v5754_v54, %v7335_v26  ;;  %v5854_v3 = vadd.f32 %v5786_v50, %v7336_v13  ;;  %v7341_v54 = vld [vmem:[#allocation86_spill] sm:$0xff]  ;;  %v7342_v50 = vld [vmem:[#allocation88_spill] sm:$0xff]  ;;  %v7343_v37 = vld [vmem:[#allocation89_spill] sm:$0xff] }
 0x28c   : > { %v5858_v0 = vadd.f32 %v5788_v62, %v7337_v35  ;;  %v5862_v60 = vadd.f32 %v5800_v59, %v7338_v28  ;;  %v5866_v8 = vadd.f32 %v5802_v18, %v7339_v15  ;;  %v5869_v32 = vadd.f32 %v2327_v17, %v7340_v49  ;;  %v7346_v39 = vld [vmem:[#allocation97_spill] sm:$0xff]  ;;  %v7349_v16 = vld [vmem:[#allocation84_spill] sm:$0xff]  ;;  %v7351_v29 = vld [vmem:[#allocation74_spill] sm:$0xff] }
 0x28d   : > { %v5872_v57 = vadd.f32 %v2334_v10, %v7341_v54  ;;  %v5875_v24 = vadd.f32 %v2355_v19, %v7342_v50  ;;  %v5878_v62 = vadd.f32 %v2362_v33, %v7343_v37  ;;  %v5882_v59 = vadd.f32 %v5747_v4, %v7344_v58  ;;  %v7350_v4 = vld [vmem:[#allocation70_spill] sm:$0xff]  ;;  %v7352_v11 = vld [vmem:[#allocation87_spill] sm:$0xff]  ;;  %v7357_v28 = vld [vmem:[#allocation92_spill] sm:$0xff] }
 0x28e   : > { %v5886_v18 = vadd.f32 %v5756_v27, %v7345_v25  ;;  %v5889_v1 = vadd.f32 %v2383_v5, %v7346_v39  ;;  %v5892_v22 = vadd.f32 %v2390_v56, %v7347_v45  ;;  %v5896_v47 = vadd.f32 %v5795_v23, %v7348_v61  ;;  %v7353_v34 = vld [vmem:[#allocation90_spill] sm:$0xff]  ;;  %v7358_v15 = vld [vmem:[#allocation120_spill] sm:$0xff]  ;;  %v7359_v58 = vld [vmem:[#allocation93_spill] sm:$0xff] }
 0x28f   : > { %v5900_v9 = vadd.f32 %v5804_v36, %v7349_v16  ;;  %v5903_v30 = vadd.f32 %v2411_v40, %v7350_v4  ;;  %v5906_v27 = vadd.f32 %v2418_v38, %v7351_v29  ;;  %v5909_v51 = vadd.f32 %v2341_v53, %v7352_v11  ;;  %v7354_v38 = vld [vmem:[#allocation91_spill] sm:$0xff]  ;;  %v7355_v7 = vld [vmem:[#allocation98_spill] sm:$0xff]  ;;  %v7361_v61 = vld [vmem:[#allocation96_spill] sm:$0xff] }
 0x290   : > { %v5912_v17 = vadd.f32 %v2369_v48, %v7353_v34  ;;  %v2465_v23 = vmax.f32 %v5838_v46, %v5842_v31  ;;  %v2468_v10 = vmax.f32 %v5846_v6, %v5850_v12  ;;  %v2471_v36 = vmax.f32 %v5854_v3, %v5858_v0  ;;  %v7356_v26 = vld [vmem:[#allocation78_spill] sm:$0xff]  ;;  %v7362_v4 = vld [vmem:[#allocation99_spill] sm:$0xff]  ;;  %v7363_v34 = vld [vmem:[#allocation101_spill] sm:$0xff] }
 0x291   : > { %v2474_v19 = vmax.f32 %v5862_v60, %v5866_v8  ;;  %v2477_v33 = vmax.f32 %v5869_v32, %v5872_v57  ;;  %v2480_v53 = vmax.f32 %v5875_v24, %v5878_v62  ;;  %v2483_v56 = vmax.f32 %v5889_v1, %v5892_v22  ;;  %v7360_v39 = vld [vmem:[#allocation94_spill] sm:$0xff] }
 0x292   : > { %v2466_v48 = vmax.f32 %v2465_v23, %v5882_v59  ;;  %v2469_v5 = vmax.f32 %v2468_v10, %v5886_v18  ;;  %v2486_v40 = vmax.f32 %v5903_v30, %v5906_v27  ;;  %v2436_v63 = vadd.f32 %v5750_v52, %v7354_v38 }
 0x293   : > { %v5935_v14 = vadd.f32 %v2397_v2, %v7355_v7  ;;  %v5938_v13 = vadd.f32 %v2425_v55, %v7356_v26  ;;  %v2472_v35 = vmax.f32 %v2471_v36, %v5896_v47  ;;  %v2440_v49 = vadd.f32 %v7358_v15, %v7357_v28 }
 0x294   : > { %v2475_v54 = vmax.f32 %v2474_v19, %v5900_v9  ;;  %v2478_v50 = vmax.f32 %v2477_v33, %v5909_v51  ;;  %v2481_v37 = vmax.f32 %v2480_v53, %v5912_v17  ;;  %v5948_v52 = vadd.f32 %v5798_v41, %v7359_v58  ;;  %v7364_v41 = vld [vmem:[#allocation100_spill] sm:$0xff] }
 0x295   : > { %v2467_v2 = vmax.f32 %v2466_v48, %v2436_v63  ;;  %v2484_v25 = vmax.f32 %v2483_v56, %v5935_v14  ;;  %v2487_v55 = vmax.f32 %v2486_v40, %v5938_v13  ;;  %v5954_v45 = vadd.f32 %v5806_v43, %v7360_v39 }
 0x296   : > { %v5957_v16 = vadd.f32 %v2348_v42, %v7361_v61  ;;  %v5960_v29 = vadd.f32 %v2376_v21, %v7362_v4  ;;  %v2470_v11 = vmax.f32 %v2469_v5, %v2440_v49  ;;  %v5963_v23 = vadd.f32 %v2404_v44, %v7363_v34 }
 0x297   : > { %v5966_v10 = vadd.f32 %v2432_v20, %v7364_v41  ;;  %v2473_v36 = vmax.f32 %v2472_v35, %v5948_v52  ;;  %v2476_v19 = vmax.f32 %v2475_v54, %v5954_v45  ;;  %v2489_v44 = vsub.f32 %v5838_v46, %v2467_v2 }
 0x298   : > { %v5971_v43 = vmax.f32 %v2478_v50, %v5957_v16  ;;  %v5974_v42 = vmax.f32 %v2481_v37, %v5960_v29  ;;  %v5977_v21 = vmax.f32 %v2484_v25, %v5963_v23  ;;  %v2490_v20 = vsub.f32 %v5842_v31, %v2467_v2 }
 0x299   : > { %v5980_v33 = vmax.f32 %v2487_v55, %v5966_v10  ;;  %v2491_v53 = vsub.f32 %v5882_v59, %v2467_v2  ;;  %v2492_v48 = vsub.f32 %v2436_v63, %v2467_v2  ;;  %v2493_v5 = vsub.f32 %v5846_v6, %v2470_v11 }
 0x29a   : > { %v2494_v56 = vsub.f32 %v5850_v12, %v2470_v11  ;;  %v2495_v40 = vsub.f32 %v5886_v18, %v2470_v11  ;;  %v2496_v38 = vsub.f32 %v2440_v49, %v2470_v11  ;;  %v2497_v7 = vsub.f32 %v5854_v3, %v2473_v36 }
 0x29b   : > { %v2498_v26 = vsub.f32 %v5858_v0, %v2473_v36  ;;  %v2499_v35 = vsub.f32 %v5896_v47, %v2473_v36  ;;  %v2500_v46 = vsub.f32 %v5948_v52, %v2473_v36  ;;  %v2501_v31 = vsub.f32 %v5862_v60, %v2476_v19 }
 0x29c   : > { %v2502_v59 = vsub.f32 %v5866_v8, %v2476_v19  ;;  %v2503_v63 = vsub.f32 %v5900_v9, %v2476_v19  ;;  %v2504_v6 = vsub.f32 %v5954_v45, %v2476_v19  ;;  %v2505_v12 = vsub.f32 %v5869_v32, %v5971_v43 }
 0x29d   : > { %v2506_v3 = vsub.f32 %v5872_v57, %v5971_v43  ;;  %v2507_v0 = vsub.f32 %v5909_v51, %v5971_v43  ;;  %v2508_v18 = vsub.f32 %v5957_v16, %v5971_v43  ;;  %v2521_v47 = vmul.f32 1.442695, %v2489_v44 }
 0x29e   : > { %v2523_v60 = vmul.f32 1.442695, %v2490_v20  ;;  %v2509_v8 = vsub.f32 %v5875_v24, %v5974_v42  ;;  %v2510_v9 = vsub.f32 %v5878_v62, %v5974_v42  ;;  %v2525_v28 = vmul.f32 1.442695, %v2491_v53 }
 0x29f   : > { %v2527_v15 = vmul.f32 1.442695, %v2492_v48  ;;  %v2511_v32 = vsub.f32 %v5912_v17, %v5974_v42  ;;  %v2512_v57 = vsub.f32 %v5960_v29, %v5974_v42  ;;  %3641 = vpow2.f32 %v2521_v47 }
 0x2a0   : > { %v2529_v51 = vmul.f32 1.442695, %v2493_v5  ;;  %v2513_v49 = vsub.f32 %v5889_v1, %v5977_v21  ;;  %v2514_v54 = vsub.f32 %v5892_v22, %v5977_v21  ;;  %3643 = vpow2.f32 %v2523_v60 }
 0x2a1   : > { %v2531_v24 = vmul.f32 1.442695, %v2494_v56  ;;  %v2515_v62 = vsub.f32 %v5935_v14, %v5977_v21  ;;  %v2516_v50 = vsub.f32 %v5963_v23, %v5977_v21  ;;  %3645 = vpow2.f32 %v2525_v28 }
 0x2a2   : > { %v2533_v17 = vmul.f32 1.442695, %v2495_v40  ;;  %v2517_v37 = vsub.f32 %v5903_v30, %v5980_v33  ;;  %v2518_v58 = vsub.f32 %v5906_v27, %v5980_v33  ;;  %3647 = vpow2.f32 %v2527_v15 }
 0x2a3   : > { %v2535_v1 = vmul.f32 1.442695, %v2496_v38  ;;  %v2519_v22 = vsub.f32 %v5938_v13, %v5980_v33  ;;  %v2520_v52 = vsub.f32 %v5966_v10, %v5980_v33  ;;  %3649 = vpow2.f32 %v2529_v51 }
 0x2a4   : > { %v2537_v14 = vmul.f32 1.442695, %v2497_v7  ;;  %3651 = vpow2.f32 %v2531_v24  ;;  %v2539_v2 = vmul.f32 1.442695, %v2498_v26  ;;  %v2541_v25 = vmul.f32 1.442695, %v2499_v35 }
 0x2a5   : > { %v2543_v55 = vmul.f32 1.442695, %v2500_v46  ;;  %v6028_v39 = vpop.eup %3641  ;;  %3653 = vpow2.f32 %v2533_v17  ;;  %v2545_v30 = vmul.f32 1.442695, %v2501_v31  ;;  %v2547_v45 = vmul.f32 1.442695, %v2502_v59 }
 0x2a6   : > { %v2549_v27 = vmul.f32 1.442695, %v2503_v63  ;;  %v6030_v61 = vpop.eup %3643  ;;  %3655 = vpow2.f32 %v2535_v1  ;;  %v2551_v16 = vmul.f32 1.442695, %v2504_v6  ;;  %v2553_v4 = vmul.f32 1.442695, %v2505_v12 }
 0x2a7   : > { %v2555_v29 = vmul.f32 1.442695, %v2506_v3  ;;  %v6032_v11 = vpop.eup %3645  ;;  %3657 = vpow2.f32 %v2537_v14  ;;  %v2557_v34 = vmul.f32 1.442695, %v2507_v0  ;;  %v2559_v23 = vmul.f32 1.442695, %v2508_v18 }
 0x2a8   : > { %v2561_v41 = vmul.f32 1.442695, %v2509_v8  ;;  %v6034_v36 = vpop.eup %3647  ;;  %3659 = vpow2.f32 %v2539_v2  ;;  %v2563_v19 = vmul.f32 1.442695, %v2510_v9  ;;  %v2617_v43 = vrot.slane %v6030_v61, 7 }
 0x2a9   : > { %v2619_v42 = vrot.slane %v6032_v11, 6  ;;  %v6038_v21 = vpop.eup %3649  ;;  %3661 = vpow2.f32 %v2541_v25  ;;  %v2565_v44 = vmul.f32 1.442695, %v2511_v32  ;;  %v2567_v20 = vmul.f32 1.442695, %v2512_v57 }
 0x2aa   : > { %v6040_v53 = vmul.f32 1.442695, %v2513_v49  ;;  %v6042_v48 = vpop.eup %3651  ;;  %3663 = vpow2.f32 %v2543_v55  ;;  %v6044_v5 = vmul.f32 1.442695, %v2514_v54  ;;  %v2618_v56 = vsel %vm1571_vm4, %v2617_v43, %v6028_v39 }
 0x2ab   : > { %v2621_v40 = vrot.slane %v6034_v36, 5  ;;  %v6049_v38 = vpop.eup %3653  ;;  %3665 = vpow2.f32 %v2545_v30  ;;  %v6051_v7 = vmul.f32 1.442695, %v2515_v62  ;;  %v2620_v26 = vsel %vm1574_vm5, %v2619_v42, %v2618_v56 }
 0x2ac   : > { %v2623_v35 = vrot.slane %v6042_v48, 7  ;;  %v6055_v46 = vpop.eup %3655  ;;  %3667 = vpow2.f32 %v2547_v45  ;;  %v6057_v31 = vmul.f32 1.442695, %v2516_v50  ;;  %v2625_v63 = vrot.slane %v6049_v38, 6 }
 0x2ad   : > { %v2622_v59 = vsel %vm1577_vm6, %v2621_v40, %v2620_v26  ;;  %v6061_v6 = vpop.eup %3657  ;;  %3669 = vpow2.f32 %v2549_v27  ;;  %v2627_v3 = vrot.slane %v6055_v46, 5  ;;  %v6069_v47 = vmul.f32 1.442695, %v2517_v37 }
 0x2ae   : > { %v2624_v12 = vsel %vm1571_vm4, %v2623_v35, %v6038_v21  ;;  %v2673_v0 = vsel %vm319_vm0, %v2622_v59, 0.0  ;;  %v6067_v18 = vpop.eup %3659  ;;  %3671 = vpow2.f32 %v2551_v16  ;;  %v6074_v28 = vmul.f32 1.442695, %v2518_v58 }
 0x2af   : > { %v2626_v60 = vsel %vm1574_vm5, %v2625_v63, %v2624_v12  ;;  %v2674_v8 = vrot.slane %v2673_v0, 4  ;;  %v6072_v9 = vpop.eup %3661  ;;  %3673 = vpow2.f32 %v2553_v4  ;;  %v2629_v32 = vrot.slane %v6067_v18, 7 }
 0x2b0   : > { %v2628_v15 = vsel %vm1577_vm6, %v2627_v3, %v2626_v60  ;;  %v6078_v57 = vpop.eup %3663  ;;  %3675 = vpow2.f32 %v2555_v29  ;;  %v2631_v51 = vrot.slane %v6072_v9, 6  ;;  %v2581_v58 = vmul.f32 1.442695, %v2519_v22 }
 0x2b1   : > { %v2675_v49 = vadd.f32 %v2674_v8, %v2673_v0  ;;  %v2680_v54 = vsel %vm319_vm0, %v2628_v15, 0.0  ;;  %v6082_v24 = vpop.eup %3665  ;;  %3677 = vpow2.f32 %v2557_v34  ;;  %v2630_v62 = vsel %vm1571_vm4, %v2629_v32, %v6061_v6 }
 0x2b2   : > { %v2633_v50 = vrot.slane %v6078_v57, 5  ;;  %v2681_v17 = vrot.slane %v2680_v54, 4  ;;  %v6087_v37 = vpop.eup %3667  ;;  %3679 = vpow2.f32 %v2559_v23  ;;  %v2632_v1 = vsel %vm1574_vm5, %v2631_v51, %v2630_v62 }
 0x2b3   : > { %v2676_v14 = vrot.slane %v2675_v49, 2  ;;  %v6093_v2 = vpop.eup %3669  ;;  %3681 = vpow2.f32 %v2561_v41  ;;  %v2635_v55 = vrot.slane %v6087_v37, 7 }
 0x2b4   : > { %v2634_v25 = vsel %vm1577_vm6, %v2633_v50, %v2632_v1  ;;  %v2682_v30 = vadd.f32 %v2681_v17, %v2680_v54  ;;  %v6097_v45 = vpop.eup %3671  ;;  %3683 = vpow2.f32 %v2563_v19  ;;  %v2637_v27 = vrot.slane %v6093_v2, 6 }
 0x2b5   : > { %v2677_v16 = vadd.f32 %v2676_v14, %v2675_v49  ;;  %v2687_v13 = vsel %vm319_vm0, %v2634_v25, 0.0  ;;  %v6101_v22 = vpop.eup %3673  ;;  %3685 = vpow2.f32 %v2565_v44  ;;  %v2636_v4 = vsel %vm1571_vm4, %v2635_v55, %v6082_v24 }
 0x2b6   : > { %v2639_v29 = vrot.slane %v6097_v45, 5  ;;  %v2683_v34 = vrot.slane %v2682_v30, 2  ;;  %v6106_v23 = vpop.eup %3675  ;;  %3687 = vpow2.f32 %v2567_v20  ;;  %v2638_v41 = vsel %vm1574_vm5, %v2637_v27, %v2636_v4 }
 0x2b7   : > { %v2678_v19 = vrot.slane %v2677_v16, 1  ;;  %v2688_v43 = vrot.slane %v2687_v13, 4  ;;  %v6109_v42 = vpop.eup %3677  ;;  %3689 = vpow2.f32 %v6040_v53  ;;  %v2641_v44 = vrot.slane %v6106_v23, 7 }
 0x2b8   : > { %v2640_v56 = vsel %vm1577_vm6, %v2639_v29, %v2638_v41  ;;  %v2684_v40 = vadd.f32 %v2683_v34, %v2682_v30  ;;  %v6114_v26 = vpop.eup %3679  ;;  %3691 = vpow2.f32 %v6044_v5  ;;  %v2583_v20 = vmul.f32 1.442695, %v2520_v52 }
 0x2b9   : > { %v2643_v35 = vrot.slane %v6109_v42, 6  ;;  %v2689_v59 = vadd.f32 %v2688_v43, %v2687_v13  ;;  %v6121_v63 = vpop.eup %3681  ;;  %3693 = vpow2.f32 %v6051_v7  ;;  %v2642_v53 = vsel %vm1571_vm4, %v2641_v44, %v6101_v22 }
 0x2ba   : > { %v2645_v12 = vrot.slane %v6114_v26, 5  ;;  %v2679_v3 = vadd.f32 %v2678_v19, %v2677_v16  ;;  %v6127_v0 = vpop.eup %3683  ;;  %3695 = vpow2.f32 %v6057_v31  ;;  %v2694_v52 = vsel %vm319_vm0, %v2640_v56, 0.0 }
 0x2bb   : > { %v2644_v10 = vsel %vm1574_vm5, %v2643_v35, %v2642_v53  ;;  %v2690_v33 = vrot.slane %v2689_v59, 2  ;;  %v6132_v5 = vpop.eup %3685  ;;  %3697 = vpow2.f32 %v6069_v47  ;;  %v2647_v60 = vrot.slane %v6127_v0, 7 }
 0x2bc   : > { %v2646_v7 = vsel %vm1577_vm6, %v2645_v12, %v2644_v10  ;;  %v2685_v8 = vrot.slane %v2684_v40, 1  ;;  %v6137_v15 = vpop.eup %3687  ;;  %3699 = vpow2.f32 %v6074_v28  ;;  %v2649_v31 = vrot.slane %v6132_v5, 6 }
 0x2bd   : > { %v2691_v32 = vadd.f32 %v2690_v33, %v2689_v59  ;;  %v2695_v51 = vrot.slane %v2694_v52, 4  ;;  %v6141_v49 = vpop.eup %3689  ;;  %3701 = vpow2.f32 %v2581_v58  ;;  %v2648_v54 = vsel %vm1571_vm4, %v2647_v60, %v6121_v63 }
 0x2be   : > { %v2651_v47 = vrot.slane %v6137_v15, 5  ;;  %v2701_v62 = vsel %vm319_vm0, %v2646_v7, 0.0  ;;  %v6147_v50 = vpop.eup %3691  ;;  %3703 = vpow2.f32 %v2583_v20  ;;  %v2650_v17 = vsel %vm1574_vm5, %v2649_v31, %v2648_v54 }
 0x2bf   : > { %v2692_v28 = vrot.slane %v2691_v32, 1  ;;  %v2696_v1 = vadd.f32 %v2695_v51, %v2694_v52  ;;  %v6150_v14 = vpop.eup %3693  ;;  %v2653_v58 = vrot.slane %v6147_v50, 7  ;;  %v2702_v55 = vrot.slane %v2701_v62, 4 }
 0x2c0   : > { %v2652_v25 = vsel %vm1577_vm6, %v2651_v47, %v2650_v17  ;;  %v6154_v30 = vpop.eup %3695  ;;  %v2655_v27 = vrot.slane %v6150_v14, 6  ;;  %v6158_v4 = vperm.slane %v2679_v3, 0  ;;  %v2686_v20 = vadd.f32 %v2685_v8, %v2684_v40 }
 0x2c1   : > { %v2697_v16 = vrot.slane %v2696_v1, 2  ;;  %v2708_v13 = vsel %vm319_vm0, %v2652_v25, 0.0  ;;  %v6160_v29 = vpop.eup %3697  ;;  %v2654_v34 = vsel %vm1571_vm4, %v2653_v58, %v6141_v49  ;;  %v2657_v41 = vrot.slane %v6154_v30, 5 }
 0x2c2   : > { %v2703_v19 = vadd.f32 %v2702_v55, %v2701_v62  ;;  %v2709_v43 = vrot.slane %v2708_v13, 4  ;;  %v6165_v56 = vpop.eup %3699  ;;  %v2656_v44 = vsel %vm1574_vm5, %v2655_v27, %v2654_v34  ;;  %v2693_v35 = vadd.f32 %v2692_v28, %v2691_v32 }
 0x2c3   : > { %v2698_v59 = vadd.f32 %v2697_v16, %v2696_v1  ;;  %v6168_v53 = vpop.eup %3701  ;;  %v2658_v12 = vsel %vm1577_vm6, %v2657_v41, %v2656_v44  ;;  %v2659_v3 = vrot.slane %v6165_v56, 7  ;;  %3705 = vrcp.f32 %v6158_v4 }
 0x2c4   : > { %v2704_v10 = vrot.slane %v2703_v19, 2  ;;  %v2710_v33 = vadd.f32 %v2709_v43, %v2708_v13  ;;  %v6172_v52 = vpop.eup %3703  ;;  %v2661_v7 = vrot.slane %v6168_v53, 6  ;;  %v2715_v31 = vsel %vm319_vm0, %v2658_v12, 0.0 }
 0x2c5   : > { %v2699_v60 = vrot.slane %v2698_v59, 1  ;;  %v2660_v40 = vsel %vm1571_vm4, %v2659_v3, %v6160_v29  ;;  %v2663_v8 = vrot.slane %v6172_v52, 5  ;;  %v2716_v47 = vrot.slane %v2715_v31, 4 }
 0x2c6   : > { %v2705_v32 = vadd.f32 %v2704_v10, %v2703_v19  ;;  %v2711_v51 = vrot.slane %v2710_v33, 2  ;;  %v2662_v54 = vsel %vm1574_vm5, %v2661_v7, %v2660_v40  ;;  %v6181_v62 = vperm.slane %v2686_v20, 0 }
 0x2c7   : > { %v2664_v17 = vsel %vm1577_vm6, %v2663_v8, %v2662_v54  ;;  %v2700_v1 = vadd.f32 %v2699_v60, %v2698_v59  ;;  %v2717_v58 = vadd.f32 %v2716_v47, %v2715_v31  ;;  %v6185_v16 = vperm.slane %v2693_v35, 0 }
 0x2c8   : > { %v2712_v28 = vadd.f32 %v2711_v51, %v2710_v33  ;;  %v2706_v25 = vrot.slane %v2705_v32, 1  ;;  %v2722_v55 = vsel %vm319_vm0, %v2664_v17, 0.0  ;;  %v2746_v19 = vand.u32 2147483647, %v6158_v4 }
 0x2c9   : > { %v2723_v27 = vrot.slane %v2722_v55, 4  ;;  %v3706_v13 = vpop.eup %3705  ;;  %v2718_v41 = vrot.slane %v2717_v58, 2  ;;  %3707 = vrcp.f32 %v6181_v62  ;;  %v6190_v59 = vperm.slane %v2700_v1, 0 }
 0x2ca   : > { %v2713_v34 = vrot.slane %v2712_v28, 1  ;;  %v2738_v44 = vmul.f32 %v3706_v13, %v6158_v4  ;;  %v2707_v20 = vadd.f32 %v2706_v25, %v2705_v32  ;;  %v2748_v3 = vand.u32 2147483648, %v6158_v4 }
 0x2cb   : > { %v2724_v43 = vadd.f32 %v2723_v27, %v2722_v55  ;;  %v2719_v12 = vadd.f32 %v2718_v41, %v2717_v58  ;;  %vm2742_vm0 = vweird.f32 %v6158_v4  ;;  %3709 = vrcp.f32 %v6185_v16 }
 0x2cc   : > { %v2739_v33 = vsub.f32 1.0, %v2738_v44  ;;  %v2714_v35 = vadd.f32 %v2713_v34, %v2712_v28  ;;  %vm6195_vm4 = vcmp.eq.f32.partialorder %v2746_v19, 8.507059e+37  ;;  %v2764_v31 = vand.u32 2147483647, %v6181_v62 }
 0x2cd   : > { %v2725_v10 = vrot.slane %v2724_v43, 2  ;;  %v2720_v7 = vrot.slane %v2719_v12, 1  ;;  %vm2743_vm5 = vweird.f32 %v3706_v13  ;;  %v2766_v32 = vand.u32 2147483648, %v6181_v62 }
 0x2ce   : > { %v2740_v8 = vmul.f32 %v3706_v13, %v2739_v33  ;;  %v6201_v54 = vperm.slane %v2707_v20, 0  ;;  %v2749_v47 = vor.u32 1.1754944e-38, %v2748_v3  ;;  %v2782_v17 = vand.u32 2147483647, %v6185_v16  ;;  %vm2744_vm6 = vmor %vm2742_vm0, %vm2743_vm5 }
 0x2cf   : > { %v2726_v40 = vadd.f32 %v2725_v10, %v2724_v43  ;;  %v3708_v51 = vpop.eup %3707  ;;  %3711 = vrcp.f32 %v6190_v59  ;;  %v2721_v28 = vadd.f32 %v2720_v7, %v2719_v12  ;;  %v6206_v55 = vperm.slane %v2714_v35, 0 }
 0x2d0   : > { %v2741_v25 = vadd.f32 %v3706_v13, %v2740_v8  ;;  %v2756_v58 = vmul.f32 %v3708_v51, %v6181_v62  ;;  %vm2760_vm10 = vweird.f32 %v6181_v62  ;;  %vm6211_vm11 = vcmp.eq.f32.partialorder %v2764_v31, 8.507059e+37 }
 0x2d1   : > { %v2727_v1 = vrot.slane %v2726_v40, 1  ;;  %v2784_v34 = vand.u32 2147483648, %v6185_v16  ;;  %v3710_v41 = vpop.eup %3709  ;;  %v2767_v20 = vor.u32 1.1754944e-38, %v2766_v32  ;;  %v2800_v4 = vand.u32 2147483647, %v6190_v59 }
 0x2d2   : > { %v2745_v43 = vsel %vm2744_vm6, %v3706_v13, %v2741_v25  ;;  %v2757_v44 = vsub.f32 1.0, %v2756_v58  ;;  %v2774_v3 = vmul.f32 %v3710_v41, %v6185_v16  ;;  %3713 = vrcp.f32 %v6201_v54 }
 0x2d3   : > { %v2728_v19 = vadd.f32 %v2727_v1, %v2726_v40  ;;  %v2750_v12 = vsel %vm6195_vm4, %v2749_v47, %v2745_v43  ;;  %v6221_v10 = vperm.slane %v2721_v28, 0  ;;  %vm2761_vm12 = vweird.f32 %v3708_v51 }
 0x2d4   : > { %vm2778_vm3 = vweird.f32 %v6185_v16  ;;  %vm6224_vm7 = vcmp.eq.f32.partialorder %v2782_v17, 8.507059e+37  ;;  %v2758_v35 = vmul.f32 %v3708_v51, %v2757_v44  ;;  %v2775_v7 = vsub.f32 1.0, %v2774_v3  ;;  %vm2762_vm15 = vmor %vm2760_vm10, %vm2761_vm12 }
 0x2d5   : > { %v3712_v13 = vpop.eup %3711  ;;  %v2785_v60 = vor.u32 1.1754944e-38, %v2784_v34  ;;  %vm2796_vm9 = vweird.f32 %v6190_v59  ;;  %v2802_v31 = vand.u32 2147483648, %v6190_v59  ;;  %v6230_v40 = vperm.slane %v2728_v19, 0 }
 0x2d6   : > { %v6233_v8 = vmul.f32 %v6028_v39, %v2750_v12  ;;  %vm2779_vm13 = vweird.f32 %v3710_v41  ;;  %v2792_v32 = vmul.f32 %v3712_v13, %v6190_v59  ;;  %v2759_v47 = vadd.f32 %v3708_v51, %v2758_v35 }
 0x2d7   : > { %v2776_v17 = vmul.f32 %v3710_v41, %v2775_v7  ;;  %vm6236_vm14 = vcmp.eq.f32.partialorder %v2800_v4, 8.507059e+37  ;;  %v2820_v1 = vand.u32 2147483648, %v6201_v54  ;;  %3715 = vrcp.f32 %v6206_v55  ;;  %vm2780_vm1 = vmor %vm2778_vm3, %vm2779_vm13 }
 0x2d8   : > { %v6243_v25 = vmul.f32 %v6030_v61, %v2750_v12  ;;  %v6246_v58 = vmul.f32 %v6032_v11, %v2750_v12  ;;  %v2793_v39 = vsub.f32 1.0, %v2792_v32  ;;  %v2818_v34 = vand.u32 2147483647, %v6201_v54  ;;  %v3714_v19 = vpop.eup %3713 }
 0x2d9   : > { %v6253_v43 = vmul.f32 %v6034_v36, %v2750_v12  ;;  %v2763_v44 = vsel %vm2762_vm15, %v3708_v51, %v2759_v47  ;;  %v2777_v3 = vadd.f32 %v3710_v41, %v2776_v17  ;;  %v2803_v4 = vor.u32 1.1754944e-38, %v2802_v31 }
 0x2da   : > { %v2768_v61 = vsel %vm6211_vm11, %v2767_v20, %v2763_v44  ;;  %v2794_v35 = vmul.f32 %v3712_v13, %v2793_v39  ;;  %v2810_v11 = vmul.f32 %v3714_v19, %v6201_v54  ;;  %v2838_v7 = vand.u32 2147483648, %v6206_v55 }
 0x2db   : > { %vm2797_vm8 = vweird.f32 %v3712_v13  ;;  %vm2814_vm2 = vweird.f32 %v6201_v54  ;;  %v2821_v36 = vor.u32 1.1754944e-38, %v2820_v1  ;;  %v2836_v62 = vand.u32 2147483647, %v6206_v55 }
 0x2dc   : > { %v2781_v51 = vsel %vm2780_vm1, %v3710_v41, %v2777_v3  ;;  %v2795_v12 = vadd.f32 %v3712_v13, %v2794_v35  ;;  %v2811_v31 = vsub.f32 1.0, %v2810_v11  ;;  %vm2815_vm0 = vweird.f32 %v3714_v19  ;;  %vm2798_vm5 = vmor %vm2796_vm9, %vm2797_vm8 }
 0x2dd   : > { %vm6264_vm4 = vcmp.eq.f32.partialorder %v2818_v34, 8.507059e+37  ;;  %v6268_v20 = vpop.eup %3715  ;;  %v6271_v32 = vmul.f32 %v6038_v21, %v2768_v61  ;;  %v6274_v16 = vmul.f32 %v6042_v48, %v2768_v61  ;;  %v2786_v47 = vsel %vm6224_vm7, %v2785_v60, %v2781_v51  ;;  %vm2816_vm12 = vmor %vm2814_vm2, %vm2815_vm0 }
 0x2de   : > { %3717 = vrcp.f32 %v6221_v10  ;;  %v6280_v41 = vmul.f32 %v6049_v38, %v2768_v61  ;;  %v6283_v17 = vmul.f32 %v6055_v46, %v2768_v61  ;;  %v6286_v1 = vmul.f32 %v6061_v6, %v2786_v47 }
 0x2df   : > { %v2839_v21 = vor.u32 1.1754944e-38, %v2838_v7  ;;  %v6292_v48 = vmul.f32 %v6067_v18, %v2786_v47  ;;  %v2799_v33 = vsel %vm2798_vm5, %v3712_v13, %v2795_v12  ;;  %v2812_v60 = vmul.f32 %v3714_v19, %v2811_v31 }
 0x2e0   : > { %v2828_v38 = vmul.f32 %v6268_v20, %v6206_v55  ;;  %vm2832_vm6 = vweird.f32 %v6206_v55  ;;  %v6298_v46 = vmul.f32 %v6072_v9, %v2786_v47  ;;  %v2804_v6 = vsel %vm6236_vm14, %v2803_v4, %v2799_v33 }
 0x2e1   : > { %v2856_v59 = vand.u32 2147483648, %v6221_v10  ;;  %3719 = vrcp.f32 %v6230_v40  ;;  %v6305_v18 = vmul.f32 %v6078_v57, %v2786_v47  ;;  %v6308_v13 = vmul.f32 %v6082_v24, %v2804_v6 }
 0x2e2   : > { %vm2833_vm10 = vweird.f32 %v6268_v20  ;;  %vm6311_vm11 = vcmp.eq.f32.partialorder %v2836_v62, 8.507059e+37  ;;  %v2854_v9 = vand.u32 2147483647, %v6221_v10  ;;  %v6317_v28 = vmul.f32 %v6087_v37, %v2804_v6 }
 0x2e3   : > { %v6320_v34 = vmul.f32 %v6093_v2, %v2804_v6  ;;  %v2813_v44 = vadd.f32 %v3714_v19, %v2812_v60  ;;  %v2829_v57 = vsub.f32 1.0, %v2828_v38  ;;  %v6323_v24 = vmul.f32 %v6097_v45, %v2804_v6  ;;  %vm2834_vm15 = vmor %vm2832_vm6, %vm2833_vm10 }
 0x2e4   : > { %v3718_v3 = vpop.eup %3717  ;;  %v2857_v4 = vor.u32 1.1754944e-38, %v2856_v59  ;;  %v2872_v61 = vand.u32 2147483647, %v6230_v40  ;;  %v2874_v35 = vand.u32 2147483648, %v6230_v40  ;;  %vm2850_vm3 = vweird.f32 %v6221_v10 }
 0x2e5   : > { %v2817_v37 = vsel %vm2816_vm12, %v3714_v19, %v2813_v44  ;;  %v2830_v11 = vmul.f32 %v6268_v20, %v2829_v57  ;;  %v2846_v2 = vmul.f32 %v3718_v3, %v6221_v10  ;;  %v2881_v7 = vperm.slane %v6233_v8, 0  ;;  %v7390_v8 = vld [vmem:[#allocation22_spill] sm:$0xff] }
 0x2e6   : > { %v2822_v45 = vsel %vm6264_vm4, %v2821_v36, %v2817_v37  ;;  %vm2851_vm7 = vweird.f32 %v3718_v3  ;;  %v2875_v54 = vor.u32 1.1754944e-38, %v2874_v35  ;;  %v2882_v62 = vperm.slane %v6243_v25, 0 }
 0x2e7   : > { %v3720_v51 = vpop.eup %3719  ;;  %v6338_v12 = vmul.f32 %v6101_v22, %v2822_v45  ;;  %v6341_v19 = vmul.f32 %v6106_v23, %v2822_v45  ;;  %v6344_v31 = vmul.f32 %v6109_v42, %v2822_v45  ;;  %v6347_v47 = vmul.f32 %v6114_v26, %v2822_v45  ;;  %vm2852_vm8 = vmor %vm2850_vm3, %vm2851_vm7  ;;  %v7421_v45 = vld [vmem:[#allocation37_spill] sm:$0xff] }
 0x2e8   : > { %vm6349_vm9 = vcmp.eq.f32.partialorder %v2854_v9, 8.507059e+37  ;;  %v2831_v36 = vadd.f32 %v6268_v20, %v2830_v11  ;;  %v2847_v33 = vsub.f32 1.0, %v2846_v2  ;;  %v2864_v60 = vmul.f32 %v3720_v51, %v6230_v40 }
 0x2e9   : > { %vm2868_vm13 = vweird.f32 %v6230_v40  ;;  %vm2869_vm14 = vweird.f32 %v3720_v51  ;;  %v2883_v22 = vperm.slane %v6246_v58, 0  ;;  %v2884_v23 = vperm.slane %v6253_v43, 0 }
 0x2ea   : > { %v2885_v42 = vperm.slane %v6271_v32, 0  ;;  %v2886_v26 = vperm.slane %v6274_v16, 0  ;;  %v2835_v38 = vsel %vm2834_vm15, %v6268_v20, %v2831_v36  ;;  %v2848_v6 = vmul.f32 %v3718_v3, %v2847_v33  ;;  %vm2870_vm2 = vmor %vm2868_vm13, %vm2869_vm14  ;;  %v7382_v33 = vld [vmem:[#allocation6_spill] sm:$0xff]  ;;  %v7407_v32 = vld [vmem:[#allocation12_spill] sm:$0xff] }
 0x2eb   : > { %v2865_v59 = vsub.f32 1.0, %v2864_v60  ;;  %vm6365_vm1 = vcmp.eq.f32.partialorder %v2872_v61, 8.507059e+37  ;;  %v2887_v44 = vperm.slane %v6280_v41, 0  ;;  %v2840_v55 = vsel %vm6311_vm11, %v2839_v21, %v2835_v38  ;;  %v7384_v38 = vld [vmem:[#allocation10_spill] sm:$0xff] }
 0x2ec   : > { %v2888_v58 = vperm.slane %v6283_v17, 0  ;;  %v2889_v43 = vperm.slane %v6286_v1, 0  ;;  %v2890_v57 = vperm.slane %v6292_v48, 0  ;;  %v6376_v35 = vmul.f32 %v6121_v63, %v2840_v55  ;;  %v7419_v48 = vld [vmem:[#allocation29_spill] sm:$0xff] }
 0x2ed   : > { %v6379_v20 = vmul.f32 %v6127_v0, %v2840_v55  ;;  %v6382_v61 = vmul.f32 %v6132_v5, %v2840_v55  ;;  %v6385_v41 = vmul.f32 %v6137_v15, %v2840_v55  ;;  %v2849_v39 = vadd.f32 %v3718_v3, %v2848_v6  ;;  %v7388_v55 = vld [vmem:[#allocation18_spill] sm:$0xff] }
 0x2ee   : > { %v2866_v21 = vmul.f32 %v3720_v51, %v2865_v59  ;;  %v2891_v17 = vperm.slane %v6298_v46, 0  ;;  %v2892_v1 = vperm.slane %v6305_v18, 0  ;;  %v2893_v63 = vperm.slane %v6308_v13, 0 }
 0x2ef   : > { %v2894_v0 = vperm.slane %v6317_v28, 0  ;;  %v2895_v5 = vperm.slane %v6320_v34, 0  ;;  %v2896_v37 = vperm.slane %v6323_v24, 0  ;;  %v2853_v15 = vsel %vm2852_vm8, %v3718_v3, %v2849_v39  ;;  %v7394_v39 = vld [vmem:[#allocation30_spill] sm:$0xff] }
 0x2f0   : > { %v2867_v11 = vadd.f32 %v3720_v51, %v2866_v21  ;;  %v2897_v2 = vperm.slane %v6338_v12, 0  ;;  %v2898_v46 = vperm.slane %v6341_v19, 0  ;;  %v2858_v18 = vsel %vm6349_vm9, %v2857_v4, %v2853_v15  ;;  %v7396_v15 = vld [vmem:[#allocation34_spill] sm:$0xff] }
 0x2f1   : > { %v2899_v10 = vperm.slane %v6344_v31, 0  ;;  %v6404_v28 = vmul.f32 %v6141_v49, %v2858_v18  ;;  %v6407_v34 = vmul.f32 %v6147_v50, %v2858_v18  ;;  %v6410_v3 = vmul.f32 %v6150_v14, %v2858_v18 }
 0x2f2   : > { %v6413_v24 = vmul.f32 %v6154_v30, %v2858_v18  ;;  %v2871_v4 = vsel %vm2870_vm2, %v3720_v51, %v2867_v11  ;;  %v2902_v12 = vperm.slane %v6379_v20, 0  ;;  %v2903_v19 = vperm.slane %v6382_v61, 0  ;;  %v7392_v61 = vld [vmem:[#allocation26_spill] sm:$0xff]  ;;  %v7398_v18 = vld [vmem:[#allocation7_spill] sm:$0xff]  ;;  %v7418_v30 = vld [vmem:[#allocation25_spill] sm:$0xff] }
 0x2f3   : > { %7381 = vst [vmem:[#allocation102_spill] sm:$0xff] %v6410_v3  ;;  %v2904_v49 = vperm.slane %v6385_v41, 0  ;;  %v2876_v50 = vsel %vm6365_vm1, %v2875_v54, %v2871_v4  ;;  %v2905_v14 = vperm.slane %v6404_v28, 0  ;;  %v2906_v31 = vperm.slane %v6407_v34, 0  ;;  %v7399_v34 = vld [vmem:[#allocation11_spill] sm:$0xff]  ;;  %v7443_v3 = vld [vmem:[#allocation44_spill] sm:$0xff] }
 0x2f4   : > { %v6427_v27 = vmul.f32 %v6160_v29, %v2876_v50  ;;  %v6430_v40 = vmul.f32 %v6165_v56, %v2876_v50  ;;  %v6433_v51 = vmul.f32 %v6168_v53, %v2876_v50  ;;  %v6436_v36 = vmul.f32 %v6172_v52, %v2876_v50  ;;  %v7386_v56 = vld [vmem:[#allocation14_spill] sm:$0xff]  ;;  %v7402_v50 = vld [vmem:[#allocation23_spill] sm:$0xff] }
 0x2f5   : > { %v2908_v54 = vperm.slane %v6413_v24, 0  ;;  %v6442_v60 = vmul.f32 %v2881_v7, %v7382_v33  ;;  %v6447_v29 = vmul.f32 %v2881_v7, %v7384_v38  ;;  %v6452_v53 = vmul.f32 %v2882_v62, %v7386_v56  ;;  %v7405_v33 = vld [vmem:[#allocation35_spill] sm:$0xff]  ;;  %v7406_v56 = vld [vmem:[#allocation8_spill] sm:$0xff] }
 0x2f6   : > { %v2909_v52 = vperm.slane %v6427_v27, 0  ;;  %v2910_v6 = vperm.slane %v6430_v40, 0  ;;  %v2911_v59 = vperm.slane %v6433_v51, 0  ;;  %v2912_v9 = vperm.slane %v6436_v36, 0  ;;  %v7404_v51 = vld [vmem:[#allocation31_spill] sm:$0xff] }
 0x2f7   : > { %7383 = vst [vmem:[#allocation103_spill] sm:$0xff] %v6442_v60  ;;  %v6461_v20 = vmul.f32 %v2882_v62, %v7388_v55  ;;  %v6464_v7 = vmul.f32 %v2883_v22, %v7390_v8  ;;  %v6467_v41 = vmul.f32 %v2883_v22, %v7392_v61  ;;  %v6470_v21 = vmul.f32 %v2884_v23, %v7394_v39  ;;  %v7400_v62 = vld [vmem:[#allocation15_spill] sm:$0xff]  ;;  %v7408_v8 = vld [vmem:[#allocation16_spill] sm:$0xff] }
 0x2f8   : > { %7385 = vst [vmem:[#allocation104_spill] sm:$0xff] %v6447_v29  ;;  %v6473_v11 = vmul.f32 %v2884_v23, %v7396_v15  ;;  %v2921_v28 = vmul.f32 %v2885_v42, %v7398_v18  ;;  %v2922_v25 = vmul.f32 %v2885_v42, %v7399_v34  ;;  %v2923_v24 = vmul.f32 %v2886_v26, %v7400_v62  ;;  %v7401_v22 = vld [vmem:[#allocation19_spill] sm:$0xff]  ;;  %v7409_v39 = vld [vmem:[#allocation20_spill] sm:$0xff] }
 0x2f9   : > { %7387 = vst [vmem:[#allocation105_spill] sm:$0xff] %v6452_v53  ;;  %v2924_v4 = vmul.f32 %v2886_v26, %v7401_v22  ;;  %v2925_v27 = vmul.f32 %v2887_v44, %v7402_v50  ;;  %v7403_v23 = vld [vmem:[#allocation27_spill] sm:$0xff]  ;;  %v2927_v36 = vmul.f32 %v2888_v58, %v7404_v51  ;;  %v2928_v38 = vmul.f32 %v2888_v58, %v7405_v33  ;;  %v7410_v26 = vld [vmem:[#allocation24_spill] sm:$0xff]  ;;  %v7414_v50 = vld [vmem:[#allocation9_spill] sm:$0xff] }
 0x2fa   : > { %7389 = vst [vmem:[#allocation106_spill] sm:$0xff] %v6461_v20  ;;  %v2926_v40 = vmul.f32 %v2887_v44, %v7403_v23  ;;  %v2929_v55 = vmul.f32 %v2889_v43, %v7406_v56  ;;  %v2930_v42 = vmul.f32 %v2889_v43, %v7407_v32  ;;  %v2931_v61 = vmul.f32 %v2890_v57, %v7408_v8  ;;  %v7411_v18 = vld [vmem:[#allocation28_spill] sm:$0xff]  ;;  %v7415_v51 = vld [vmem:[#allocation13_spill] sm:$0xff]  ;;  %v7439_v53 = vld [vmem:[#allocation59_spill] sm:$0xff] }
 0x2fb   : > { %7391 = vst [vmem:[#allocation107_spill] sm:$0xff] %v6464_v7  ;;  %v2932_v16 = vmul.f32 %v2890_v57, %v7409_v39  ;;  %v2933_v15 = vmul.f32 %v2891_v17, %v7410_v26  ;;  %v2934_v44 = vmul.f32 %v2891_v17, %v7411_v18  ;;  %v7412_v34 = vld [vmem:[#allocation32_spill] sm:$0xff]  ;;  %v2937_v23 = vmul.f32 %v2893_v63, %v7414_v50  ;;  %v7416_v33 = vld [vmem:[#allocation17_spill] sm:$0xff]  ;;  %v7422_v18 = vld [vmem:[#allocation38_spill] sm:$0xff] }
 0x2fc   : > { %7393 = vst [vmem:[#allocation108_spill] sm:$0xff] %v6467_v41  ;;  %v2935_v62 = vmul.f32 %v2892_v1, %v7412_v34  ;;  %v7413_v22 = vld [vmem:[#allocation36_spill] sm:$0xff]  ;;  %v2938_v43 = vmul.f32 %v2893_v63, %v7415_v51  ;;  %v2939_v56 = vmul.f32 %v2894_v0, %v7416_v33  ;;  %v7417_v32 = vld [vmem:[#allocation21_spill] sm:$0xff]  ;;  %v2941_v13 = vmul.f32 %v2895_v5, %v7418_v30  ;;  %v7426_v51 = vld [vmem:[#allocation54_spill] sm:$0xff] }
 0x2fd   : > { %7395 = vst [vmem:[#allocation109_spill] sm:$0xff] %v6470_v21  ;;  %v2936_v58 = vmul.f32 %v2892_v1, %v7413_v22  ;;  %v2940_v8 = vmul.f32 %v2894_v0, %v7417_v32  ;;  %v2942_v57 = vmul.f32 %v2895_v5, %v7419_v48  ;;  %v7420_v39 = vld [vmem:[#allocation33_spill] sm:$0xff]  ;;  %v2944_v17 = vmul.f32 %v2896_v37, %v7421_v45  ;;  %v7424_v22 = vld [vmem:[#allocation46_spill] sm:$0xff]  ;;  %v7432_v45 = vld [vmem:[#allocation39_spill] sm:$0xff] }
 0x2fe   : > { %7397 = vst [vmem:[#allocation110_spill] sm:$0xff] %v6473_v11  ;;  %v2943_v26 = vmul.f32 %v2896_v37, %v7420_v39  ;;  %v2945_v34 = vmul.f32 %v2897_v2, %v7422_v18  ;;  %v7423_v11 = vld [vmem:[#allocation42_spill] sm:$0xff]  ;;  %v2947_v50 = vmul.f32 %v2898_v46, %v7424_v22  ;;  %v2949_v33 = vmul.f32 %v2899_v10, %v7426_v51  ;;  %v7430_v48 = vld [vmem:[#allocation65_spill] sm:$0xff]  ;;  %v7437_v7 = vld [vmem:[#allocation51_spill] sm:$0xff] }
 0x2ff   : > { %v2946_v1 = vmul.f32 %v2897_v2, %v7423_v11  ;;  %v7425_v21 = vld [vmem:[#allocation50_spill] sm:$0xff]  ;;  %v7429_v30 = vperm.slane %v6347_v47, 0  ;;  %v7433_v18 = vperm.slane %v6376_v35, 0  ;;  %v7434_v11 = vld [vmem:[#allocation43_spill] sm:$0xff] }
 0x300   : > { %v2948_v63 = vmul.f32 %v2898_v46, %v7425_v21  ;;  %v7427_v41 = vld [vmem:[#allocation58_spill] sm:$0xff]  ;;  %v7436_v21 = vld [vmem:[#allocation47_spill] sm:$0xff] }
 0x301   : > { %v2950_v0 = vmul.f32 %v2899_v10, %v7427_v41  ;;  %v7428_v32 = vld [vmem:[#allocation62_spill] sm:$0xff]  ;;  %v7431_v39 = vmov %v7429_v30  ;;  %v2953_v2 = vmul.f32 %v7433_v18, %v7432_v45  ;;  %v7435_v22 = vmov %v7433_v18  ;;  %v7438_v41 = vld [vmem:[#allocation55_spill] sm:$0xff]  ;;  %v7444_v18 = vld [vmem:[#allocation48_spill] sm:$0xff] }
 0x302   : > { %v2951_v5 = vmul.f32 %v7429_v30, %v7428_v32  ;;  %v2952_v37 = vmul.f32 %v7431_v39, %v7430_v48  ;;  %v2954_v46 = vmul.f32 %v7435_v22, %v7434_v11  ;;  %v2955_v51 = vmul.f32 %v2902_v12, %v7436_v21  ;;  %v7440_v30 = vld [vmem:[#allocation63_spill] sm:$0xff]  ;;  %v7442_v39 = vld [vmem:[#allocation40_spill] sm:$0xff] }
 0x303   : > { %v2956_v10 = vmul.f32 %v2902_v12, %v7437_v7  ;;  %v2957_v20 = vmul.f32 %v2903_v19, %v7438_v41  ;;  %v2958_v32 = vmul.f32 %v2903_v19, %v7439_v53  ;;  %v2959_v29 = vmul.f32 %v2904_v49, %v7440_v30  ;;  %v7441_v47 = vld [vmem:[#allocation67_spill] sm:$0xff]  ;;  %v7445_v11 = vld [vmem:[#allocation52_spill] sm:$0xff]  ;;  %v7447_v7 = vld [vmem:[#allocation102_spill] sm:$0xff] }
 0x304   : > { %v2960_v48 = vmul.f32 %v2904_v49, %v7441_v47  ;;  %v2961_v60 = vmul.f32 %v2905_v14, %v7442_v39  ;;  %v2962_v45 = vmul.f32 %v2905_v14, %v7443_v3  ;;  %v2963_v35 = vmul.f32 %v2906_v31, %v7444_v18  ;;  %v7446_v21 = vld [vmem:[#allocation56_spill] sm:$0xff]  ;;  %v7453_v14 = vld [vmem:[#allocation41_spill] sm:$0xff] }
 0x305   : > { %v2964_v22 = vmul.f32 %v2906_v31, %v7445_v11  ;;  %v7448_v12 = vperm.slane %v7447_v7, 0  ;;  %v7449_v19 = vld [vmem:[#allocation60_spill] sm:$0xff]  ;;  %v2969_v18 = vmul.f32 %v2909_v52, %v7453_v14  ;;  %v7454_v11 = vld [vmem:[#allocation45_spill] sm:$0xff]  ;;  %v7459_v14 = vld [vmem:[#allocation66_spill] sm:$0xff] }
 0x306   : > { %v7451_v47 = vld [vmem:[#allocation64_spill] sm:$0xff]  ;;  %v2970_v31 = vmul.f32 %v2909_v52, %v7454_v11  ;;  %v7456_v7 = vld [vmem:[#allocation53_spill] sm:$0xff]  ;;  %v2975_v11 = vmul.f32 %v2912_v9, %v7459_v14 }
 0x307   : > { %v2965_v41 = vmul.f32 %v7448_v12, %v7446_v21  ;;  %v7450_v53 = vmov %v7448_v12  ;;  %v2967_v49 = vmul.f32 %v2908_v54, %v7451_v47  ;;  %v7452_v39 = vld [vmem:[#allocation68_spill] sm:$0xff]  ;;  %v7455_v12 = vld [vmem:[#allocation49_spill] sm:$0xff] }
 0x308   : > { %v2966_v30 = vmul.f32 %v7450_v53, %v7449_v19  ;;  %v2968_v3 = vmul.f32 %v2908_v54, %v7452_v39  ;;  %v2971_v21 = vmul.f32 %v2910_v6, %v7455_v12  ;;  %v2972_v19 = vmul.f32 %v2910_v6, %v7456_v7  ;;  %v7457_v53 = vld [vmem:[#allocation57_spill] sm:$0xff]  ;;  %v7461_v6 = vld [vmem:[#allocation103_spill] sm:$0xff] }
 0x309   : > { %v2973_v47 = vmul.f32 %v2911_v59, %v7457_v53  ;;  %v7458_v39 = vld [vmem:[#allocation61_spill] sm:$0xff]  ;;  %v2977_v7 = vadd.f32 %v2921_v28, %v7461_v6  ;;  %v7462_v53 = vld [vmem:[#allocation104_spill] sm:$0xff]  ;;  %v7465_v6 = vld [vmem:[#allocation107_spill] sm:$0xff] }
 0x30a   : > { %v2974_v54 = vmul.f32 %v2911_v59, %v7458_v39  ;;  %v7460_v52 = vld [vmem:[#allocation69_spill] sm:$0xff]  ;;  %v2984_v39 = vadd.f32 %v2922_v25, %v7462_v53  ;;  %v3005_v28 = vadd.f32 %v2925_v27, %v7465_v6  ;;  %v7466_v25 = vld [vmem:[#allocation108_spill] sm:$0xff]  ;;  %v7468_v27 = vld [vmem:[#allocation110_spill] sm:$0xff] }
 0x30b   : > { %v2976_v12 = vmul.f32 %v2912_v9, %v7460_v52  ;;  %v7463_v59 = vld [vmem:[#allocation105_spill] sm:$0xff]  ;;  %v7464_v9 = vld [vmem:[#allocation106_spill] sm:$0xff]  ;;  %v3012_v53 = vadd.f32 %v2926_v40, %v7466_v25  ;;  %v3026_v25 = vadd.f32 %v2928_v38, %v7468_v27 }
 0x30c   : > { %v2991_v14 = vadd.f32 %v2923_v24, %v7463_v59  ;;  %v2998_v52 = vadd.f32 %v2924_v4, %v7464_v9  ;;  %v7467_v24 = vld [vmem:[#allocation109_spill] sm:$0xff]  ;;  %v2978_v4 = vadd.f32 %v2977_v7, %v2929_v55  ;;  %v2985_v9 = vadd.f32 %v2984_v39, %v2930_v42 }
 0x30d   : > { %v3019_v59 = vadd.f32 %v2927_v36, %v7467_v24  ;;  %v3006_v24 = vadd.f32 %v3005_v28, %v2933_v15  ;;  %v3013_v36 = vadd.f32 %v3012_v53, %v2934_v44 }
 0x30e   : > { %v2992_v6 = vadd.f32 %v2991_v14, %v2931_v61  ;;  %v2999_v40 = vadd.f32 %v2998_v52, %v2932_v16  ;;  %v2979_v55 = vadd.f32 %v2978_v4, %v2937_v23  ;;  %v2986_v39 = vadd.f32 %v2985_v9, %v2938_v43 }
 0x30f   : > { %v3020_v7 = vadd.f32 %v3019_v59, %v2935_v62  ;;  %v3027_v14 = vadd.f32 %v3026_v25, %v2936_v58  ;;  %v3007_v27 = vadd.f32 %v3006_v24, %v2941_v13  ;;  %v3014_v38 = vadd.f32 %v3013_v36, %v2942_v57 }
 0x310   : > { %v2993_v42 = vadd.f32 %v2992_v6, %v2939_v56  ;;  %v3000_v61 = vadd.f32 %v2999_v40, %v2940_v8  ;;  %v2980_v52 = vadd.f32 %v2979_v55, %v2945_v34  ;;  %v2987_v15 = vadd.f32 %v2986_v39, %v2946_v1 }
 0x311   : > { %v3021_v16 = vadd.f32 %v3020_v7, %v2943_v26  ;;  %v3028_v44 = vadd.f32 %v3027_v14, %v2944_v17  ;;  %v3008_v59 = vadd.f32 %v3007_v27, %v2949_v33  ;;  %v3015_v62 = vadd.f32 %v3014_v38, %v2950_v0 }
 0x312   : > { %v2994_v28 = vadd.f32 %v2993_v42, %v2947_v50  ;;  %v3001_v53 = vadd.f32 %v3000_v61, %v2948_v63  ;;  %v2981_v23 = vadd.f32 %v2980_v52, %v2953_v2  ;;  %v2988_v9 = vadd.f32 %v2987_v15, %v2954_v46 }
 0x313   : > { %v3022_v4 = vadd.f32 %v3021_v16, %v2951_v5  ;;  %v3029_v6 = vadd.f32 %v3028_v44, %v2952_v37  ;;  %v3009_v25 = vadd.f32 %v3008_v59, %v2957_v20  ;;  %v3016_v58 = vadd.f32 %v3015_v62, %v2958_v32 }
 0x314   : > { %v2995_v43 = vadd.f32 %v2994_v28, %v2955_v51  ;;  %v3002_v56 = vadd.f32 %v3001_v53, %v2956_v10  ;;  %v2982_v40 = vadd.f32 %v2981_v23, %v2961_v60  ;;  %v2989_v13 = vadd.f32 %v2988_v9, %v2962_v45 }
 0x315   : > { %v3023_v8 = vadd.f32 %v3022_v4, %v2959_v29  ;;  %v3030_v26 = vadd.f32 %v3029_v6, %v2960_v48  ;;  %v3010_v1 = vadd.f32 %v3009_v25, %v2965_v41  ;;  %v3017_v50 = vadd.f32 %v3016_v58, %v2966_v30 }
 0x316   : > { %v2996_v57 = vadd.f32 %v2995_v43, %v2963_v35  ;;  %v3003_v34 = vadd.f32 %v3002_v56, %v2964_v22  ;;  %v6563_v63 = vadd.f32 %v2982_v40, %v2969_v18  ;;  %v6565_v33 = vadd.f32 %v2989_v13, %v2970_v31 }
 0x317   : > { %v3024_v17 = vadd.f32 %v3023_v8, %v2967_v49  ;;  %v3031_v5 = vadd.f32 %v3030_v26, %v2968_v3  ;;  %v6571_v20 = vadd.f32 %v3010_v1, %v2973_v47  ;;  %v6573_v29 = vadd.f32 %v3017_v50, %v2974_v54 }
 0x318   : > { %v6567_v0 = vadd.f32 %v2996_v57, %v2971_v21  ;;  %v6569_v37 = vadd.f32 %v3003_v34, %v2972_v19  ;;  %v3033_v46 = vmul.f32 %v6563_v63, %v6563_v63  ;;  %v3034_v51 = vmul.f32 %v6565_v33, %v6565_v33 }
 0x319   : > { %v6575_v60 = vadd.f32 %v3024_v17, %v2975_v11  ;;  %v6577_v2 = vadd.f32 %v3031_v5, %v2976_v12  ;;  %v3037_v48 = vmul.f32 %v6571_v20, %v6571_v20  ;;  %v3038_v45 = vmul.f32 %v6573_v29, %v6573_v29 }
 0x31a   : > { %v3035_v10 = vmul.f32 %v6567_v0, %v6567_v0  ;;  %v3036_v32 = vmul.f32 %v6569_v37, %v6569_v37  ;;  %v3041_v41 = vadd.f32 %v3034_v51, %v3033_v46 }
 0x31b   : > { %v3039_v35 = vmul.f32 %v6575_v60, %v6575_v60  ;;  %v3040_v22 = vmul.f32 %v6577_v2, %v6577_v2  ;;  %v3055_v49 = vadd.f32 %v3038_v45, %v3037_v48 }
 0x31c   : > { %v3048_v30 = vadd.f32 %v3036_v32, %v3035_v10  ;;  %v3042_v3 = vrot.slane %v3041_v41, 4 }
 0x31d   : > { %v3062_v18 = vadd.f32 %v3040_v22, %v3039_v35  ;;  %v3056_v21 = vrot.slane %v3055_v49, 4 }
 0x31e   : > { %v3049_v31 = vrot.slane %v3048_v30, 4  ;;  %v3043_v19 = vadd.f32 %v3042_v3, %v3041_v41 }
 0x31f   : > { %v3063_v47 = vrot.slane %v3062_v18, 4  ;;  %v3057_v11 = vadd.f32 %v3056_v21, %v3055_v49 }
 0x320   : > { %v3050_v54 = vadd.f32 %v3049_v31, %v3048_v30  ;;  %v3044_v12 = vrot.slane %v3043_v19, 2 }
 0x321   : > { %v3064_v24 = vadd.f32 %v3063_v47, %v3062_v18  ;;  %v3058_v7 = vrot.slane %v3057_v11, 2 }
 0x322   : > { %v3051_v36 = vrot.slane %v3050_v54, 2  ;;  %v3045_v55 = vadd.f32 %v3044_v12, %v3043_v19 }
 0x323   : > { %v3065_v39 = vrot.slane %v3064_v24, 2  ;;  %v3059_v14 = vadd.f32 %v3058_v7, %v3057_v11 }
 0x324   : > { %v3052_v42 = vadd.f32 %v3051_v36, %v3050_v54  ;;  %v3046_v61 = vrot.slane %v3045_v55, 1 }
 0x325   : > { %v3066_v27 = vadd.f32 %v3065_v39, %v3064_v24  ;;  %v3060_v16 = vrot.slane %v3059_v14, 1 }
 0x326   : > { %v3053_v38 = vrot.slane %v3052_v42, 1  ;;  %v6595_v52 = vadd.f32 %v3046_v61, %v3045_v55 }
 0x327   : > { %v3067_v15 = vrot.slane %v3066_v27, 1  ;;  %v6599_v44 = vadd.f32 %v3060_v16, %v3059_v14 }
 0x328   : > { %v6597_v28 = vadd.f32 %v3053_v38, %v3052_v42  ;;  %v3069_v59 = vadd.f32 1.0, %v6595_v52  ;;  %v6613_v9 = vadd.f32 1e-08, %v6595_v52 }
 0x329   : > { %v6601_v53 = vadd.f32 %v3067_v15, %v3066_v27  ;;  %v6606_v4 = vadd.f32 1.0, %v6599_v44  ;;  %v6620_v25 = vadd.f32 1e-08, %v6599_v44 }
 0x32a   : > { %v3070_v62 = vadd.f32 1.0, %v6597_v28  ;;  %3721 = vrcp.f32 %v3069_v59  ;;  %v3084_v43 = vand.u32 2147483648, %v3069_v59  ;;  %v6616_v6 = vadd.f32 1e-08, %v6597_v28 }
 0x32b   : > { %v6609_v23 = vadd.f32 1.0, %v6601_v53  ;;  %v3082_v56 = vand.u32 2147483647, %v3069_v59  ;;  %vm3078_vm0 = vweird.f32 %v3069_v59  ;;  %v6624_v34 = vadd.f32 1e-08, %v6601_v53 }
 0x32c   : > { %3723 = vrcp.f32 %v3070_v62  ;;  %v3097_v58 = vand.u32 2147483647, %v3070_v62  ;;  %v3099_v8 = vand.u32 2147483648, %v3070_v62  ;;  %vm3093_vm4 = vweird.f32 %v3070_v62 }
 0x32d   : > { %3725 = vrcp.f32 %v6606_v4  ;;  %v3085_v26 = vor.u32 1.1754944e-38, %v3084_v43  ;;  %vm6629_vm5 = vcmp.eq.f32.partialorder %v3082_v56, 8.507059e+37  ;;  %vm3108_vm6 = vweird.f32 %v6606_v4 }
 0x32e   : > { %3727 = vrcp.f32 %v6609_v23  ;;  %v3112_v5 = vand.u32 2147483647, %v6606_v4  ;;  %v3114_v46 = vand.u32 2147483648, %v6606_v4  ;;  %vm6637_vm10 = vcmp.eq.f32.partialorder %v3097_v58, 8.507059e+37 }
 0x32f   : > { %3729 = vrsqrt.f32 %v6613_v9  ;;  %v3100_v32 = vor.u32 1.1754944e-38, %v3099_v8  ;;  %vm3123_vm12 = vweird.f32 %v6609_v23  ;;  %v3127_v22 = vand.u32 2147483647, %v6609_v23 }
 0x330   : > { %v3722_v40 = vpop.eup %3721  ;;  %3731 = vrsqrt.f32 %v6616_v6  ;;  %vm6652_vm7 = vcmp.eq.f32.partialorder %v3112_v5, 8.507059e+37  ;;  %v3115_v21 = vor.u32 1.1754944e-38, %v3114_v46  ;;  %v3129_v55 = vand.u32 2147483648, %v6609_v23 }
 0x331   : > { %v3074_v57 = vmul.f32 %v3722_v40, %v3069_v59  ;;  %3733 = vrsqrt.f32 %v6620_v25  ;;  %vm3079_vm11 = vweird.f32 %v3722_v40  ;;  %vm6691_vm8 = vcmp.eq.f32.partialorder %v3127_v22, 8.507059e+37 }
 0x332   : > { %v3724_v13 = vpop.eup %3723  ;;  %3735 = vrsqrt.f32 %v6624_v34  ;;  %vm6663_vm9 = vmor %vm3078_vm0, %vm3079_vm11  ;;  %vm3143_vm2 = vweird.f32 %v6613_v9 }
 0x333   : > { %v6627_v1 = vpop.eup %3725  ;;  %v3089_v17 = vmul.f32 %v3724_v13, %v3070_v62  ;;  %v3075_v51 = vsub.f32 1.0, %v3074_v57  ;;  %vm3094_vm3 = vweird.f32 %v3724_v13 }
 0x334   : > { %v3104_v48 = vmul.f32 %v6627_v1, %v6606_v4  ;;  %v6643_v45 = vpop.eup %3727  ;;  %vm3109_vm13 = vweird.f32 %v6627_v1  ;;  %vm3095_vm14 = vmor %vm3093_vm4, %vm3094_vm3  ;;  %vm3163_vm3 = vweird.f32 %v6620_v25 }
 0x335   : > { %v3090_v35 = vsub.f32 1.0, %v3089_v17  ;;  %v3076_v41 = vmul.f32 %v3722_v40, %v3075_v51  ;;  %v3119_v49 = vmul.f32 %v6643_v45, %v6609_v23  ;;  %v6650_v3 = vpop.eup %3729  ;;  %vm3124_vm15 = vweird.f32 %v6643_v45  ;;  %vm6686_vm1 = vmor %vm3108_vm6, %vm3109_vm13 }
 0x336   : > { %v3105_v30 = vsub.f32 1.0, %v3104_v48  ;;  %v3732_v19 = vpop.eup %3731  ;;  %v3138_v12 = vmul.f32 %v6650_v3, %v6613_v9  ;;  %vm6703_vm0 = vmor %vm3123_vm12, %vm3124_vm15  ;;  %vm3144_vm4 = vweird.f32 %v6650_v3  ;;  %vm3173_vm13 = vweird.f32 %v6624_v34 }
 0x337   : > { %v3091_v18 = vmul.f32 %v3724_v13, %v3090_v35  ;;  %v3077_v47 = vadd.f32 %v3722_v40, %v3076_v41  ;;  %v3120_v11 = vsub.f32 1.0, %v3119_v49  ;;  %v6659_v24 = vpop.eup %3733  ;;  %v3148_v39 = vmul.f32 %v3732_v19, %v6616_v6  ;;  %vm6721_vm6 = vmor %vm3143_vm2, %vm3144_vm4 }
 0x338   : > { %v3106_v54 = vmul.f32 %v6627_v1, %v3105_v30  ;;  %v3139_v27 = vmul.f32 %v6650_v3, %v3138_v12  ;;  %v3158_v15 = vmul.f32 %v6659_v24, %v6620_v25  ;;  %v6680_v59 = vpop.eup %3735  ;;  %vm3164_vm12 = vweird.f32 %v6659_v24 }
 0x339   : > { %v3092_v7 = vadd.f32 %v3724_v13, %v3091_v18  ;;  %v3081_v42 = vsel %vm6663_vm9, %v3722_v40, %v3077_v47  ;;  %v3121_v61 = vmul.f32 %v6643_v45, %v3120_v11  ;;  %v3149_v16 = vmul.f32 %v3732_v19, %v3148_v39 }
 0x33a   : > { %v3107_v14 = vadd.f32 %v6627_v1, %v3106_v54  ;;  %v3086_v43 = vsel %vm6629_vm5, %v3085_v26, %v3081_v42  ;;  %v3140_v4 = vmul.f32 0.5, %v3139_v27  ;;  %v3130_v26 = vor.u32 1.1754944e-38, %v3129_v55 }
 0x33b   : > { %v3096_v38 = vsel %vm3095_vm14, %v3724_v13, %v3092_v7  ;;  %v3122_v56 = vadd.f32 %v6643_v45, %v3121_v61  ;;  %v3150_v13 = vmul.f32 0.5, %v3149_v16  ;;  %vm3154_vm5 = vweird.f32 %v3732_v19 }
 0x33c   : > { %v3101_v8 = vsel %vm6637_vm10, %v3100_v32, %v3096_v38  ;;  %v3111_v40 = vsel %vm6686_vm1, %v6627_v1, %v3107_v14  ;;  %v3159_v50 = vmul.f32 %v6659_v24, %v3158_v15  ;;  %v3141_v1 = vsub.f32 1.5, %v3140_v4 }
 0x33d   : > { %v3126_v17 = vsel %vm6703_vm0, %v6643_v45, %v3122_v56  ;;  %v3151_v5 = vsub.f32 1.5, %v3150_v13  ;;  %v3168_v23 = vmul.f32 %v6680_v59, %v6624_v34  ;;  %v3087_v46 = vmul.f32 %v3086_v43, %v6595_v52 }
 0x33e   : > { %v3102_v51 = vmul.f32 %v3101_v8, %v6597_v28  ;;  %v3116_v10 = vsel %vm6652_vm7, %v3115_v21, %v3111_v40  ;;  %v3160_v32 = vmul.f32 0.5, %v3159_v50  ;;  %v3142_v48 = vmul.f32 %v6650_v3, %v3141_v1  ;;  %vm3165_vm7 = vmor %vm3163_vm3, %vm3164_vm12 }
 0x33f   : > { %v3152_v35 = vmul.f32 %v3732_v19, %v3151_v5  ;;  %vm3153_vm10 = vweird.f32 %v6616_v6  ;;  %v3169_v52 = vmul.f32 %v6680_v59, %v3168_v23  ;;  %v3131_v28 = vsel %vm6691_vm8, %v3130_v26, %v3126_v17 }
 0x340   : > { %vm3155_vm11 = vmor %vm3153_vm10, %vm3154_vm5  ;;  %v3161_v22 = vsub.f32 1.5, %v3160_v32  ;;  %v3117_v9 = vmul.f32 %v3116_v10, %v6599_v44  ;;  %v3146_v41 = vsel %vm6721_vm6, %v6650_v3, %v3142_v48  ;;  %v3132_v21 = vmul.f32 %v3131_v28, %v6601_v53 }
 0x341   : > { %v3156_v30 = vsel %vm3155_vm11, %v3732_v19, %v3152_v35  ;;  %v3170_v49 = vmul.f32 0.5, %v3169_v52  ;;  %v3177_v18 = vmul.f32 %v3146_v41, %v3087_v46  ;;  %vm3174_vm9 = vweird.f32 %v6680_v59 }
 0x342   : > { %v3162_v6 = vmul.f32 %v6659_v24, %v3161_v22  ;;  %v3178_v31 = vmul.f32 %v3156_v30, %v3102_v51  ;;  %vm3175_vm14 = vmor %vm3173_vm13, %vm3174_vm9 }
 0x343   : > { %v3171_v47 = vsub.f32 1.5, %v3170_v49  ;;  %v3181_v3 = vmul.f32 %v3177_v18, %v6563_v63  ;;  %v3182_v19 = vmul.f32 %v3177_v18, %v6565_v33 }
 0x344   : > { %v3166_v44 = vsel %vm3165_vm7, %v6659_v24, %v3162_v6  ;;  %v3183_v54 = vmul.f32 %v3178_v31, %v6567_v0  ;;  %v3184_v11 = vmul.f32 %v3178_v31, %v6569_v37 }
 0x345   : > { %v3172_v25 = vmul.f32 %v6680_v59, %v3171_v47  ;;  %v3179_v53 = vmul.f32 %v3166_v44, %v3117_v9  ;;  %3189 = vst [vmem:[%s212_s26] sm:$0xff] %v3181_v3 }
 0x346   : > { %3190 = vst [vmem:[%s212_s26 + $0x8] sm:$0xff] %v3182_v19 }
 0x347   : > { %v3176_v63 = vsel %vm3175_vm14, %v6680_v59, %v3172_v25  ;;  %v3185_v33 = vmul.f32 %v3179_v53, %v6571_v20  ;;  %v3186_v0 = vmul.f32 %v3179_v53, %v6573_v29  ;;  %3191 = vst [vmem:[%s212_s26 + $0x10] sm:$0xff] %v3183_v54 }
 0x348   : > { %v3180_v12 = vmul.f32 %v3176_v63, %v3132_v21  ;;  %3192 = vst [vmem:[%s212_s26 + $0x18] sm:$0xff] %v3184_v11 }
 0x349   : > { %3193 = vst [vmem:[%s212_s26 + $0x20] sm:$0xff] %v3185_v33 }
 0x34a   : > { %v3187_v37 = vmul.f32 %v3180_v12, %v6575_v60  ;;  %v3188_v34 = vmul.f32 %v3180_v12, %v6577_v2  ;;  %3194 = vst [vmem:[%s212_s26 + $0x28] sm:$0xff] %v3186_v0 }
 0x34c   : > { %3195 = vst [vmem:[%s212_s26 + $0x30] sm:$0xff] %v3187_v37 }
 0x34d   : > { %3196 = vst [vmem:[%s212_s26 + $0x38] sm:$0xff] %v3188_v34 }
 0x34e   : > { %3764 = shalt.err (!%p3761_p5)
}
 0x34f   : > { %s3802_s28 = smov 128   ;;  %s3803_s16 = smov 256  }
 0x350   : > { %s3804_s17 = smov 8  }
 0x351   : > { %3484 = dma.vmem_to_hbm [thread:$0]  (%p3858_p6), %s6757_s27, 1024, %s3212_s29, %s3198_s30, %s3802_s28, %s3803_s16, %s3804_s17  }
 0x352 PF: > { %s3226_s21 = sand.u32 1, %s3787_s9   ;;  %p3487_p7 = pnand %p3282_p9, %p3862_p8 }
 0x353   : > { %s3227_s22 = scalar_lea.sflag [#allocation4], %s3226_s21 }
 0x354   : > { %p3488_p10 = pneg %p3487_p7 }
 0x356   : > { %3782 = dma.done.wait (%p3488_p10), %s3227_s22, 1024  }
 0x357   : > { %3784 = vsyncadd (%p3488_p10), %s3227_s22, 4294966272  ;;  %p12_p11 = scmp.ge.s32.totalorder %s3843_s15, 4   ;;  %s7485_s9 = smov %s3791_s10 }
 0x358   : > { %s7486_s10 = smov %s3795_s11  ;;  %s7487_s11 = smov %s3856_s18 }
 0x359   : > { %s7488_s12 = smov %s3843_s15  ;;  %14 = sbr.rel (!%p12_p11) target bundleno = 3 (0x3), region = 109 }
 0x35e   :  { %3233 = vsyncpa [#allocation4], 1 }
 0x35f   :  { %3235 = vsyncpa [#allocation4 + $0x1], 1 }

</bundles_post_ra>
